<compile_context>
chip_gen: v5e
topology: v5e:2x2
jax: 0.10.0
libtpu: 0.0.40
codegen_flags: <defaults>
</compile_context>

<pallas_src>
import functools

import jax
import jax.numpy as jnp
from jax.experimental import pallas as pl
from jax.experimental.pallas import tpu as pltpu

BN_EPS = 1e-5
ENC_WIDTH = 128        # ResNetEncoder block width (blocks_size kwarg is swallowed)
HEAD_LANES = 128       # merged head row: [hidden | policy | value | zero pad]


# ---------------------------------------------------------------------------
# Fused forward kernel (one batch element per grid step).
# ---------------------------------------------------------------------------
def _make_kernel(h, w, hid_size, n_classes):
    m = h * w

    def kernel(
        xpad_ref,        # (1, H+2, W+2, CIN_P) bf16  halo-padded NHWC input
        hid_ref,         # (1, HID, 1)          f32   hidden state (as a column)
        gate_w_ref,      # (9*CIN_P, CW)        bf16  BN scale folded
        gate_shift_ref,  # (1, CW)              f32
        b1_w_ref,        # (9*CW, CW)           bf16
        b1_shift_ref,    # (1, CW)              f32
        b2_w_ref,        # (9*CW, CW)           bf16
        b2_shift_ref,    # (1, CW)              f32
        hc_w_ref,        # (1, CW)              f32   1x1 conv row, BN scale folded
        hc_shift_ref,    # (1, 1)               f32   conv bias*scale + BN shift
        wf_ref,          # (H*W, 128)           f32   merged feat-part head weights
        wh_ref,          # (HID, 128)           f32   merged hidden-part head weights
        bias_ref,        # (1, 128)             f32   merged head biases
        out_ref,         # (1, 1, 128)          f32   merged [h | softmax(p) | v]
        act_ref,         # scratch (1, H+2, W+2, CW) bf16  halo-padded activation
        gtaps_ref,       # scratch (H*W, 9*CIN_P)    bf16  gate im2col staging
        taps_ref,        # scratch (H*W, 9*CW)       bf16  block-conv im2col staging
        res_ref,         # scratch (H*W, CW)         f32   residual stash
    ):
        cin_p = xpad_ref.shape[3]
        cw = gate_w_ref.shape[1]

        # ---- ResNetEncoder gate: conv3x3 + BN + ReLU, one im2col matmul -----
        for kh in range(3):
            for kw in range(3):
                t = kh * 3 + kw
                gtaps_ref[:, t * cin_p:(t + 1) * cin_p] = (
                    xpad_ref[:, kh:kh + h, kw:kw + w, :].reshape(m, cin_p))
        y = jnp.dot(gtaps_ref[...], gate_w_ref[...],
                    preferred_element_type=jnp.float32)
        y = jnp.maximum(y + gate_shift_ref[...], 0.0)          # (m, cw) f32
        res_ref[...] = y                                       # identity shortcut

        # Halo-padded bf16 activation buffer (halo must be zero each step:
        # scratch is per-core and re-used across "parallel" grid steps).
        act_ref[...] = jnp.zeros(act_ref.shape, act_ref.dtype)
        act_ref[:, 1:1 + h, 1:1 + w, :] = (
            y.astype(act_ref.dtype).reshape(1, h, w, cw))

        def stage_block_taps():
            for kh in range(3):
                for kw in range(3):
                    t = kh * 3 + kw
                    taps_ref[:, t * cw:(t + 1) * cw] = (
                        act_ref[:, kh:kh + h, kw:kw + w, :].reshape(m, cw))

        # ---- ResNetBasicBlock conv1: conv3x3 + BN + ReLU ---------------------
        stage_block_taps()
        y = jnp.dot(taps_ref[...], b1_w_ref[...],
                    preferred_element_type=jnp.float32)
        y = jnp.maximum(y + b1_shift_ref[...], 0.0)
        act_ref[:, 1:1 + h, 1:1 + w, :] = (
            y.astype(act_ref.dtype).reshape(1, h, w, cw))

        # ---- conv2: conv3x3 + BN, + residual (no ReLU after the add) --------
        stage_block_taps()
        y = (jnp.dot(taps_ref[...], b2_w_ref[...],
                     preferred_element_type=jnp.float32)
             + b2_shift_ref[...] + res_ref[...])               # (m, cw) f32

        # ---- RNNEncoder1 head: 1x1 conv(128->1, bias) + BN + ReLU ------------
        # Lane-broadcast multiply + lane reduction (no 1-column MXU matmul).
        z = jnp.sum(y * hc_w_ref[...], axis=-1, keepdims=True) + hc_shift_ref[...]
        z = jnp.maximum(z, 0.0)                                # (m, 1) per-pixel feat

        # ---- merged linear heads [i2h | i2p | i2v] ---------------------------
        # feat @ Wf == sum over the H*W rows of z * Wf  (no seg matmul, no
        # materialized (N, H*W) feature matrix).
        feat_part = jnp.sum(z * wf_ref[...], axis=0, keepdims=True)       # (1,128)
        hid_col = hid_ref[...].reshape(hid_size, 1)
        hid_part = jnp.sum(hid_col * wh_ref[...], axis=0, keepdims=True)  # (1,128)
        row = feat_part + hid_part + bias_ref[...]                        # (1,128)

        # softmax (== logSoftmax(.).exp()) over the policy lanes, in-kernel,
        # with an exact divide for fidelity.
        lanes = jax.lax.broadcasted_iota(jnp.int32, row.shape, 1)
        pmask = (lanes >= hid_size) & (lanes < hid_size + n_classes)
        mx = jnp.max(jnp.where(pmask, row, -jnp.inf), axis=-1, keepdims=True)
        e = jnp.where(pmask, jnp.exp(row - mx), 0.0)
        p = e / jnp.sum(e, axis=-1, keepdims=True)
        out_ref[...] = jnp.where(pmask, p, row)[None]          # (1, 1, 128)

    return kernel


def _fused_forward(xpad, hidden3, params, n_classes):
    n, hp, wp, cin_p = xpad.shape
    h, w = hp - 2, wp - 2
    m = h * w
    cw = ENC_WIDTH
    hid_size = params['wh_cat'].shape[0]

    kernel = _make_kernel(h, w, hid_size, n_classes)
    const2 = lambda b: (0, 0)

    return pl.pallas_call(
        kernel,
        out_shape=jax.ShapeDtypeStruct((n, 1, HEAD_LANES), jnp.float32),
        grid=(n,),
        in_specs=[
            pl.BlockSpec((1, hp, wp, cin_p), lambda b: (b, 0, 0, 0)),
            pl.BlockSpec((1, hid_size, 1), lambda b: (b, 0, 0)),
            pl.BlockSpec(params['gate_w'].shape, const2),
            pl.BlockSpec(params['gate_shift'].shape, const2),
            pl.BlockSpec(params['b1_w'].shape, const2),
            pl.BlockSpec(params['b1_shift'].shape, const2),
            pl.BlockSpec(params['b2_w'].shape, const2),
            pl.BlockSpec(params['b2_shift'].shape, const2),
            pl.BlockSpec(params['hc_w'].shape, const2),
            pl.BlockSpec(params['hc_shift'].shape, const2),
            pl.BlockSpec(params['wf_cat'].shape, const2),
            pl.BlockSpec(params['wh_cat'].shape, const2),
            pl.BlockSpec(params['bias_cat'].shape, const2),
        ],
        out_specs=pl.BlockSpec((1, 1, HEAD_LANES), lambda b: (b, 0, 0)),
        scratch_shapes=[
            pltpu.VMEM((1, hp, wp, cw), jnp.bfloat16),   # halo-padded activation
            pltpu.VMEM((m, 9 * cin_p), jnp.bfloat16),    # gate im2col staging
            pltpu.VMEM((m, 9 * cw), jnp.bfloat16),       # block-conv im2col staging
            pltpu.VMEM((m, cw), jnp.float32),            # residual stash
        ],
        compiler_params=pltpu.CompilerParams(
            dimension_semantics=("parallel",)),          # v7x: batch over 2 TCs
    )(xpad, hidden3,
      params['gate_w'], params['gate_shift'],
      params['b1_w'], params['b1_shift'],
      params['b2_w'], params['b2_shift'],
      params['hc_w'], params['hc_shift'],
      params['wf_cat'], params['wh_cat'], params['bias_cat'])


# ---------------------------------------------------------------------------
# Parameter initialization (deterministic, mirrors the PyTorch module shapes;
# BN folded; head weights pre-merged into lane-dense [h|p|v] matrices).
# ---------------------------------------------------------------------------
def init_params(key, in_channels, n_classes, grid_len, hidden_size):
    cw = ENC_WIDTH
    cin_p = ((in_channels + 7) // 8) * 8
    assert hidden_size + n_classes + 1 <= HEAD_LANES
    ks = jax.random.split(key, 8)

    def conv_w(kk, kh, kw, cin, cout):
        fan_in = kh * kw * cin
        return jax.random.normal(kk, (kh, kw, cin, cout), jnp.float32) / jnp.sqrt(fan_in)

    def bn_fold(c, conv_bias=None):
        gamma = jnp.ones((c,), jnp.float32)
        beta = jnp.zeros((c,), jnp.float32)
        mean = jnp.zeros((c,), jnp.float32)
        var = jnp.ones((c,), jnp.float32)
        scale = gamma / jnp.sqrt(var + BN_EPS)
        shift = beta - mean * scale
        if conv_bias is not None:
            shift = shift + conv_bias * scale
        return scale, shift

    p = {}
    # gate: conv3x3(in->128, no bias) + BN + ReLU; Cin padded to a multiple of 8
    gw = conv_w(ks[0], 3, 3, in_channels, cw)
    gw = jnp.pad(gw, ((0, 0), (0, 0), (0, cin_p - in_channels), (0, 0)))
    gs, gsh = bn_fold(cw)
    p['gate_w'] = (gw.reshape(9 * cin_p, cw) * gs[None, :]).astype(jnp.bfloat16)
    p['gate_shift'] = gsh.reshape(1, cw)

    # ResNetBasicBlock: conv3x3+BN -> ReLU -> conv3x3+BN (identity shortcut)
    b1 = conv_w(ks[1], 3, 3, cw, cw).reshape(9 * cw, cw)
    s1, sh1 = bn_fold(cw)
    p['b1_w'] = (b1 * s1[None, :]).astype(jnp.bfloat16)
    p['b1_shift'] = sh1.reshape(1, cw)
    b2 = conv_w(ks[2], 3, 3, cw, cw).reshape(9 * cw, cw)
    s2, sh2 = bn_fold(cw)
    p['b2_w'] = (b2 * s2[None, :]).astype(jnp.bfloat16)
    p['b2_shift'] = sh2.reshape(1, cw)

    # RNNEncoder1 head: 1x1 conv(128->1, bias=True) + BN(1) + ReLU (row layout)
    hc_w = conv_w(ks[3], 1, 1, cw, 1).reshape(cw)
    hc_b = jax.random.normal(ks[4], (1,), jnp.float32) * 0.1
    hs, hsh = bn_fold(1)
    p['hc_w'] = (hc_w * hs[0]).reshape(1, cw)
    p['hc_shift'] = (hsh + hs * hc_b).reshape(1, 1)

    # Linear heads i2h/i2p/i2v on cat([feat, hidden], 1), merged & lane-packed:
    # columns [0:HID]=i2h, [HID:HID+NC]=i2p, [HID+NC]=i2v, rest zero.
    k_feat = grid_len * grid_len
    k_lin = k_feat + hidden_size

    def lin(kk, din, dout):
        kw1, kb1 = jax.random.split(kk)
        bound = float(din) ** -0.5
        wt = jax.random.uniform(kw1, (din, dout), jnp.float32, -bound, bound)
        b = jax.random.uniform(kb1, (dout,), jnp.float32, -bound, bound)
        return wt, b

    wf = jnp.zeros((k_feat, HEAD_LANES), jnp.float32)
    wh = jnp.zeros((hidden_size, HEAD_LANES), jnp.float32)
    bc = jnp.zeros((1, HEAD_LANES), jnp.float32)
    col = 0
    for dout, kk in ((hidden_size, ks[5]), (n_classes, ks[6]), (1, ks[7])):
        wt, b = lin(kk, k_lin, dout)
        wf = wf.at[:, col:col + dout].set(wt[:k_feat])
        wh = wh.at[:, col:col + dout].set(wt[k_feat:])
        bc = bc.at[0, col:col + dout].set(b)
        col += dout
    p['wf_cat'] = wf
    p['wh_cat'] = wh
    p['bias_cat'] = bc
    return p


# ---------------------------------------------------------------------------
# Full forward pass == RNN.forward(x, hidden): returns (p, v, hidden)
# ---------------------------------------------------------------------------
def rnn_forward(params, x_nchw, hidden, *, n_classes, hidden_size):
    x = jnp.transpose(x_nchw, (0, 2, 3, 1))                    # NCHW -> NHWC
    n, h, w, cin = x.shape
    cin_p = params['gate_w'].shape[0] // 9
    xpad = jnp.pad(x, ((0, 0), (1, 1), (1, 1),
                       (0, cin_p - cin))).astype(jnp.bfloat16)
    hidden3 = hidden.astype(jnp.float32)[:, :, None]           # (N, HID, 1)

    out = _fused_forward(xpad, hidden3, params, n_classes)
    out = out.reshape(n, HEAD_LANES)
    h_new = out[:, :hidden_size]
    p_out = out[:, hidden_size:hidden_size + n_classes]
    v_out = out[:, hidden_size + n_classes:hidden_size + n_classes + 1]
    return p_out, v_out, h_new


if __name__ == "__main__":
    in_channels, n_classes, grid_len, hidden_size = 4, 10, 8, 32
    batch = 2

    key = jax.random.PRNGKey(0)
    kx, kp = jax.random.split(key)
    params = init_params(kp, in_channels, n_classes, grid_len, hidden_size)

    x = jax.random.normal(kx, (batch, in_channels, grid_len, grid_len), jnp.float32)
    hidden = jnp.zeros((batch, hidden_size), jnp.float32)      # init_hidden() per row

    fwd = jax.jit(functools.partial(rnn_forward, n_classes=n_classes,
                                    hidden_size=hidden_size))
    p_out, v_out, h_new = fwd(params, x, hidden)
    jax.block_until_ready((p_out, v_out, h_new))

    assert p_out.shape == (batch, n_classes)
    assert v_out.shape == (batch, 1)
    assert h_new.shape == (batch, hidden_size)
    assert bool(jnp.all(jnp.isfinite(p_out)) and jnp.all(jnp.isfinite(v_out))
                and jnp.all(jnp.isfinite(h_new)))
    assert bool(jnp.allclose(jnp.sum(p_out, axis=1), 1.0, atol=1e-4))
    print("KERNEL_OK")
</pallas_src>

<mosaic_0001>
module attributes {stable_mosaic.version = 11 : i64} {
  func.func @kernel(%arg0: i32, %arg1: memref<1x10x10x8xbf16, #tpu.memory_space<vmem>>, %arg2: memref<1x32x1xf32, #tpu.memory_space<vmem>>, %arg3: memref<72x128xbf16, #tpu.memory_space<vmem>>, %arg4: memref<1x128xf32, #tpu.memory_space<vmem>>, %arg5: memref<1152x128xbf16, #tpu.memory_space<vmem>>, %arg6: memref<1x128xf32, #tpu.memory_space<vmem>>, %arg7: memref<1152x128xbf16, #tpu.memory_space<vmem>>, %arg8: memref<1x128xf32, #tpu.memory_space<vmem>>, %arg9: memref<1x128xf32, #tpu.memory_space<vmem>>, %arg10: memref<1x1xf32, #tpu.memory_space<vmem>>, %arg11: memref<64x128xf32, #tpu.memory_space<vmem>>, %arg12: memref<32x128xf32, #tpu.memory_space<vmem>>, %arg13: memref<1x128xf32, #tpu.memory_space<vmem>>, %arg14: memref<1x1x128xf32, #tpu.memory_space<vmem>>, %arg15: memref<1x10x10x128xbf16, #tpu.memory_space<vmem>>, %arg16: memref<64x72xbf16, #tpu.memory_space<vmem>>, %arg17: memref<64x1152xbf16, #tpu.memory_space<vmem>>, %arg18: memref<64x128xf32, #tpu.memory_space<vmem>>) attributes {dimension_semantics = [#tpu.dimension_semantics<parallel>], iteration_bounds = array<i64: 2>, scalar_prefetch = 0 : i64, scratch_operands = 4 : i64, tpu.core_type = #tpu.core_type<tc>, window_params = [{transform_indices = @transform_0, window_bounds = array<i64: 1, 10, 10, 8>}, {transform_indices = @transform_1, window_bounds = array<i64: 1, 32, 1>}, {pipeline_mode = #tpu.pipeline_mode<synchronous>, transform_indices = @transform_2, window_bounds = array<i64: 72, 128>}, {pipeline_mode = #tpu.pipeline_mode<synchronous>, transform_indices = @transform_3, window_bounds = array<i64: 1, 128>}, {pipeline_mode = #tpu.pipeline_mode<synchronous>, transform_indices = @transform_4, window_bounds = array<i64: 1152, 128>}, {pipeline_mode = #tpu.pipeline_mode<synchronous>, transform_indices = @transform_5, window_bounds = array<i64: 1, 128>}, {pipeline_mode = #tpu.pipeline_mode<synchronous>, transform_indices = @transform_6, window_bounds = array<i64: 1152, 128>}, {pipeline_mode = #tpu.pipeline_mode<synchronous>, transform_indices = @transform_7, window_bounds = array<i64: 1, 128>}, {pipeline_mode = #tpu.pipeline_mode<synchronous>, transform_indices = @transform_8, window_bounds = array<i64: 1, 128>}, {pipeline_mode = #tpu.pipeline_mode<synchronous>, transform_indices = @transform_9, window_bounds = array<i64: 1, 1>}, {pipeline_mode = #tpu.pipeline_mode<synchronous>, transform_indices = @transform_10, window_bounds = array<i64: 64, 128>}, {pipeline_mode = #tpu.pipeline_mode<synchronous>, transform_indices = @transform_11, window_bounds = array<i64: 32, 128>}, {pipeline_mode = #tpu.pipeline_mode<synchronous>, transform_indices = @transform_12, window_bounds = array<i64: 1, 128>}, {transform_indices = @transform_13, window_bounds = array<i64: 1, 1, 128>}]} {
    %c0 = arith.constant 0 : index
    %c0_0 = arith.constant 0 : index
    %c0_1 = arith.constant 0 : index
    %c0_2 = arith.constant 0 : index
    %0 = vector.load %arg1[%c0, %c0_0, %c0_1, %c0_2] : memref<1x10x10x8xbf16, #tpu.memory_space<vmem>>, vector<1x8x8x8xbf16>
    %1 = vector.shape_cast %0 : vector<1x8x8x8xbf16> to vector<64x8xbf16>
    %c0_3 = arith.constant 0 : index
    %c0_4 = arith.constant 0 : index
    %2 = vector.load %arg16[%c0_3, %c0_4] : memref<64x72xbf16, #tpu.memory_space<vmem>>, vector<64x8xbf16>
    tpu.vector_store %arg16[%c0_3, %c0_4], %1 {strides = array<i32>} : memref<64x72xbf16, #tpu.memory_space<vmem>>, vector<64x8xbf16>,
    %c0_5 = arith.constant 0 : index
    %c0_6 = arith.constant 0 : index
    %c1 = arith.constant 1 : index
    %c0_7 = arith.constant 0 : index
    %3 = vector.load %arg1[%c0_5, %c0_6, %c1, %c0_7] : memref<1x10x10x8xbf16, #tpu.memory_space<vmem>>, vector<1x8x8x8xbf16>
    %4 = vector.shape_cast %3 : vector<1x8x8x8xbf16> to vector<64x8xbf16>
    %c0_8 = arith.constant 0 : index
    %c8 = arith.constant 8 : index
    %5 = vector.load %arg16[%c0_8, %c8] : memref<64x72xbf16, #tpu.memory_space<vmem>>, vector<64x8xbf16>
    tpu.vector_store %arg16[%c0_8, %c8], %4 {strides = array<i32>} : memref<64x72xbf16, #tpu.memory_space<vmem>>, vector<64x8xbf16>,
    %c0_9 = arith.constant 0 : index
    %c0_10 = arith.constant 0 : index
    %c2 = arith.constant 2 : index
    %c0_11 = arith.constant 0 : index
    %6 = vector.load %arg1[%c0_9, %c0_10, %c2, %c0_11] : memref<1x10x10x8xbf16, #tpu.memory_space<vmem>>, vector<1x8x8x8xbf16>
    %7 = vector.shape_cast %6 : vector<1x8x8x8xbf16> to vector<64x8xbf16>
    %c0_12 = arith.constant 0 : index
    %c16 = arith.constant 16 : index
    %8 = vector.load %arg16[%c0_12, %c16] : memref<64x72xbf16, #tpu.memory_space<vmem>>, vector<64x8xbf16>
    tpu.vector_store %arg16[%c0_12, %c16], %7 {strides = array<i32>} : memref<64x72xbf16, #tpu.memory_space<vmem>>, vector<64x8xbf16>,
    %c0_13 = arith.constant 0 : index
    %c1_14 = arith.constant 1 : index
    %c0_15 = arith.constant 0 : index
    %c0_16 = arith.constant 0 : index
    %9 = vector.load %arg1[%c0_13, %c1_14, %c0_15, %c0_16] : memref<1x10x10x8xbf16, #tpu.memory_space<vmem>>, vector<1x8x8x8xbf16>
    %10 = vector.shape_cast %9 : vector<1x8x8x8xbf16> to vector<64x8xbf16>
    %c0_17 = arith.constant 0 : index
    %c24 = arith.constant 24 : index
    %11 = vector.load %arg16[%c0_17, %c24] : memref<64x72xbf16, #tpu.memory_space<vmem>>, vector<64x8xbf16>
    tpu.vector_store %arg16[%c0_17, %c24], %10 {strides = array<i32>} : memref<64x72xbf16, #tpu.memory_space<vmem>>, vector<64x8xbf16>,
    %c0_18 = arith.constant 0 : index
    %c1_19 = arith.constant 1 : index
    %c1_20 = arith.constant 1 : index
    %c0_21 = arith.constant 0 : index
    %12 = vector.load %arg1[%c0_18, %c1_19, %c1_20, %c0_21] : memref<1x10x10x8xbf16, #tpu.memory_space<vmem>>, vector<1x8x8x8xbf16>
    %13 = vector.shape_cast %12 : vector<1x8x8x8xbf16> to vector<64x8xbf16>
    %c0_22 = arith.constant 0 : index
    %c32 = arith.constant 32 : index
    %14 = vector.load %arg16[%c0_22, %c32] : memref<64x72xbf16, #tpu.memory_space<vmem>>, vector<64x8xbf16>
    tpu.vector_store %arg16[%c0_22, %c32], %13 {strides = array<i32>} : memref<64x72xbf16, #tpu.memory_space<vmem>>, vector<64x8xbf16>,
    %c0_23 = arith.constant 0 : index
    %c1_24 = arith.constant 1 : index
    %c2_25 = arith.constant 2 : index
    %c0_26 = arith.constant 0 : index
    %15 = vector.load %arg1[%c0_23, %c1_24, %c2_25, %c0_26] : memref<1x10x10x8xbf16, #tpu.memory_space<vmem>>, vector<1x8x8x8xbf16>
    %16 = vector.shape_cast %15 : vector<1x8x8x8xbf16> to vector<64x8xbf16>
    %c0_27 = arith.constant 0 : index
    %c40 = arith.constant 40 : index
    %17 = vector.load %arg16[%c0_27, %c40] : memref<64x72xbf16, #tpu.memory_space<vmem>>, vector<64x8xbf16>
    tpu.vector_store %arg16[%c0_27, %c40], %16 {strides = array<i32>} : memref<64x72xbf16, #tpu.memory_space<vmem>>, vector<64x8xbf16>,
    %c0_28 = arith.constant 0 : index
    %c2_29 = arith.constant 2 : index
    %c0_30 = arith.constant 0 : index
    %c0_31 = arith.constant 0 : index
    %18 = vector.load %arg1[%c0_28, %c2_29, %c0_30, %c0_31] : memref<1x10x10x8xbf16, #tpu.memory_space<vmem>>, vector<1x8x8x8xbf16>
    %19 = vector.shape_cast %18 : vector<1x8x8x8xbf16> to vector<64x8xbf16>
    %c0_32 = arith.constant 0 : index
    %c48 = arith.constant 48 : index
    %20 = vector.load %arg16[%c0_32, %c48] : memref<64x72xbf16, #tpu.memory_space<vmem>>, vector<64x8xbf16>
    tpu.vector_store %arg16[%c0_32, %c48], %19 {strides = array<i32>} : memref<64x72xbf16, #tpu.memory_space<vmem>>, vector<64x8xbf16>,
    %c0_33 = arith.constant 0 : index
    %c2_34 = arith.constant 2 : index
    %c1_35 = arith.constant 1 : index
    %c0_36 = arith.constant 0 : index
    %21 = vector.load %arg1[%c0_33, %c2_34, %c1_35, %c0_36] : memref<1x10x10x8xbf16, #tpu.memory_space<vmem>>, vector<1x8x8x8xbf16>
    %22 = vector.shape_cast %21 : vector<1x8x8x8xbf16> to vector<64x8xbf16>
    %c0_37 = arith.constant 0 : index
    %c56 = arith.constant 56 : index
    %23 = vector.load %arg16[%c0_37, %c56] : memref<64x72xbf16, #tpu.memory_space<vmem>>, vector<64x8xbf16>
    tpu.vector_store %arg16[%c0_37, %c56], %22 {strides = array<i32>} : memref<64x72xbf16, #tpu.memory_space<vmem>>, vector<64x8xbf16>,
    %c0_38 = arith.constant 0 : index
    %c2_39 = arith.constant 2 : index
    %c2_40 = arith.constant 2 : index
    %c0_41 = arith.constant 0 : index
    %24 = vector.load %arg1[%c0_38, %c2_39, %c2_40, %c0_41] : memref<1x10x10x8xbf16, #tpu.memory_space<vmem>>, vector<1x8x8x8xbf16>
    %25 = vector.shape_cast %24 : vector<1x8x8x8xbf16> to vector<64x8xbf16>
    %c0_42 = arith.constant 0 : index
    %c64 = arith.constant 64 : index
    %26 = vector.load %arg16[%c0_42, %c64] : memref<64x72xbf16, #tpu.memory_space<vmem>>, vector<64x8xbf16>
    tpu.vector_store %arg16[%c0_42, %c64], %25 {strides = array<i32>} : memref<64x72xbf16, #tpu.memory_space<vmem>>, vector<64x8xbf16>,
    %c0_43 = arith.constant 0 : index
    %c0_44 = arith.constant 0 : index
    %27 = vector.load %arg16[%c0_43, %c0_44] : memref<64x72xbf16, #tpu.memory_space<vmem>>, vector<64x72xbf16>
    %c0_45 = arith.constant 0 : index
    %c0_46 = arith.constant 0 : index
    %28 = vector.load %arg3[%c0_45, %c0_46] : memref<72x128xbf16, #tpu.memory_space<vmem>>, vector<72x128xbf16>
    %cst = arith.constant dense<0.000000e+00> : vector<64x128xf32>
    %29 = tpu.matmul %27, %28, %cst {dimension_numbers = #tpu.dot_dimension_numbers<[1], [0], [0], [1], [0, 0, 1, 1], [], []>} : vector<64x72xbf16>, vector<72x128xbf16>, vector<64x128xf32> -> vector<64x128xf32>
    %c0_47 = arith.constant 0 : index
    %c0_48 = arith.constant 0 : index
    %30 = vector.load %arg4[%c0_47, %c0_48] : memref<1x128xf32, #tpu.memory_space<vmem>>, vector<1x128xf32>
    %31 = vector.broadcast %30 : vector<1x128xf32> to vector<64x128xf32>
    %32 = arith.addf %29, %31 : vector<64x128xf32>
    %cst_49 = arith.constant 0.000000e+00 : f32
    %33 = vector.broadcast %cst_49 : f32 to vector<64x128xf32>
    %34 = arith.maximumf %32, %33 : vector<64x128xf32>
    %c0_50 = arith.constant 0 : index
    %c0_51 = arith.constant 0 : index
    %35 = vector.load %arg18[%c0_50, %c0_51] : memref<64x128xf32, #tpu.memory_space<vmem>>, vector<64x128xf32>
    tpu.vector_store %arg18[%c0_50, %c0_51], %34 {strides = array<i32>} : memref<64x128xf32, #tpu.memory_space<vmem>>, vector<64x128xf32>,
    %cst_52 = arith.constant 0.000000e+00 : bf16
    %36 = vector.broadcast %cst_52 : bf16 to vector<1x10x10x128xbf16>
    %c0_53 = arith.constant 0 : index
    %c0_54 = arith.constant 0 : index
    %c0_55 = arith.constant 0 : index
    %c0_56 = arith.constant 0 : index
    %37 = vector.load %arg15[%c0_53, %c0_54, %c0_55, %c0_56] : memref<1x10x10x128xbf16, #tpu.memory_space<vmem>>, vector<1x10x10x128xbf16>
    tpu.vector_store %arg15[%c0_53, %c0_54, %c0_55, %c0_56], %36 {strides = array<i32>} : memref<1x10x10x128xbf16, #tpu.memory_space<vmem>>, vector<1x10x10x128xbf16>,
    %38 = arith.truncf %34 : vector<64x128xf32> to vector<64x128xbf16>
    %39 = vector.shape_cast %38 : vector<64x128xbf16> to vector<1x8x8x128xbf16>
    %c0_57 = arith.constant 0 : index
    %c1_58 = arith.constant 1 : index
    %c1_59 = arith.constant 1 : index
    %c0_60 = arith.constant 0 : index
    %40 = vector.load %arg15[%c0_57, %c1_58, %c1_59, %c0_60] : memref<1x10x10x128xbf16, #tpu.memory_space<vmem>>, vector<1x8x8x128xbf16>
    tpu.vector_store %arg15[%c0_57, %c1_58, %c1_59, %c0_60], %39 {strides = array<i32>} : memref<1x10x10x128xbf16, #tpu.memory_space<vmem>>, vector<1x8x8x128xbf16>,
    %c0_61 = arith.constant 0 : index
    %c0_62 = arith.constant 0 : index
    %c0_63 = arith.constant 0 : index
    %c0_64 = arith.constant 0 : index
    %41 = vector.load %arg15[%c0_61, %c0_62, %c0_63, %c0_64] : memref<1x10x10x128xbf16, #tpu.memory_space<vmem>>, vector<1x8x8x128xbf16>
    %42 = vector.shape_cast %41 : vector<1x8x8x128xbf16> to vector<64x128xbf16>
    %c0_65 = arith.constant 0 : index
    %c0_66 = arith.constant 0 : index
    %43 = vector.load %arg17[%c0_65, %c0_66] : memref<64x1152xbf16, #tpu.memory_space<vmem>>, vector<64x128xbf16>
    tpu.vector_store %arg17[%c0_65, %c0_66], %42 {strides = array<i32>} : memref<64x1152xbf16, #tpu.memory_space<vmem>>, vector<64x128xbf16>,
    %c0_67 = arith.constant 0 : index
    %c0_68 = arith.constant 0 : index
    %c1_69 = arith.constant 1 : index
    %c0_70 = arith.constant 0 : index
    %44 = vector.load %arg15[%c0_67, %c0_68, %c1_69, %c0_70] : memref<1x10x10x128xbf16, #tpu.memory_space<vmem>>, vector<1x8x8x128xbf16>
    %45 = vector.shape_cast %44 : vector<1x8x8x128xbf16> to vector<64x128xbf16>
    %c0_71 = arith.constant 0 : index
    %c128 = arith.constant 128 : index
    %46 = vector.load %arg17[%c0_71, %c128] : memref<64x1152xbf16, #tpu.memory_space<vmem>>, vector<64x128xbf16>
    tpu.vector_store %arg17[%c0_71, %c128], %45 {strides = array<i32>} : memref<64x1152xbf16, #tpu.memory_space<vmem>>, vector<64x128xbf16>,
    %c0_72 = arith.constant 0 : index
    %c0_73 = arith.constant 0 : index
    %c2_74 = arith.constant 2 : index
    %c0_75 = arith.constant 0 : index
    %47 = vector.load %arg15[%c0_72, %c0_73, %c2_74, %c0_75] : memref<1x10x10x128xbf16, #tpu.memory_space<vmem>>, vector<1x8x8x128xbf16>
    %48 = vector.shape_cast %47 : vector<1x8x8x128xbf16> to vector<64x128xbf16>
    %c0_76 = arith.constant 0 : index
    %c256 = arith.constant 256 : index
    %49 = vector.load %arg17[%c0_76, %c256] : memref<64x1152xbf16, #tpu.memory_space<vmem>>, vector<64x128xbf16>
    tpu.vector_store %arg17[%c0_76, %c256], %48 {strides = array<i32>} : memref<64x1152xbf16, #tpu.memory_space<vmem>>, vector<64x128xbf16>,
    %c0_77 = arith.constant 0 : index
    %c1_78 = arith.constant 1 : index
    %c0_79 = arith.constant 0 : index
    %c0_80 = arith.constant 0 : index
    %50 = vector.load %arg15[%c0_77, %c1_78, %c0_79, %c0_80] : memref<1x10x10x128xbf16, #tpu.memory_space<vmem>>, vector<1x8x8x128xbf16>
    %51 = vector.shape_cast %50 : vector<1x8x8x128xbf16> to vector<64x128xbf16>
    %c0_81 = arith.constant 0 : index
    %c384 = arith.constant 384 : index
    %52 = vector.load %arg17[%c0_81, %c384] : memref<64x1152xbf16, #tpu.memory_space<vmem>>, vector<64x128xbf16>
    tpu.vector_store %arg17[%c0_81, %c384], %51 {strides = array<i32>} : memref<64x1152xbf16, #tpu.memory_space<vmem>>, vector<64x128xbf16>,
    %c0_82 = arith.constant 0 : index
    %c1_83 = arith.constant 1 : index
    %c1_84 = arith.constant 1 : index
    %c0_85 = arith.constant 0 : index
    %53 = vector.load %arg15[%c0_82, %c1_83, %c1_84, %c0_85] : memref<1x10x10x128xbf16, #tpu.memory_space<vmem>>, vector<1x8x8x128xbf16>
    %54 = vector.shape_cast %53 : vector<1x8x8x128xbf16> to vector<64x128xbf16>
    %c0_86 = arith.constant 0 : index
    %c512 = arith.constant 512 : index
    %55 = vector.load %arg17[%c0_86, %c512] : memref<64x1152xbf16, #tpu.memory_space<vmem>>, vector<64x128xbf16>
    tpu.vector_store %arg17[%c0_86, %c512], %54 {strides = array<i32>} : memref<64x1152xbf16, #tpu.memory_space<vmem>>, vector<64x128xbf16>,
    %c0_87 = arith.constant 0 : index
    %c1_88 = arith.constant 1 : index
    %c2_89 = arith.constant 2 : index
    %c0_90 = arith.constant 0 : index
    %56 = vector.load %arg15[%c0_87, %c1_88, %c2_89, %c0_90] : memref<1x10x10x128xbf16, #tpu.memory_space<vmem>>, vector<1x8x8x128xbf16>
    %57 = vector.shape_cast %56 : vector<1x8x8x128xbf16> to vector<64x128xbf16>
    %c0_91 = arith.constant 0 : index
    %c640 = arith.constant 640 : index
    %58 = vector.load %arg17[%c0_91, %c640] : memref<64x1152xbf16, #tpu.memory_space<vmem>>, vector<64x128xbf16>
    tpu.vector_store %arg17[%c0_91, %c640], %57 {strides = array<i32>} : memref<64x1152xbf16, #tpu.memory_space<vmem>>, vector<64x128xbf16>,
    %c0_92 = arith.constant 0 : index
    %c2_93 = arith.constant 2 : index
    %c0_94 = arith.constant 0 : index
    %c0_95 = arith.constant 0 : index
    %59 = vector.load %arg15[%c0_92, %c2_93, %c0_94, %c0_95] : memref<1x10x10x128xbf16, #tpu.memory_space<vmem>>, vector<1x8x8x128xbf16>
    %60 = vector.shape_cast %59 : vector<1x8x8x128xbf16> to vector<64x128xbf16>
    %c0_96 = arith.constant 0 : index
    %c768 = arith.constant 768 : index
    %61 = vector.load %arg17[%c0_96, %c768] : memref<64x1152xbf16, #tpu.memory_space<vmem>>, vector<64x128xbf16>
    tpu.vector_store %arg17[%c0_96, %c768], %60 {strides = array<i32>} : memref<64x1152xbf16, #tpu.memory_space<vmem>>, vector<64x128xbf16>,
    %c0_97 = arith.constant 0 : index
    %c2_98 = arith.constant 2 : index
    %c1_99 = arith.constant 1 : index
    %c0_100 = arith.constant 0 : index
    %62 = vector.load %arg15[%c0_97, %c2_98, %c1_99, %c0_100] : memref<1x10x10x128xbf16, #tpu.memory_space<vmem>>, vector<1x8x8x128xbf16>
    %63 = vector.shape_cast %62 : vector<1x8x8x128xbf16> to vector<64x128xbf16>
    %c0_101 = arith.constant 0 : index
    %c896 = arith.constant 896 : index
    %64 = vector.load %arg17[%c0_101, %c896] : memref<64x1152xbf16, #tpu.memory_space<vmem>>, vector<64x128xbf16>
    tpu.vector_store %arg17[%c0_101, %c896], %63 {strides = array<i32>} : memref<64x1152xbf16, #tpu.memory_space<vmem>>, vector<64x128xbf16>,
    %c0_102 = arith.constant 0 : index
    %c2_103 = arith.constant 2 : index
    %c2_104 = arith.constant 2 : index
    %c0_105 = arith.constant 0 : index
    %65 = vector.load %arg15[%c0_102, %c2_103, %c2_104, %c0_105] : memref<1x10x10x128xbf16, #tpu.memory_space<vmem>>, vector<1x8x8x128xbf16>
    %66 = vector.shape_cast %65 : vector<1x8x8x128xbf16> to vector<64x128xbf16>
    %c0_106 = arith.constant 0 : index
    %c1024 = arith.constant 1024 : index
    %67 = vector.load %arg17[%c0_106, %c1024] : memref<64x1152xbf16, #tpu.memory_space<vmem>>, vector<64x128xbf16>
    tpu.vector_store %arg17[%c0_106, %c1024], %66 {strides = array<i32>} : memref<64x1152xbf16, #tpu.memory_space<vmem>>, vector<64x128xbf16>,
    %c0_107 = arith.constant 0 : index
    %c0_108 = arith.constant 0 : index
    %68 = vector.load %arg17[%c0_107, %c0_108] : memref<64x1152xbf16, #tpu.memory_space<vmem>>, vector<64x1152xbf16>
    %c0_109 = arith.constant 0 : index
    %c0_110 = arith.constant 0 : index
    %69 = vector.load %arg5[%c0_109, %c0_110] : memref<1152x128xbf16, #tpu.memory_space<vmem>>, vector<1152x128xbf16>
    %cst_111 = arith.constant dense<0.000000e+00> : vector<64x128xf32>
    %70 = tpu.matmul %68, %69, %cst_111 {dimension_numbers = #tpu.dot_dimension_numbers<[1], [0], [0], [1], [0, 0, 1, 1], [], []>} : vector<64x1152xbf16>, vector<1152x128xbf16>, vector<64x128xf32> -> vector<64x128xf32>
    %c0_112 = arith.constant 0 : index
    %c0_113 = arith.constant 0 : index
    %71 = vector.load %arg6[%c0_112, %c0_113] : memref<1x128xf32, #tpu.memory_space<vmem>>, vector<1x128xf32>
    %72 = vector.broadcast %71 : vector<1x128xf32> to vector<64x128xf32>
    %73 = arith.addf %70, %72 : vector<64x128xf32>
    %cst_114 = arith.constant 0.000000e+00 : f32
    %74 = vector.broadcast %cst_114 : f32 to vector<64x128xf32>
    %75 = arith.maximumf %73, %74 : vector<64x128xf32>
    %76 = arith.truncf %75 : vector<64x128xf32> to vector<64x128xbf16>
    %77 = vector.shape_cast %76 : vector<64x128xbf16> to vector<1x8x8x128xbf16>
    %c0_115 = arith.constant 0 : index
    %c1_116 = arith.constant 1 : index
    %c1_117 = arith.constant 1 : index
    %c0_118 = arith.constant 0 : index
    %78 = vector.load %arg15[%c0_115, %c1_116, %c1_117, %c0_118] : memref<1x10x10x128xbf16, #tpu.memory_space<vmem>>, vector<1x8x8x128xbf16>
    tpu.vector_store %arg15[%c0_115, %c1_116, %c1_117, %c0_118], %77 {strides = array<i32>} : memref<1x10x10x128xbf16, #tpu.memory_space<vmem>>, vector<1x8x8x128xbf16>,
    %c0_119 = arith.constant 0 : index
    %c0_120 = arith.constant 0 : index
    %c0_121 = arith.constant 0 : index
    %c0_122 = arith.constant 0 : index
    %79 = vector.load %arg15[%c0_119, %c0_120, %c0_121, %c0_122] : memref<1x10x10x128xbf16, #tpu.memory_space<vmem>>, vector<1x8x8x128xbf16>
    %80 = vector.shape_cast %79 : vector<1x8x8x128xbf16> to vector<64x128xbf16>
    %c0_123 = arith.constant 0 : index
    %c0_124 = arith.constant 0 : index
    %81 = vector.load %arg17[%c0_123, %c0_124] : memref<64x1152xbf16, #tpu.memory_space<vmem>>, vector<64x128xbf16>
    tpu.vector_store %arg17[%c0_123, %c0_124], %80 {strides = array<i32>} : memref<64x1152xbf16, #tpu.memory_space<vmem>>, vector<64x128xbf16>,
    %c0_125 = arith.constant 0 : index
    %c0_126 = arith.constant 0 : index
    %c1_127 = arith.constant 1 : index
    %c0_128 = arith.constant 0 : index
    %82 = vector.load %arg15[%c0_125, %c0_126, %c1_127, %c0_128] : memref<1x10x10x128xbf16, #tpu.memory_space<vmem>>, vector<1x8x8x128xbf16>
    %83 = vector.shape_cast %82 : vector<1x8x8x128xbf16> to vector<64x128xbf16>
    %c0_129 = arith.constant 0 : index
    %c128_130 = arith.constant 128 : index
    %84 = vector.load %arg17[%c0_129, %c128_130] : memref<64x1152xbf16, #tpu.memory_space<vmem>>, vector<64x128xbf16>
    tpu.vector_store %arg17[%c0_129, %c128_130], %83 {strides = array<i32>} : memref<64x1152xbf16, #tpu.memory_space<vmem>>, vector<64x128xbf16>,
    %c0_131 = arith.constant 0 : index
    %c0_132 = arith.constant 0 : index
    %c2_133 = arith.constant 2 : index
    %c0_134 = arith.constant 0 : index
    %85 = vector.load %arg15[%c0_131, %c0_132, %c2_133, %c0_134] : memref<1x10x10x128xbf16, #tpu.memory_space<vmem>>, vector<1x8x8x128xbf16>
    %86 = vector.shape_cast %85 : vector<1x8x8x128xbf16> to vector<64x128xbf16>
    %c0_135 = arith.constant 0 : index
    %c256_136 = arith.constant 256 : index
    %87 = vector.load %arg17[%c0_135, %c256_136] : memref<64x1152xbf16, #tpu.memory_space<vmem>>, vector<64x128xbf16>
    tpu.vector_store %arg17[%c0_135, %c256_136], %86 {strides = array<i32>} : memref<64x1152xbf16, #tpu.memory_space<vmem>>, vector<64x128xbf16>,
    %c0_137 = arith.constant 0 : index
    %c1_138 = arith.constant 1 : index
    %c0_139 = arith.constant 0 : index
    %c0_140 = arith.constant 0 : index
    %88 = vector.load %arg15[%c0_137, %c1_138, %c0_139, %c0_140] : memref<1x10x10x128xbf16, #tpu.memory_space<vmem>>, vector<1x8x8x128xbf16>
    %89 = vector.shape_cast %88 : vector<1x8x8x128xbf16> to vector<64x128xbf16>
    %c0_141 = arith.constant 0 : index
    %c384_142 = arith.constant 384 : index
    %90 = vector.load %arg17[%c0_141, %c384_142] : memref<64x1152xbf16, #tpu.memory_space<vmem>>, vector<64x128xbf16>
    tpu.vector_store %arg17[%c0_141, %c384_142], %89 {strides = array<i32>} : memref<64x1152xbf16, #tpu.memory_space<vmem>>, vector<64x128xbf16>,
    %c0_143 = arith.constant 0 : index
    %c1_144 = arith.constant 1 : index
    %c1_145 = arith.constant 1 : index
    %c0_146 = arith.constant 0 : index
    %91 = vector.load %arg15[%c0_143, %c1_144, %c1_145, %c0_146] : memref<1x10x10x128xbf16, #tpu.memory_space<vmem>>, vector<1x8x8x128xbf16>
    %92 = vector.shape_cast %91 : vector<1x8x8x128xbf16> to vector<64x128xbf16>
    %c0_147 = arith.constant 0 : index
    %c512_148 = arith.constant 512 : index
    %93 = vector.load %arg17[%c0_147, %c512_148] : memref<64x1152xbf16, #tpu.memory_space<vmem>>, vector<64x128xbf16>
    tpu.vector_store %arg17[%c0_147, %c512_148], %92 {strides = array<i32>} : memref<64x1152xbf16, #tpu.memory_space<vmem>>, vector<64x128xbf16>,
    %c0_149 = arith.constant 0 : index
    %c1_150 = arith.constant 1 : index
    %c2_151 = arith.constant 2 : index
    %c0_152 = arith.constant 0 : index
    %94 = vector.load %arg15[%c0_149, %c1_150, %c2_151, %c0_152] : memref<1x10x10x128xbf16, #tpu.memory_space<vmem>>, vector<1x8x8x128xbf16>
    %95 = vector.shape_cast %94 : vector<1x8x8x128xbf16> to vector<64x128xbf16>
    %c0_153 = arith.constant 0 : index
    %c640_154 = arith.constant 640 : index
    %96 = vector.load %arg17[%c0_153, %c640_154] : memref<64x1152xbf16, #tpu.memory_space<vmem>>, vector<64x128xbf16>
    tpu.vector_store %arg17[%c0_153, %c640_154], %95 {strides = array<i32>} : memref<64x1152xbf16, #tpu.memory_space<vmem>>, vector<64x128xbf16>,
    %c0_155 = arith.constant 0 : index
    %c2_156 = arith.constant 2 : index
    %c0_157 = arith.constant 0 : index
    %c0_158 = arith.constant 0 : index
    %97 = vector.load %arg15[%c0_155, %c2_156, %c0_157, %c0_158] : memref<1x10x10x128xbf16, #tpu.memory_space<vmem>>, vector<1x8x8x128xbf16>
    %98 = vector.shape_cast %97 : vector<1x8x8x128xbf16> to vector<64x128xbf16>
    %c0_159 = arith.constant 0 : index
    %c768_160 = arith.constant 768 : index
    %99 = vector.load %arg17[%c0_159, %c768_160] : memref<64x1152xbf16, #tpu.memory_space<vmem>>, vector<64x128xbf16>
    tpu.vector_store %arg17[%c0_159, %c768_160], %98 {strides = array<i32>} : memref<64x1152xbf16, #tpu.memory_space<vmem>>, vector<64x128xbf16>,
    %c0_161 = arith.constant 0 : index
    %c2_162 = arith.constant 2 : index
    %c1_163 = arith.constant 1 : index
    %c0_164 = arith.constant 0 : index
    %100 = vector.load %arg15[%c0_161, %c2_162, %c1_163, %c0_164] : memref<1x10x10x128xbf16, #tpu.memory_space<vmem>>, vector<1x8x8x128xbf16>
    %101 = vector.shape_cast %100 : vector<1x8x8x128xbf16> to vector<64x128xbf16>
    %c0_165 = arith.constant 0 : index
    %c896_166 = arith.constant 896 : index
    %102 = vector.load %arg17[%c0_165, %c896_166] : memref<64x1152xbf16, #tpu.memory_space<vmem>>, vector<64x128xbf16>
    tpu.vector_store %arg17[%c0_165, %c896_166], %101 {strides = array<i32>} : memref<64x1152xbf16, #tpu.memory_space<vmem>>, vector<64x128xbf16>,
    %c0_167 = arith.constant 0 : index
    %c2_168 = arith.constant 2 : index
    %c2_169 = arith.constant 2 : index
    %c0_170 = arith.constant 0 : index
    %103 = vector.load %arg15[%c0_167, %c2_168, %c2_169, %c0_170] : memref<1x10x10x128xbf16, #tpu.memory_space<vmem>>, vector<1x8x8x128xbf16>
    %104 = vector.shape_cast %103 : vector<1x8x8x128xbf16> to vector<64x128xbf16>
    %c0_171 = arith.constant 0 : index
    %c1024_172 = arith.constant 1024 : index
    %105 = vector.load %arg17[%c0_171, %c1024_172] : memref<64x1152xbf16, #tpu.memory_space<vmem>>, vector<64x128xbf16>
    tpu.vector_store %arg17[%c0_171, %c1024_172], %104 {strides = array<i32>} : memref<64x1152xbf16, #tpu.memory_space<vmem>>, vector<64x128xbf16>,
    %c0_173 = arith.constant 0 : index
    %c0_174 = arith.constant 0 : index
    %106 = vector.load %arg17[%c0_173, %c0_174] : memref<64x1152xbf16, #tpu.memory_space<vmem>>, vector<64x1152xbf16>
    %c0_175 = arith.constant 0 : index
    %c0_176 = arith.constant 0 : index
    %107 = vector.load %arg7[%c0_175, %c0_176] : memref<1152x128xbf16, #tpu.memory_space<vmem>>, vector<1152x128xbf16>
    %cst_177 = arith.constant dense<0.000000e+00> : vector<64x128xf32>
    %108 = tpu.matmul %106, %107, %cst_177 {dimension_numbers = #tpu.dot_dimension_numbers<[1], [0], [0], [1], [0, 0, 1, 1], [], []>} : vector<64x1152xbf16>, vector<1152x128xbf16>, vector<64x128xf32> -> vector<64x128xf32>
    %c0_178 = arith.constant 0 : index
    %c0_179 = arith.constant 0 : index
    %109 = vector.load %arg8[%c0_178, %c0_179] : memref<1x128xf32, #tpu.memory_space<vmem>>, vector<1x128xf32>
    %110 = vector.broadcast %109 : vector<1x128xf32> to vector<64x128xf32>
    %111 = arith.addf %108, %110 : vector<64x128xf32>
    %c0_180 = arith.constant 0 : index
    %c0_181 = arith.constant 0 : index
    %112 = vector.load %arg18[%c0_180, %c0_181] : memref<64x128xf32, #tpu.memory_space<vmem>>, vector<64x128xf32>
    %113 = arith.addf %111, %112 : vector<64x128xf32>
    %c0_182 = arith.constant 0 : index
    %c0_183 = arith.constant 0 : index
    %114 = vector.load %arg9[%c0_182, %c0_183] : memref<1x128xf32, #tpu.memory_space<vmem>>, vector<1x128xf32>
    %115 = vector.broadcast %114 : vector<1x128xf32> to vector<64x128xf32>
    %116 = arith.mulf %113, %115 : vector<64x128xf32>
    %cst_184 = arith.constant dense<0.000000e+00> : vector<64xf32>
    %117 = vector.multi_reduction <add>, %116, %cst_184 [1] : vector<64x128xf32> to vector<64xf32>
    %118 = vector.shape_cast %117 : vector<64xf32> to vector<64x1xf32>
    %c0_185 = arith.constant 0 : index
    %c0_186 = arith.constant 0 : index
    %119 = vector.load %arg10[%c0_185, %c0_186] : memref<1x1xf32, #tpu.memory_space<vmem>>, vector<1x1xf32>
    %120 = vector.broadcast %119 : vector<1x1xf32> to vector<64x1xf32>
    %121 = arith.addf %118, %120 : vector<64x1xf32>
    %cst_187 = arith.constant 0.000000e+00 : f32
    %122 = vector.broadcast %cst_187 : f32 to vector<64x1xf32>
    %123 = arith.maximumf %121, %122 : vector<64x1xf32>
    %c0_188 = arith.constant 0 : index
    %c0_189 = arith.constant 0 : index
    %124 = vector.load %arg11[%c0_188, %c0_189] : memref<64x128xf32, #tpu.memory_space<vmem>>, vector<64x128xf32>
    %125 = vector.broadcast %123 : vector<64x1xf32> to vector<64x128xf32>
    %126 = arith.mulf %125, %124 : vector<64x128xf32>
    %cst_190 = arith.constant dense<0.000000e+00> : vector<128xf32>
    %127 = vector.multi_reduction <add>, %126, %cst_190 [0] : vector<64x128xf32> to vector<128xf32>
    %128 = vector.shape_cast %127 : vector<128xf32> to vector<1x128xf32>
    %c0_191 = arith.constant 0 : index
    %c0_192 = arith.constant 0 : index
    %c0_193 = arith.constant 0 : index
    %129 = vector.load %arg2[%c0_191, %c0_192, %c0_193] : memref<1x32x1xf32, #tpu.memory_space<vmem>>, vector<1x32x1xf32>
    %130 = vector.shape_cast %129 : vector<1x32x1xf32> to vector<32x1xf32>
    %c0_194 = arith.constant 0 : index
    %c0_195 = arith.constant 0 : index
    %131 = vector.load %arg12[%c0_194, %c0_195] : memref<32x128xf32, #tpu.memory_space<vmem>>, vector<32x128xf32>
    %132 = vector.broadcast %130 : vector<32x1xf32> to vector<32x128xf32>
    %133 = arith.mulf %132, %131 : vector<32x128xf32>
    %cst_196 = arith.constant dense<0.000000e+00> : vector<128xf32>
    %134 = vector.multi_reduction <add>, %133, %cst_196 [0] : vector<32x128xf32> to vector<128xf32>
    %135 = vector.shape_cast %134 : vector<128xf32> to vector<1x128xf32>
    %136 = arith.addf %128, %135 : vector<1x128xf32>
    %c0_197 = arith.constant 0 : index
    %c0_198 = arith.constant 0 : index
    %137 = vector.load %arg13[%c0_197, %c0_198] : memref<1x128xf32, #tpu.memory_space<vmem>>, vector<1x128xf32>
    %138 = arith.addf %136, %137 : vector<1x128xf32>
    %139 = tpu.iota {dimensions = array<i32: 1>} : vector<1x128xi32>
    %c32_i32 = arith.constant 32 : i32
    %140 = vector.broadcast %c32_i32 : i32 to vector<1x128xi32>
    %141 = arith.cmpi sge, %139, %140 : vector<1x128xi32>
    %c42_i32 = arith.constant 42 : i32
    %142 = vector.broadcast %c42_i32 : i32 to vector<1x128xi32>
    %143 = arith.cmpi slt, %139, %142 : vector<1x128xi32>
    %144 = arith.andi %141, %143 : vector<1x128xi1>
    %cst_199 = arith.constant 0xFF800000 : f32
    %145 = vector.broadcast %cst_199 : f32 to vector<1x128xf32>
    %146 = arith.select %144, %138, %145 : vector<1x128xi1>, vector<1x128xf32>
    %cst_200 = arith.constant dense<0xFF800000> : vector<1xf32>
    %147 = vector.multi_reduction <maximumf>, %146, %cst_200 [1] : vector<1x128xf32> to vector<1xf32>
    %148 = vector.shape_cast %147 : vector<1xf32> to vector<1x1xf32>
    %149 = vector.broadcast %148 : vector<1x1xf32> to vector<1x128xf32>
    %150 = arith.subf %138, %149 : vector<1x128xf32>
    %151 = math.exp %150 : vector<1x128xf32>
    %cst_201 = arith.constant 0.000000e+00 : f32
    %152 = vector.broadcast %cst_201 : f32 to vector<1x128xf32>
    %153 = arith.select %144, %151, %152 : vector<1x128xi1>, vector<1x128xf32>
    %cst_202 = arith.constant dense<0.000000e+00> : vector<1xf32>
    %154 = vector.multi_reduction <add>, %153, %cst_202 [1] : vector<1x128xf32> to vector<1xf32>
    %155 = vector.shape_cast %154 : vector<1xf32> to vector<1x1xf32>
    %156 = vector.broadcast %155 : vector<1x1xf32> to vector<1x128xf32>
    %157 = arith.divf %153, %156 : vector<1x128xf32>
    %158 = arith.select %144, %157, %138 : vector<1x128xi1>, vector<1x128xf32>
    %159 = vector.shape_cast %158 : vector<1x128xf32> to vector<1x1x128xf32>
    %c0_203 = arith.constant 0 : index
    %c0_204 = arith.constant 0 : index
    %c0_205 = arith.constant 0 : index
    %160 = vector.load %arg14[%c0_203, %c0_204, %c0_205] : memref<1x1x128xf32, #tpu.memory_space<vmem>>, vector<1x1x128xf32>
    tpu.vector_store %arg14[%c0_203, %c0_204, %c0_205], %159 {strides = array<i32>} : memref<1x1x128xf32, #tpu.memory_space<vmem>>, vector<1x1x128xf32>,
    return
  }
  func.func @transform_0(%arg0: i32) -> (i32, i32, i32, i32) {
    %c0_i32 = arith.constant 0 : i32
    %c0_i32_0 = arith.constant 0 : i32
    %c0_i32_1 = arith.constant 0 : i32
    %c0_i32_2 = arith.constant 0 : i32
    return %arg0, %c0_i32, %c0_i32_0, %c0_i32_1 : i32, i32, i32, i32
  }
  func.func @transform_1(%arg0: i32) -> (i32, i32, i32) {
    %c0_i32 = arith.constant 0 : i32
    %c0_i32_0 = arith.constant 0 : i32
    %c0_i32_1 = arith.constant 0 : i32
    return %arg0, %c0_i32, %c0_i32_0 : i32, i32, i32
  }
  func.func @transform_2(%arg0: i32) -> (i32, i32) {
    %c0_i32 = arith.constant 0 : i32
    %c0_i32_0 = arith.constant 0 : i32
    %c0_i32_1 = arith.constant 0 : i32
    return %c0_i32, %c0_i32_0 : i32, i32
  }
  func.func @transform_3(%arg0: i32) -> (i32, i32) {
    %c0_i32 = arith.constant 0 : i32
    %c0_i32_0 = arith.constant 0 : i32
    %c0_i32_1 = arith.constant 0 : i32
    return %c0_i32, %c0_i32_0 : i32, i32
  }
  func.func @transform_4(%arg0: i32) -> (i32, i32) {
    %c0_i32 = arith.constant 0 : i32
    %c0_i32_0 = arith.constant 0 : i32
    %c0_i32_1 = arith.constant 0 : i32
    return %c0_i32, %c0_i32_0 : i32, i32
  }
  func.func @transform_5(%arg0: i32) -> (i32, i32) {
    %c0_i32 = arith.constant 0 : i32
    %c0_i32_0 = arith.constant 0 : i32
    %c0_i32_1 = arith.constant 0 : i32
    return %c0_i32, %c0_i32_0 : i32, i32
  }
  func.func @transform_6(%arg0: i32) -> (i32, i32) {
    %c0_i32 = arith.constant 0 : i32
    %c0_i32_0 = arith.constant 0 : i32
    %c0_i32_1 = arith.constant 0 : i32
    return %c0_i32, %c0_i32_0 : i32, i32
  }
  func.func @transform_7(%arg0: i32) -> (i32, i32) {
    %c0_i32 = arith.constant 0 : i32
    %c0_i32_0 = arith.constant 0 : i32
    %c0_i32_1 = arith.constant 0 : i32
    return %c0_i32, %c0_i32_0 : i32, i32
  }
  func.func @transform_8(%arg0: i32) -> (i32, i32) {
    %c0_i32 = arith.constant 0 : i32
    %c0_i32_0 = arith.constant 0 : i32
    %c0_i32_1 = arith.constant 0 : i32
    return %c0_i32, %c0_i32_0 : i32, i32
  }
  func.func @transform_9(%arg0: i32) -> (i32, i32) {
    %c0_i32 = arith.constant 0 : i32
    %c0_i32_0 = arith.constant 0 : i32
    %c0_i32_1 = arith.constant 0 : i32
    return %c0_i32, %c0_i32_0 : i32, i32
  }
  func.func @transform_10(%arg0: i32) -> (i32, i32) {
    %c0_i32 = arith.constant 0 : i32
    %c0_i32_0 = arith.constant 0 : i32
    %c0_i32_1 = arith.constant 0 : i32
    return %c0_i32, %c0_i32_0 : i32, i32
  }
  func.func @transform_11(%arg0: i32) -> (i32, i32) {
    %c0_i32 = arith.constant 0 : i32
    %c0_i32_0 = arith.constant 0 : i32
    %c0_i32_1 = arith.constant 0 : i32
    return %c0_i32, %c0_i32_0 : i32, i32
  }
  func.func @transform_12(%arg0: i32) -> (i32, i32) {
    %c0_i32 = arith.constant 0 : i32
    %c0_i32_0 = arith.constant 0 : i32
    %c0_i32_1 = arith.constant 0 : i32
    return %c0_i32, %c0_i32_0 : i32, i32
  }
  func.func @transform_13(%arg0: i32) -> (i32, i32, i32) {
    %c0_i32 = arith.constant 0 : i32
    %c0_i32_0 = arith.constant 0 : i32
    %c0_i32_1 = arith.constant 0 : i32
    return %arg0, %c0_i32, %c0_i32_0 : i32, i32, i32
  }
}

</mosaic_0001>

<bundles_post_ra>
// kernel: rnn_forward.1
= control target key start
LH: loop header
LB: loop body
LE: loop exit
PB: predicated region body
PF: predicated region fallthrough
CT: control target
= control target key end

     0   :  { %s8255_s0 = inlined_call_operand.vmem [shape: bf16[2,10,10,8], index: 0, kind: input, shape index: {}]   ;;  %s8256_s1 = inlined_call_operand.vmem [shape: f32[2,32,1], index: 1, kind: input, shape index: {}]   ;;  %s8257_s2 = inlined_call_operand.vmem [shape: bf16[72,128], index: 2, kind: input, shape index: {}]   ;;  %s8258_s3 = inlined_call_operand.vmem [shape: f32[1,128], index: 3, kind: input, shape index: {}]   ;;  %s8259_s4 = inlined_call_operand.hbm [shape: bf16[1152,128], index: 4, kind: input, shape index: {}]   ;;  %s8260_s5 = inlined_call_operand.vmem [shape: f32[1,128], index: 5, kind: input, shape index: {}]   ;;  %s8261_s6 = inlined_call_operand.hbm [shape: bf16[1152,128], index: 6, kind: input, shape index: {}]   ;;  %s8262_s7 = inlined_call_operand.vmem [shape: f32[1,128], index: 7, kind: input, shape index: {}]   ;;  %s8263_s8 = inlined_call_operand.vmem [shape: f32[1,128], index: 8, kind: input, shape index: {}]   ;;  %s8264_s9 = inlined_call_operand.<no memory space> [shape: f32[1,1], index: 9, kind: input, shape index: {}]   ;;  %s8265_s10 = inlined_call_operand.vmem [shape: f32[64,128], index: 10, kind: input, shape index: {}]   ;;  %s8266_s11 = inlined_call_operand.vmem [shape: f32[32,128], index: 11, kind: input, shape index: {}]   ;;  %s8267_s12 = inlined_call_operand.vmem [shape: f32[1,128], index: 12, kind: input, shape index: {}]   ;;  %s8268_s13 = inlined_call_operand.vmem [shape: f32[2,1,128], index: 13, kind: output, shape index: {}]  }
   0x1   :  { %v18_v0 = vstv %s8264_s9 }
   0x2   :  { %19 = vst [vmem:[#allocation6] sm:$0x1] %v18_v0 }
   0x3   :  { %20 = vsyncpa [#allocation8], 0 }
   0x4   :  { %21 = vsyncpa [#allocation10], 0  ;;  %s7214_s27 = smov 0  }
   0x5 LB: > { %s358_s30 = sshll.u32 %s8259_s4, 4  ;;  %s5691_s14 = sadd.s32 4294967295, %s7126_s27   ;;  %s7126_s27 = sphi %s7214_s27, %s27_s27   ;;  %s359_s30 = int_to_ptr.hbm [resolvable:$true] %s358_s30 }
   0x6   : > { %p5693_p0 = scmp.ge.s32.totalorder %s7126_s27, 1  ;;  %p341_p1 = scmp.lt.s32.totalorder %s7126_s27, 3 }
   0x7   : > { %p7014_p2 = scmp.eq.s32.totalorder %s5691_s14, 0  ;;  %s7128_s15 = smov [#allocation7]  }
   0x8   : > { %p7225_p3 = pnand %p5693_p0, %p341_p1  ;;  %s360_s16 = sshll.u32 %s7128_s15, 4  ;;  %s361_s16 = int_to_ptr.vmem [resolvable:$true] %s360_s16 }
   0x9   : > { %s375_s19 = sshll.u32 %s8261_s6, 4  ;;  %s7129_s20 = smov [#allocation9]   ;;  %s376_s19 = int_to_ptr.hbm [resolvable:$true] %s375_s19 }
   0xa   : > { %p7007_p4 = pneg %p7225_p3  ;;  %s377_s21 = sshll.u32 %s7129_s20, 4  ;;  %s378_s21 = int_to_ptr.vmem [resolvable:$true] %s377_s21 }
   0xb   : > { %s7130_s22 = smov 64   ;;  %s7131_s23 = smov 4  }
   0xc   : > { %p7008_p5 = pnand %p7014_p2, %p7007_p4  ;;  %427 = sbr.rel (%p7225_p3) target bundleno = 1573 (0x625), region = 72 }
   0xe   : > { %7010 = dma.hbm_to_vmem [thread:$0]  (!%p7008_p5), %s359_s30, 9216, %s361_s16, [#allocation8], %s7130_s22, %s7130_s22, %s7131_s23  }
   0xf   : > { %7013 = dma.hbm_to_vmem [thread:$0]  (!%p7008_p5), %s376_s19, 9216, %s378_s21, [#allocation10], %s7130_s22, %s7130_s22, %s7131_s23  }
  0x11   : > { %7117 = dma.done.wait (%p7014_p2), [#allocation8], 9216  }
  0x12   : > { %7119 = vsyncadd (%p7014_p2), [#allocation8], 4294958080 }
  0x13   : > { %7121 = dma.done.wait (%p7014_p2), [#allocation10], 9216  }
  0x14   : > { %7123 = vsyncadd (%p7014_p2), [#allocation10], 4294958080  ;;  %p480_p6 = scmp.lt.s32.totalorder %s5691_s14, 1  ;;  %vm707_vm0 = vcmask 1042432   ;;  %vm708_vm1 = vcmask 1046532   ;;  %s7132_s29 = smov 16  }
  0x15   : > { %vm7249_vm2 = vmor %vm707_vm0, %vm708_vm1  ;;  %vm527_vm3 = vsmask.f32 3328  ;;  %vm528_vm4 = vsmask.f32 7440  ;;  %s7133_s30 = smov 8   ;;  %s7134_s9 = smov 24  }
  0x16   : > { %s8296_s14 = smov (!%p480_p6, %s5691_s14), 1  ;;  %vm7268_vm5 = vmor %vm527_vm3, %vm528_vm4  ;;  %s7135_s15 = smov 32   ;;  %vm502_vm6 = vcmask 60416   ;;  %vm666_vm7 = vcmask 126016   ;;  %vm1472_vm8 = vcmask 1043456   ;;  %vm766_vm9 = vcmask 191616  }
  0x17   : > { %s6998_s24 = smul.u32 80, %s8296_s14  ;;  %s7136_s16 = smov 48   ;;  %vm816_vm10 = vcmask 257216   ;;  %vm977_vm11 = vcmask 322816   ;;  %vm1074_vm12 = vcmask 388416   ;;  %vm1124_vm13 = vcmask 454016  }
  0x18   : > { %s7137_s17 = smov 40   ;;  %s7138_s18 = smov 56   ;;  %vm1285_vm14 = vcmask 519616   ;;  %vm1382_vm15 = vcmask 585216   ;;  %vm1459_vm0 = vcmask 588800   ;;  %vm1636_vm3 = vcmask 1040384  }
  0x19   : > { %s7247_s28 = scalar_lea.vmem %s8255_s0, %s6998_s24  ;;  %s7139_s19 = smov 64   ;;  %vm1631_vm1 = vsmask.f32 7938  ;;  %vm1637_vm4 = vsmask.f32 256 }
  0x1a   : > { %v675_v2 = vld [vmem:[%s7247_s28] sm:$0xe]  ;;  %v676_v3 = vld [vmem:[%s7247_s28 + $0x4] sm:$0x1]  ;;  %v677_v11 = vld [vmem:[%s7247_s28 + $0x8] sm:$0xe]  ;;  %s492_s24 = scalar_lea.vmem %s8268_s13, %s8296_s14 }
  0x1b   : > { %v511_v4 = vld [vmem:[%s7247_s28] sm:$0xf]  ;;  %v5703_v5 = vrot.slane %v675_v2, 9  ;;  %v712_v6 = vrot.slane %v676_v3, 5  ;;  %v512_v7 = vld [vmem:[%s7247_s28 + $0x4] sm:$0x1] }
  0x1c   : > { %v531_v8 = vshrl.u32 %v511_v4, 16  ;;  %v534_v9 = vshll.u32 %v511_v4, 16  ;;  %v540_v10 = vshll.u32 %v512_v7, 16  ;;  %v678_v12 = vld [vmem:[%s7247_s28 + $0xc] sm:$0x1]  ;;  %v5704_v17 = vrot.slane %v677_v11, 9 }
  0x1d   : > { %v713_v13 = vsel %vm7249_vm2, %v5703_v5, %v712_v6  ;;  %v513_v16 = vld [vmem:[%s7247_s28 + $0x8] sm:$0xf]  ;;  %v514_v18 = vld [vmem:[%s7247_s28 + $0xc] sm:$0x1]  ;;  %v716_v23 = vrot.slane %v678_v12, 5 }
  0x1e   : > { %v533_v14 = vrot.slane %v531_v8, 4  ;;  %v536_v15 = vrot.slane %v534_v9, 5  ;;  %742 = vrot.lane.b32.xlu1 %v713_v13, %s7132_s29  ;;  %v545_v19 = vshrl.u32 %v513_v16, 16  ;;  %v548_v20 = vshll.u32 %v513_v16, 16  ;;  %v5721_v24 = vld [vmem:[%s7247_s28 + $0x10] sm:$0xf] }
  0x1f   : > { %v542_v22 = vrot.slane %v540_v10, 5  ;;  %v5722_v25 = vld [vmem:[%s7247_s28 + $0x14] sm:$0x1]  ;;  %v554_v29 = vshll.u32 %v514_v18, 16  ;;  %v856_v30 = vshrl.u32 %v5721_v24, 16  ;;  %v859_v33 = vshll.u32 %v5721_v24, 16 }
  0x20   : > { %v537_v21 = vor.u32 %v536_v15, %v533_v14  ;;  %v547_v27 = vrot.slane %v545_v19, 4  ;;  %v550_v28 = vrot.slane %v548_v20, 5  ;;  %v5719_v31 = vld [vmem:[%s7247_s28 + $0x8] sm:$0xf]  ;;  %v717_v39 = vsel %vm7249_vm2, %v5704_v17, %v716_v23  ;;  %v5720_v48 = vld [vmem:[%s7247_s28 + $0xc] sm:$0x1] }
  0x21   : > { %v858_v35 = vrot.slane %v856_v30, 4  ;;  %v842_v36 = vshrl.u32 %v5719_v31, 16  ;;  %v845_v37 = vshll.u32 %v5719_v31, 16  ;;  %v861_v40 = vrot.slane %v859_v33, 5  ;;  %v5711_v47 = vld [vmem:[%s7247_s28 + $0x8] sm:$0xf] }
  0x22   : > { %v538_v32 = vrot.slane %v537_v21, 4  ;;  %v551_v34 = vor.u32 %v550_v28, %v547_v27  ;;  %v865_v41 = vshll.u32 %v5722_v25, 16  ;;  %v556_v42 = vrot.slane %v554_v29, 5  ;;  %792 = vrot.lane.b32.xlu2 %v5711_v47, %s7134_s9  ;;  %v5769_v51 = vld [vmem:[%s7247_s28 + $0x18] sm:$0xf] }
  0x23   : > { %v862_v44 = vor.u32 %v861_v40, %v858_v35  ;;  %v844_v45 = vrot.slane %v842_v36, 4  ;;  %v847_v46 = vrot.slane %v845_v37, 5  ;;  %v851_v54 = vshll.u32 %v5720_v48, 16  ;;  %v5712_v58 = vld [vmem:[%s7247_s28 + $0x10] sm:$0xf] }
  0x24   : > { %v543_v38 = vsel %vm7268_vm5, %v538_v32, %v542_v22  ;;  %v552_v43 = vrot.slane %v551_v34, 4  ;;  %v867_v50 = vrot.slane %v865_v41, 5  ;;  %v1164_v56 = vshrl.u32 %v5769_v51, 16  ;;  %v5735_v59 = vld [vmem:[%s7247_s28 + $0x8] sm:$0xe] }
  0x25   : > { %642 = vrot.lane.b32.xlu0 %v543_v38, %s7133_s30  ;;  %v863_v49 = vrot.slane %v862_v44, 4  ;;  %v848_v53 = vor.u32 %v847_v46, %v844_v45  ;;  %v1167_v57 = vshll.u32 %v5769_v51, 16  ;;  %v853_v61 = vrot.slane %v851_v54, 5  ;;  %v5736_v62 = vld [vmem:[%s7247_s28 + $0xc] sm:$0x1] }
  0x26   : > { %744 = vrot.lane.b32.xlu1 %v717_v39, %s7132_s29  ;;  %v557_v52 = vsel %vm7268_vm5, %v552_v43, %v556_v42  ;;  %v5767_v63 = vld [vmem:[%s7247_s28 + $0x10] sm:$0xf]  ;;  %v1166_v0 = vrot.slane %v1164_v56, 4  ;;  %v5751_v4 = vrot.slane %v5735_v59, 9  ;;  %v1020_v5 = vrot.slane %v5736_v62, 5 }
  0x27   : > { %v868_v55 = vsel %vm7268_vm5, %v863_v49, %v867_v50  ;;  %v849_v60 = vrot.slane %v848_v53, 4  ;;  %v1169_v2 = vrot.slane %v1167_v57, 5  ;;  %v515_v3 = vld [vmem:[%s7247_s28 + $0x10] sm:$0xf]  ;;  %v5770_v7 = vld [vmem:[%s7247_s28 + $0x1c] sm:$0x1] }
  0x28   : > { %v5737_v6 = vld [vmem:[%s7247_s28 + $0x10] sm:$0xe]  ;;  %v1150_v9 = vshrl.u32 %v5767_v63, 16  ;;  %v1153_v10 = vshll.u32 %v5767_v63, 16  ;;  %v5738_v11 = vld [vmem:[%s7247_s28 + $0x14] sm:$0x1]  ;;  %v1021_v17 = vsel %vm7249_vm2, %v5751_v4, %v1020_v5 }
  0x29   : > { %v854_v8 = vsel %vm7268_vm5, %v849_v60, %v853_v61  ;;  %v559_v12 = vshrl.u32 %v515_v3, 16  ;;  %v562_v13 = vshll.u32 %v515_v3, 16  ;;  %v5759_v14 = vld [vmem:[%s7247_s28 + $0x10] sm:$0xf]  ;;  %v1170_v15 = vor.u32 %v1169_v2, %v1166_v0  ;;  %v5768_v22 = vld [vmem:[%s7247_s28 + $0x14] sm:$0x1] }
  0x2a   : > { %794 = vrot.lane.b32.xlu2 %v5712_v58, %s7134_s9  ;;  %v1173_v16 = vshll.u32 %v5770_v7, 16  ;;  %v5752_v18 = vrot.slane %v5737_v6, 9  ;;  %v1024_v19 = vrot.slane %v5738_v11, 5  ;;  %v1152_v20 = vrot.slane %v1150_v9, 4  ;;  %v516_v28 = vld [vmem:[%s7247_s28 + $0x14] sm:$0x1] }
  0x2b   : > { %v1155_v21 = vrot.slane %v1153_v10, 5  ;;  %v561_v23 = vrot.slane %v559_v12, 4  ;;  %v564_v24 = vrot.slane %v562_v13, 5  ;;  %v1171_v25 = vrot.slane %v1170_v15, 4  ;;  %v5760_v35 = vld [vmem:[%s7247_s28 + $0x18] sm:$0xf] }
  0x2c   : > { %v1175_v27 = vrot.slane %v1173_v16, 5  ;;  %v1025_v29 = vsel %vm7249_vm2, %v5752_v18, %v1024_v19  ;;  %v1159_v31 = vshll.u32 %v5768_v22, 16  ;;  %v568_v33 = vshll.u32 %v516_v28, 16  ;;  %v517_v36 = vld [vmem:[%s7247_s28 + $0x18] sm:$0xf] }
  0x2d   : > { %644 = vrot.lane.b32.xlu0 %v557_v52, %s7133_s30  ;;  %v1156_v30 = vor.u32 %v1155_v21, %v1152_v20  ;;  %v565_v32 = vor.u32 %v564_v24, %v561_v23  ;;  %v5783_v37 = vld [vmem:[%s7247_s28 + $0x10] sm:$0xe]  ;;  %v5784_v38 = vld [vmem:[%s7247_s28 + $0x14] sm:$0x1]  ;;  %v573_v39 = vshrl.u32 %v517_v36, 16  ;;  %v576_v40 = vshll.u32 %v517_v36, 16 }
  0x2e   : > { %955 = vrot.lane.b32.xlu1 %v868_v55, %s7135_s15  ;;  %v1176_v34 = vsel %vm7268_vm5, %v1171_v25, %v1175_v27  ;;  %v1161_v42 = vrot.slane %v1159_v31, 5  ;;  %v570_v44 = vrot.slane %v568_v33, 5  ;;  %v5723_v45 = vld [vmem:[%s7247_s28 + $0x18] sm:$0xf]  ;;  %v5799_v46 = vrot.slane %v5783_v37, 9 }
  0x2f   : > { %v1157_v41 = vrot.slane %v1156_v30, 4  ;;  %v566_v43 = vrot.slane %v565_v32, 4  ;;  %v1328_v47 = vrot.slane %v5784_v38, 5  ;;  %v575_v48 = vrot.slane %v573_v39, 4  ;;  %v518_v50 = vld [vmem:[%s7247_s28 + $0x1c] sm:$0x1] }
  0x30   : > { %v578_v49 = vrot.slane %v576_v40, 5  ;;  %v5785_v52 = vld [vmem:[%s7247_s28 + $0x18] sm:$0xe]  ;;  %v5786_v53 = vld [vmem:[%s7247_s28 + $0x1c] sm:$0x1]  ;;  %v870_v54 = vshrl.u32 %v5723_v45, 16 }
  0x31   : > { %v1162_v51 = vsel %vm7268_vm5, %v1157_v41, %v1161_v42  ;;  %v873_v55 = vshll.u32 %v5723_v45, 16  ;;  %v571_v56 = vsel %vm7268_vm5, %v566_v43, %v570_v44  ;;  %v1329_v57 = vsel %vm7249_vm2, %v5799_v46, %v1328_v47  ;;  %v681_v60 = vld [vmem:[%s7247_s28 + $0x18] sm:$0xe]  ;;  %v682_v61 = vld [vmem:[%s7247_s28 + $0x1c] sm:$0x1] }
  0x32   : > { %1050 = vrot.lane.b32.xlu2 %v1021_v17, %s7137_s17  ;;  %v579_v58 = vor.u32 %v578_v49, %v575_v48  ;;  %v582_v59 = vshll.u32 %v518_v50, 16  ;;  %v5800_v62 = vrot.slane %v5785_v52, 9  ;;  %v1332_v63 = vrot.slane %v5786_v53, 5  ;;  %v5724_v5 = vld [vmem:[%s7247_s28 + $0x1c] sm:$0x1] }
  0x33   : > { %v872_v0 = vrot.slane %v870_v54, 4  ;;  %v875_v2 = vrot.slane %v873_v55, 5  ;;  %v5706_v3 = vrot.slane %v681_v60, 9  ;;  %v724_v4 = vrot.slane %v682_v61, 5  ;;  %v679_v9 = vld [vmem:[%s7247_s28 + $0x10] sm:$0xe] }
  0x34   : > { %v580_v6 = vrot.slane %v579_v58, 4  ;;  %v584_v7 = vrot.slane %v582_v59, 5  ;;  %v680_v10 = vld [vmem:[%s7247_s28 + $0x14] sm:$0x1]  ;;  %v879_v12 = vshll.u32 %v5724_v5, 16  ;;  %v5705_v16 = vrot.slane %v679_v9, 9 }
  0x35   : > { %953 = vrot.lane.b32.xlu0 %v854_v8, %s7135_s15  ;;  %v1333_v8 = vsel %vm7249_vm2, %v5800_v62, %v1332_v63  ;;  %v876_v11 = vor.u32 %v875_v2, %v872_v0  ;;  %v725_v13 = vsel %vm7249_vm2, %v5706_v3, %v724_v4  ;;  %v5725_v15 = vld [vmem:[%s7247_s28 + $0x20] sm:$0xf]  ;;  %v720_v17 = vrot.slane %v680_v10, 5  ;;  %v5726_v24 = vld [vmem:[%s7247_s28 + $0x24] sm:$0x1] }
  0x36   : > { %1100 = vrot.lane.b32.xlu1 %v5759_v14, %s7136_s16  ;;  %v585_v14 = vsel %vm7268_vm5, %v580_v6, %v584_v7  ;;  %v884_v18 = vshrl.u32 %v5725_v15, 16  ;;  %v887_v19 = vshll.u32 %v5725_v15, 16  ;;  %v881_v21 = vrot.slane %v879_v12, 5  ;;  %v5771_v23 = vld [vmem:[%s7247_s28 + $0x20] sm:$0xf] }
  0x37   : > { %v877_v20 = vrot.slane %v876_v11, 4  ;;  %v721_v27 = vsel %vm7249_vm2, %v5705_v16, %v720_v17  ;;  %v5742_v30 = vld [vmem:[%s7247_s28 + $0x24] sm:$0x1]  ;;  %v1178_v31 = vshrl.u32 %v5771_v23, 16  ;;  %v1181_v32 = vshll.u32 %v5771_v23, 16 }
  0x38   : > { %v886_v22 = vrot.slane %v884_v18, 4  ;;  %v889_v25 = vrot.slane %v887_v19, 5  ;;  %v5713_v33 = vld [vmem:[%s7247_s28 + $0x18] sm:$0xf]  ;;  %v1032_v37 = vrot.slane %v5742_v30, 5 }
  0x39   : > { %v882_v28 = vsel %vm7268_vm5, %v877_v20, %v881_v21  ;;  %v1180_v38 = vrot.slane %v1178_v31, 4  ;;  %v1183_v39 = vrot.slane %v1181_v32, 5  ;;  %v5772_v42 = vld [vmem:[%s7247_s28 + $0x24] sm:$0x1]  ;;  %v5714_v43 = vld [vmem:[%s7247_s28 + $0x20] sm:$0xf] }
  0x3a   : > { %1102 = vrot.lane.b32.xlu2 %v5760_v35, %s7136_s16  ;;  %v893_v35 = vshll.u32 %v5726_v24, 16  ;;  %v5739_v44 = vld [vmem:[%s7247_s28 + $0x18] sm:$0xe]  ;;  %v5740_v45 = vld [vmem:[%s7247_s28 + $0x1c] sm:$0x1]  ;;  %v1187_v48 = vshll.u32 %v5772_v42, 16 }
  0x3b   : > { %v1184_v47 = vor.u32 %v1183_v39, %v1180_v38  ;;  %v5773_v50 = vld [vmem:[%s7247_s28 + $0x28] sm:$0xf]  ;;  %v5753_v53 = vrot.slane %v5739_v44, 9  ;;  %v1028_v54 = vrot.slane %v5740_v45, 5  ;;  %v5774_v59 = vld [vmem:[%s7247_s28 + $0x2c] sm:$0x1] }
  0x3c   : > { %v895_v41 = vrot.slane %v893_v35, 5  ;;  %v1195_v52 = vshll.u32 %v5773_v50, 16  ;;  %v5789_v61 = vld [vmem:[%s7247_s28 + $0x28] sm:$0xe]  ;;  %v5790_v62 = vld [vmem:[%s7247_s28 + $0x2c] sm:$0x1] }
  0x3d   : > { %1052 = vrot.lane.b32.xlu0 %v1025_v29, %s7137_s17  ;;  %v5741_v29 = vld [vmem:[%s7247_s28 + $0x20] sm:$0xe]  ;;  %v1185_v55 = vrot.slane %v1184_v47, 4  ;;  %v1029_v60 = vsel %vm7249_vm2, %v5753_v53, %v1028_v54  ;;  %v1201_v3 = vshll.u32 %v5774_v59, 16  ;;  %v5802_v7 = vrot.slane %v5789_v61, 9 }
  0x3e   : > { %1263 = vrot.lane.b32.xlu1 %v1176_v34, %s7138_s18  ;;  %v890_v34 = vor.u32 %v889_v25, %v886_v22  ;;  %v5754_v36 = vrot.slane %v5741_v29, 9  ;;  %v1197_v58 = vrot.slane %v1195_v52, 5  ;;  %v5761_v0 = vld [vmem:[%s7247_s28 + $0x20] sm:$0xf]  ;;  %v521_v9 = vld [vmem:[%s7247_s28 + $0x28] sm:$0xf] }
  0x3f   : > { %v519_v4 = vld [vmem:[%s7247_s28 + $0x20] sm:$0xf]  ;;  %v1203_v11 = vrot.slane %v1201_v3, 5  ;;  %v5762_v15 = vld [vmem:[%s7247_s28 + $0x28] sm:$0xf]  ;;  %v601_v16 = vshrl.u32 %v521_v9, 16 }
  0x40   : > { %v891_v40 = vrot.slane %v890_v34, 4  ;;  %v1033_v46 = vsel %vm7249_vm2, %v5754_v36, %v1032_v37  ;;  %v587_v5 = vshrl.u32 %v519_v4, 16  ;;  %v590_v6 = vshll.u32 %v519_v4, 16  ;;  %v5787_v18 = vld [vmem:[%s7247_s28 + $0x20] sm:$0xe] }
  0x41   : > { %v604_v17 = vshll.u32 %v521_v9, 16  ;;  %v5788_v19 = vld [vmem:[%s7247_s28 + $0x24] sm:$0x1]  ;;  %v683_v24 = vld [vmem:[%s7247_s28 + $0x20] sm:$0xe]  ;;  %v603_v29 = vrot.slane %v601_v16, 4 }
  0x42   : > { %1358 = vrot.lane.b32.xlu2 %v1329_v57, %s7139_s19  ;;  %v896_v49 = vsel %vm7268_vm5, %v891_v40, %v895_v41  ;;  %v589_v12 = vrot.slane %v587_v5, 4  ;;  %v684_v25 = vld [vmem:[%s7247_s28 + $0x24] sm:$0x1]  ;;  %v522_v31 = vld [vmem:[%s7247_s28 + $0x2c] sm:$0x1]  ;;  %v5707_v32 = vrot.slane %v683_v24, 9 }
  0x43   : > { %v606_v30 = vrot.slane %v604_v17, 5  ;;  %v610_v38 = vshll.u32 %v522_v31, 16  ;;  %v5727_v41 = vld [vmem:[%s7247_s28 + $0x28] sm:$0xf]  ;;  %v494_v47 = vld [vmem:[%s7247_s28] sm:$0xf] }
  0x44   : > { %v685_v42 = vld [vmem:[%s7247_s28 + $0x28] sm:$0xe]  ;;  %v898_v44 = vshrl.u32 %v5727_v41, 16  ;;  %503 = vst.msk [vmem:[#allocation3] sm:$0xf] %vm502_vm6, %v494_v47 }
  0x45   : > { %1261 = vrot.lane.b32.xlu0 %v1162_v51, %s7138_s18  ;;  %v1192_v51 = vshrl.u32 %v5773_v50, 16  ;;  %v607_v37 = vor.u32 %v606_v30, %v603_v29  ;;  %v5708_v50 = vrot.slane %v685_v42, 9  ;;  %v5728_v53 = vld [vmem:[%s7247_s28 + $0x2c] sm:$0x1]  ;;  %v495_v3 = vld [vmem:[%s7247_s28 + $0x8] sm:$0xf] }
  0x46   : > { %646 = vrot.lane.b32.xlu1 %v571_v56, %s7133_s30  ;;  %v1189_v56 = vrot.slane %v1187_v48, 5  ;;  %v901_v48 = vshll.u32 %v5727_v41, 16  ;;  %v900_v52 = vrot.slane %v898_v44, 4  ;;  %v907_v61 = vshll.u32 %v5728_v53, 16  ;;  %v5730_v4 = vld [vmem:[%s7247_s28 + $0x34] sm:$0x1] }
  0x47   : > { %v1194_v57 = vrot.slane %v1192_v51, 4  ;;  %v608_v45 = vrot.slane %v607_v37, 4  ;;  %504 = vst.msk [vmem:[#allocation3 + $0x4] sm:$0xf] %vm502_vm6, %v495_v3  ;;  %v5745_v16 = vld [vmem:[%s7247_s28 + $0x30] sm:$0xe] }
  0x48   : > { %v1190_v63 = vsel %vm7268_vm5, %v1185_v55, %v1189_v56  ;;  %v903_v54 = vrot.slane %v901_v48, 5  ;;  %v5746_v17 = vld [vmem:[%s7247_s28 + $0x34] sm:$0x1]  ;;  %v5778_v42 = vld [vmem:[%s7247_s28 + $0x3c] sm:$0x1] }
  0x49   : > { %v1198_v2 = vor.u32 %v1197_v58, %v1194_v57  ;;  %v5716_v58 = vld [vmem:[%s7247_s28 + $0x30] sm:$0xf]  ;;  %v1040_v24 = vrot.slane %v5746_v17, 5  ;;  %v5776_v30 = vld [vmem:[%s7247_s28 + $0x34] sm:$0x1] }
  0x4a   : > { %648 = vrot.lane.b32.xlu2 %v585_v14, %s7133_s30  ;;  %v520_v14 = vld [vmem:[%s7247_s28 + $0x24] sm:$0x1]  ;;  %v5792_v37 = vld [vmem:[%s7247_s28 + $0x34] sm:$0x1]  ;;  %v1215_v41 = vshll.u32 %v5776_v30, 16 }
  0x4b   : > { %v1199_v10 = vrot.slane %v1198_v2, 4  ;;  %v596_v23 = vshll.u32 %v520_v14, 16  ;;  %v523_v47 = vld [vmem:[%s7247_s28 + $0x30] sm:$0xf]  ;;  %v526_v48 = vld [vmem:[%s7247_s28 + $0x3c] sm:$0x1] }
  0x4c   : > { %v1407_v53 = vld [vmem:[%s8257_s2 + $0x20] sm:$0xf] }
  0x4d   : > { %1360 = vrot.lane.b32.xlu0 %v1333_v8, %s7139_s19  ;;  %v1340_v8 = vrot.slane %v5790_v62, 5  ;;  %v1204_v21 = vsel %vm7268_vm5, %v1199_v10, %v1203_v11  ;;  %v598_v35 = vrot.slane %v596_v23, 5  ;;  %v5743_v62 = vld [vmem:[%s7247_s28 + $0x28] sm:$0xe]  ;;  %v5756_v23 = vrot.slane %v5745_v16, 9 }
  0x4e   : > { %748 = vrot.lane.b32.xlu1 %v725_v13, %s7132_s29  ;;  %v592_v13 = vrot.slane %v590_v6, 5  ;;  %v5755_v5 = vrot.slane %v5743_v62, 9  ;;  %v5715_v10 = vld [vmem:[%s7247_s28 + $0x28] sm:$0xf]  ;;  %v638_v62 = vshll.u32 %v526_v48, 16 }
  0x4f   : > { %v1341_v20 = vsel %vm7249_vm2, %v5802_v7, %v1340_v8  ;;  %v909_v8 = vrot.slane %v907_v61, 5  ;;  %v618_v61 = vshll.u32 %v523_v47, 16  ;;  %v688_v48 = vld [vmem:[%s7247_s28 + $0x34] sm:$0x1] }
  0x50   : > { %v593_v22 = vor.u32 %v592_v13, %v589_v12  ;;  %v921_v12 = vshll.u32 %v5730_v4, 16  ;;  %v5793_v4 = vld [vmem:[%s7247_s28 + $0x38] sm:$0xe] }
  0x51   : > { %v5804_v16 = vrot.slane %v5793_v4, 9 }
  0x52   : > { %796 = vrot.lane.b32.xlu2 %v5713_v33, %s7134_s9  ;;  %v728_v33 = vrot.slane %v684_v25, 5  ;;  %v594_v34 = vrot.slane %v593_v22, 4  ;;  %v5777_v22 = vld [vmem:[%s7247_s28 + $0x38] sm:$0xf] }
  0x53   : > { %v525_v25 = vld [vmem:[%s7247_s28 + $0x38] sm:$0xf] }
  0x54   : > { %v729_v39 = vsel %vm7249_vm2, %v5707_v32, %v728_v33  ;;  %v599_v40 = vsel %vm7268_vm5, %v594_v34, %v598_v35  ;;  %v1220_v32 = vshrl.u32 %v5777_v22, 16  ;;  %v1223_v33 = vshll.u32 %v5777_v22, 16  ;;  %v5764_v34 = vld [vmem:[%s7247_s28 + $0x38] sm:$0xf] }
  0x55   : > { %746 = vrot.lane.b32.xlu0 %v721_v27, %s7132_s29  ;;  %v5801_v27 = vrot.slane %v5787_v18, 9  ;;  %v629_v35 = vshrl.u32 %v525_v25, 16 }
  0x56   : > { %957 = vrot.lane.b32.xlu1 %v882_v28, %s7135_s15  ;;  %v1336_v28 = vrot.slane %v5788_v19, 5  ;;  %v1225_v44 = vrot.slane %v1223_v33, 5 }
  0x58   : > { %v1337_v36 = vsel %vm7249_vm2, %v5801_v27, %v1336_v28 }
  0x5a   : > { %959 = vrot.lane.b32.xlu2 %v896_v49, %s7135_s15  ;;  %v5729_v49 = vld [vmem:[%s7247_s28 + $0x30] sm:$0xf] }
  0x5b   : > { %v912_v56 = vshrl.u32 %v5729_v49, 16  ;;  %v915_v57 = vshll.u32 %v5729_v49, 16  ;;  %v631_v49 = vrot.slane %v629_v35, 4 }
  0x5d   : > { %798 = vrot.lane.b32.xlu0 %v5714_v43, %s7134_s9  ;;  %v686_v43 = vld [vmem:[%s7247_s28 + $0x2c] sm:$0x1]  ;;  %v917_v2 = vrot.slane %v915_v57, 5  ;;  %v5763_v57 = vld [vmem:[%s7247_s28 + $0x30] sm:$0xf] }
  0x5e   : > { %1056 = vrot.lane.b32.xlu1 %v1033_v46, %s7137_s17  ;;  %v612_v46 = vrot.slane %v610_v38, 5  ;;  %v732_v51 = vrot.slane %v686_v43, 5  ;;  %v1041_v38 = vsel %vm7249_vm2, %v5756_v23, %v1040_v24  ;;  %v1222_v43 = vrot.slane %v1220_v32, 4  ;;  %v496_v32 = vld [vmem:[%s7247_s28 + $0x10] sm:$0xf] }
  0x5f   : > { %505 = vst.msk [vmem:[#allocation3 + $0x8] sm:$0xf] %vm502_vm6, %v496_v32  ;;  %v5765_v32 = vld [vmem:[%s7247_s28 + $0x40] sm:$0xf] }
  0x60   : > { %v613_v55 = vsel %vm7268_vm5, %v608_v45, %v612_v46  ;;  %v733_v59 = vsel %vm7249_vm2, %v5708_v50, %v732_v51  ;;  %v1344_v46 = vrot.slane %v5792_v37, 5  ;;  %v5734_v37 = vld [vmem:[%s7247_s28 + $0x44] sm:$0x1] }
  0x62   : > { %1104 = vrot.lane.b32.xlu2 %v5761_v0, %s7136_s16  ;;  %v914_v0 = vrot.slane %v912_v56, 4  ;;  %v1449_v56 = vunpack.c.l.b16 %v1407_v53 }
  0x64   : > { %v918_v11 = vor.u32 %v917_v2, %v914_v0 }
  0x65   : > { %1054 = vrot.lane.b32.xlu0 %v1029_v60, %s7137_s17  ;;  %v904_v60 = vor.u32 %v903_v54, %v900_v52  ;;  %v1217_v52 = vrot.slane %v1215_v41, 5  ;;  %v6763_v41 = vld [vmem:[%s8257_s2 + $0x8] sm:$0xff] }
  0x66   : > { %1265 = vrot.lane.b32.xlu1 %v1190_v63, %s7138_s18  ;;  %v5744_v63 = vld [vmem:[%s7247_s28 + $0x2c] sm:$0x1] }
  0x67   : > { %v1036_v6 = vrot.slane %v5744_v63, 5  ;;  %v905_v7 = vrot.slane %v904_v60, 4  ;;  %v615_v60 = vshrl.u32 %v523_v47, 16  ;;  %v1454_v63 = vpack.c.b16 %v1449_v56, %v1449_v56 }
  0x69   : > { %v1037_v13 = vsel %vm7249_vm2, %v5755_v5, %v1036_v6  ;;  %v910_v14 = vsel %vm7268_vm5, %v905_v7, %v909_v8  ;;  %v5794_v5 = vld [vmem:[%s7247_s28 + $0x3c] sm:$0x1]  ;;  %v1474_v6 = vsel %vm1472_vm8, %v1454_v63, 0 }
  0x6a   : > { %1267 = vrot.lane.b32.xlu2 %v1204_v21, %s7138_s18  ;;  %v923_v21 = vrot.slane %v921_v12, 5  ;;  %1479 = vmatpush.bf16.msra.mxu0 %v1474_v6  ;;  %v1348_v17 = vrot.slane %v5794_v5, 5  ;;  %v5781_v6 = vld [vmem:[%s7247_s28 + $0x48] sm:$0xf] }
  0x6d   : > { %1106 = vrot.lane.b32.xlu0 %v5762_v15, %s7136_s16  ;;  %v5775_v15 = vld [vmem:[%s7247_s28 + $0x30] sm:$0xf] }
  0x6e   : > { %1364 = vrot.lane.b32.xlu1 %v1341_v20, %s7139_s19  ;;  %v1206_v18 = vshrl.u32 %v5775_v15, 16  ;;  %v1209_v19 = vshll.u32 %v5775_v15, 16  ;;  %v919_v20 = vrot.slane %v918_v11, 4  ;;  %v620_v11 = vrot.slane %v618_v61, 5  ;;  %v5732_v61 = vld [vmem:[%s7247_s28 + $0x3c] sm:$0x1] }
  0x6f   : > { %v935_v4 = vshll.u32 %v5732_v61, 16  ;;  %v5798_v61 = vld [vmem:[%s7247_s28 + $0x4c] sm:$0x1] }
  0x70   : > { %v1208_v27 = vrot.slane %v1206_v18, 4  ;;  %v1211_v28 = vrot.slane %v1209_v19, 5  ;;  %v924_v31 = vsel %vm7268_vm5, %v919_v20, %v923_v21  ;;  %v6765_v18 = vld [vmem:[%s8257_s2 + $0x18] sm:$0xff]  ;;  %v5733_v21 = vld [vmem:[%s7247_s28 + $0x40] sm:$0xf] }
  0x71   : > { %1480 = vmatpush.bf16.msra.mxu0 %v6765_v18  ;;  %v940_v30 = vshrl.u32 %v5733_v21, 16 }
  0x72   : > { %650 = vrot.lane.b32.xlu2 %v599_v40, %s7133_s30  ;;  %v1212_v40 = vor.u32 %v1211_v28, %v1208_v27  ;;  %v5731_v27 = vld [vmem:[%s7247_s28 + $0x38] sm:$0xf]  ;;  %v1349_v28 = vsel %vm7249_vm2, %v5804_v16, %v1348_v17  ;;  %v5782_v16 = vld [vmem:[%s7247_s28 + $0x4c] sm:$0x1] }
  0x74   : > { %v1213_v51 = vrot.slane %v1212_v40, 4 }
  0x75   : > { %1362 = vrot.lane.b32.xlu0 %v1337_v36, %s7139_s19  ;;  %v5791_v36 = vld [vmem:[%s7247_s28 + $0x30] sm:$0xe] }
  0x76   : > { %750 = vrot.lane.b32.xlu1 %v729_v39, %s7132_s29  ;;  %v632_v39 = vshll.u32 %v525_v25, 16  ;;  %v5803_v45 = vrot.slane %v5791_v36, 9  ;;  %v1218_v3 = vsel %vm7268_vm5, %v1213_v51, %v1217_v52  ;;  %v926_v36 = vshrl.u32 %v5731_v27, 16  ;;  %v5717_v52 = vld [vmem:[%s7247_s28 + $0x38] sm:$0xf] }
  0x77   : > { %v736_v51 = vrot.slane %v688_v48, 5 }
  0x78   : > { %v634_v50 = vrot.slane %v632_v39, 5  ;;  %v1345_v0 = vsel %vm7249_vm2, %v5803_v45, %v1344_v46  ;;  %v942_v39 = vrot.slane %v940_v30, 4  ;;  %v497_v45 = vld [vmem:[%s7247_s28 + $0x18] sm:$0xf]  ;;  %v687_v46 = vld [vmem:[%s7247_s28 + $0x30] sm:$0xe] }
  0x79   : > { %506 = vst.msk [vmem:[#allocation3 + $0xc] sm:$0xf] %vm502_vm6, %v497_v45  ;;  %v928_v56 = vrot.slane %v926_v36, 4 }
  0x7a   : > { %752 = vrot.lane.b32.xlu2 %v733_v59, %s7132_s29  ;;  %v1229_v59 = vshll.u32 %v5778_v42, 16  ;;  %v635_v2 = vor.u32 %v634_v50, %v631_v49  ;;  %v5709_v49 = vrot.slane %v687_v46, 9  ;;  %v690_v50 = vld [vmem:[%s7247_s28 + $0x3c] sm:$0x1] }
  0x7c   : > { %v7427_v9 = vpop.permute.xlu2 %792  ;;  %v1231_v8 = vrot.slane %v1229_v59, 5  ;;  %v636_v15 = vrot.slane %v635_v2, 4 }
  0x7d   : > { %652 = vrot.lane.b32.xlu0 %v613_v55, %s7133_s30 }
  0x7e   : > { %802 = vrot.lane.b32.xlu1 %v5716_v58, %s7134_s9  ;;  %v1226_v58 = vor.u32 %v1225_v44, %v1222_v43  ;;  %v689_v43 = vld [vmem:[%s7247_s28 + $0x38] sm:$0xe] }
  0x7f   : > { %v5710_v59 = vrot.slane %v689_v43, 9 }
  0x80   : > { %v1227_v7 = vrot.slane %v1226_v58, 4  ;;  %v737_v58 = vsel %vm7249_vm2, %v5709_v49, %v736_v51 }
  0x82   : > { %961 = vrot.lane.b32.xlu2 %v910_v14, %s7135_s15  ;;  %v640_v14 = vrot.slane %v638_v62, 5  ;;  %v1232_v22 = vsel %vm7268_vm5, %v1227_v7, %v1231_v8 }
  0x84   : > { %v7442_v29 = vpop.permute.xlu2 %794  ;;  %v641_v25 = vsel %vm7268_vm5, %v636_v15, %v640_v14  ;;  %v5779_v15 = vld [vmem:[%s7247_s28 + $0x40] sm:$0xf] }
  0x85   : > { %800 = vrot.lane.b32.xlu0 %v5715_v10, %s7134_s9  ;;  %v617_v10 = vrot.slane %v615_v60, 4  ;;  %v740_v60 = vrot.slane %v690_v50, 5  ;;  %v5766_v50 = vld [vmem:[%s7247_s28 + $0x48] sm:$0xf] }
  0x86   : > { %1058 = vrot.lane.b32.xlu1 %v1037_v13, %s7137_s17  ;;  %v524_v13 = vld [vmem:[%s7247_s28 + $0x34] sm:$0x1] }
  0x87   : > { %v621_v23 = vor.u32 %v620_v11, %v617_v10  ;;  %v624_v24 = vshll.u32 %v524_v13, 16  ;;  %v741_v7 = vsel %vm7249_vm2, %v5710_v59, %v740_v60  ;;  %v1248_v10 = vshrl.u32 %v5781_v6, 16  ;;  %v5797_v60 = vld [vmem:[%s7247_s28 + $0x48] sm:$0xe] }
  0x88   : > { %v1251_v11 = vshll.u32 %v5781_v6, 16  ;;  %v937_v13 = vrot.slane %v935_v4, 5  ;;  %v498_v4 = vld [vmem:[%s7247_s28 + $0x20] sm:$0xf] }
  0x89   : > { %v622_v33 = vrot.slane %v621_v23, 4  ;;  %v1250_v17 = vrot.slane %v1248_v10, 4  ;;  %v5747_v23 = vld [vmem:[%s7247_s28 + $0x38] sm:$0xe]  ;;  %507 = vst.msk [vmem:[#allocation3 + $0x10] sm:$0xf] %vm502_vm6, %v498_v4 }
  0x8a   : > { %1060 = vrot.lane.b32.xlu2 %v1041_v38, %s7137_s17  ;;  %v929_v38 = vshll.u32 %v5731_v27, 16  ;;  %v1253_v18 = vrot.slane %v1251_v11, 5  ;;  %v1237_v27 = vshll.u32 %v5779_v15, 16  ;;  %v6803_v4 = vld [vmem:[#allocation7 + $0x8] sm:$0xff] }
  0x8c   : > { %v7461_v55 = vpop.permute.xlu2 %1050 }
  0x8d   : > { %963 = vrot.lane.b32.xlu0 %v924_v31, %s7135_s15  ;;  %v943_v31 = vshll.u32 %v5733_v21, 16 }
  0x8e   : > { %1110 = vrot.lane.b32.xlu1 %v5764_v34, %s7136_s16  ;;  %v626_v34 = vrot.slane %v624_v24, 5  ;;  %v5748_v24 = vld [vmem:[%s7247_s28 + $0x3c] sm:$0x1] }
  0x8f   : > { %v945_v40 = vrot.slane %v943_v31, 5  ;;  %v1044_v30 = vrot.slane %v5748_v24, 5  ;;  %v5749_v31 = vld [vmem:[%s7247_s28 + $0x40] sm:$0xe] }
  0x90   : > { %v743_v54 = vpop.permute.xlu1 %742  ;;  %v627_v47 = vsel %vm7268_vm5, %v622_v33, %v626_v34  ;;  %v1254_v33 = vor.u32 %v1253_v18, %v1250_v17 }
  0x91   : > { %v946_v53 = vor.u32 %v945_v40, %v942_v39  ;;  %v5780_v40 = vld [vmem:[%s7247_s28 + $0x44] sm:$0x1] }
  0x92   : > { %1269 = vrot.lane.b32.xlu2 %v1218_v3, %s7138_s18  ;;  %v1243_v48 = vshll.u32 %v5780_v40, 16 }
  0x93   : > { %v947_v63 = vrot.slane %v946_v53, 4 }
  0x94   : > { %v7480_v20 = vpop.permute.xlu2 %1102  ;;  %v1245_v51 = vrot.slane %v1243_v48, 5 }
  0x95   : > { %1108 = vrot.lane.b32.xlu0 %v5763_v57, %s7136_s16  ;;  %v931_v57 = vrot.slane %v929_v38, 5  ;;  %v1239_v38 = vrot.slane %v1237_v27, 5 }
  0x96   : > { %1366 = vrot.lane.b32.xlu1 %v1345_v0, %s7139_s19 }
  0x97   : > { %v643_v12 = vpop.permute.xlu0 %642  ;;  %v932_v3 = vor.u32 %v931_v57, %v928_v56  ;;  %v5796_v56 = vld [vmem:[%s7247_s28 + $0x44] sm:$0x1] }
  0x98   : > { %667 = vst.msk [vmem:[#allocation3] sm:$0xf] %vm666_vm7, %v643_v12  ;;  %v745_v19 = vpop.permute.xlu1 %744  ;;  %v1352_v59 = vrot.slane %v5796_v56, 5  ;;  %v6806_v56 = vld [vmem:[#allocation7 + $0x20] sm:$0xff] }
  0x99   : > { %767 = vst.msk [vmem:[#allocation3] sm:$0xf] %vm766_vm9, %v743_v54  ;;  %v949_v54 = vshll.u32 %v5734_v37, 16  ;;  %v933_v12 = vrot.slane %v932_v3, 4 }
  0x9a   : > { %817 = vst.msk [vmem:[#allocation3] sm:$0xf] %vm816_vm10, %v7427_v9  ;;  %v6764_v9 = vld [vmem:[%s8257_s2 + $0x10] sm:$0xff]  ;;  %1368 = vrot.lane.b32.xlu2 %v1349_v28, %s7139_s19  ;;  %v5757_v28 = vrot.slane %v5747_v23, 9 }
  0x9b   : > { %1481 = vmatpush.bf16.msra.mxu0 %v6764_v9  ;;  %v951_v0 = vrot.slane %v949_v54, 5  ;;  %v5750_v9 = vld [vmem:[%s7247_s28 + $0x44] sm:$0x1] }
  0x9c   : > { %v7507_v44 = vpop.permute.xlu2 %1358  ;;  %v1045_v34 = vsel %vm7249_vm2, %v5757_v28, %v1044_v30  ;;  %v1048_v36 = vrot.slane %v5750_v9, 5  ;;  %v501_v30 = vld [vmem:[%s7247_s28 + $0x38] sm:$0xf] }
  0x9d   : > { %1271 = vrot.lane.b32.xlu0 %v1232_v22, %s7138_s18  ;;  %v952_v8 = vsel %vm7268_vm5, %v947_v63, %v951_v0  ;;  %v5806_v63 = vrot.slane %v5797_v60, 9  ;;  %v1356_v0 = vrot.slane %v5798_v61, 5  ;;  %510 = vst.msk [vmem:[#allocation3 + $0x1c] sm:$0xf] %vm502_vm6, %v501_v30  ;;  %v6805_v60 = vld [vmem:[#allocation7 + $0x18] sm:$0xff]  ;;  %v6831_v61 = vld [vmem:[#allocation7 + $0xe8] sm:$0xff] }
  0x9e   : > { %656 = vrot.lane.b32.xlu1 %v641_v25, %s7133_s30  ;;  %v1234_v25 = vshrl.u32 %v5779_v15, 16 }
  0x9f   : > { %v645_v35 = vpop.permute.xlu0 %644  ;;  %1482 = vmatpush.bf16.msra.mxu0 %v6763_v41  ;;  %v1255_v41 = vrot.slane %v1254_v33, 4 }
  0xa0   : > { %668 = vst.msk [vmem:[#allocation3 + $0x4] sm:$0xf] %vm666_vm7, %v645_v35  ;;  %v956_v42 = vpop.permute.xlu1 %955  ;;  %v5758_v35 = vrot.slane %v5749_v31, 9  ;;  %v1236_v37 = vrot.slane %v1234_v25, 4  ;;  %v500_v25 = vld [vmem:[%s7247_s28 + $0x30] sm:$0xf] }
  0xa1   : > { %768 = vst.msk [vmem:[#allocation3 + $0x4] sm:$0xf] %vm766_vm9, %v745_v19  ;;  %v938_v19 = vsel %vm7268_vm5, %v933_v12, %v937_v13 }
  0xa2   : > { %818 = vst.msk [vmem:[#allocation3 + $0x4] sm:$0xf] %vm816_vm10, %v7442_v29  ;;  %v6762_v29 = vld [vmem:[%s8257_s2] sm:$0xff]  ;;  %754 = vrot.lane.b32.xlu2 %v737_v58, %s7132_s29  ;;  %v1049_v46 = vsel %vm7249_vm2, %v5758_v35, %v1048_v36 }
  0xa3   : > { %979 = vst.msk [vmem:[#allocation3 + $0x4] sm:$0xf] %vm977_vm11, %v956_v42  ;;  %1483 = vmatpush.bf16.msra.mxu0 %v6762_v29  ;;  %v5795_v29 = vld [vmem:[%s7247_s28 + $0x40] sm:$0xe] }
  0xa4   : > { %v649_v5 = vpop.permute.xlu2 %648  ;;  %v5805_v58 = vrot.slane %v5795_v29, 9  ;;  %509 = vst.msk [vmem:[#allocation3 + $0x18] sm:$0xf] %vm502_vm6, %v500_v25 }
  0xa5   : > { %654 = vrot.lane.b32.xlu0 %v627_v47, %s7133_s30  ;;  %670 = vst.msk [vmem:[#allocation3 + $0xc] sm:$0xf] %vm666_vm7, %v649_v5  ;;  %v1240_v47 = vor.u32 %v1239_v38, %v1236_v37 }
  0xa6   : > { %804 = vrot.lane.b32.xlu1 %v5717_v52, %s7134_s9 }
  0xa7   : > { %v954_v62 = vpop.permute.xlu0 %953 }
  0xa8   : > { %978 = vst.msk [vmem:[#allocation3] sm:$0xf] %vm977_vm11, %v954_v62  ;;  %v1101_v2 = vpop.permute.xlu1 %1100  ;;  %v1353_v62 = vsel %vm7249_vm2, %v5805_v58, %v1352_v59  ;;  %v6816_v58 = vld [vmem:[#allocation7 + $0x70] sm:$0xff] }
  0xa9   : > { %1075 = vst.msk [vmem:[#allocation3] sm:$0xf] %vm1074_vm12, %v7461_v55  ;;  %v5718_v55 = vld [vmem:[%s7247_s28 + $0x40] sm:$0xf] }
  0xaa   : > { %1125 = vst.msk [vmem:[#allocation3] sm:$0xf] %vm1124_vm13, %v1101_v2  ;;  %806 = vrot.lane.b32.xlu2 %v5718_v55, %s7134_s9 }
  0xac   : > { %v7550_v22 = vpop.permute.xlu2 %796 }
  0xad   : > { %756 = vrot.lane.b32.xlu0 %v741_v7, %s7132_s29  ;;  %v1357_v7 = vsel %vm7249_vm2, %v5806_v63, %v1356_v0  ;;  %v6815_v63 = vld [vmem:[#allocation7 + $0x68] sm:$0xff]  ;;  %v6804_v0 = vld [vmem:[#allocation7 + $0x10] sm:$0xff] }
  0xae   : > { %967 = vrot.lane.b32.xlu1 %v952_v8, %s7135_s15  ;;  %v499_v8 = vld [vmem:[%s7247_s28 + $0x28] sm:$0xf] }
  0xaf   : > { %v1053_v14 = vpop.permute.xlu0 %1052  ;;  %508 = vst.msk [vmem:[#allocation3 + $0x14] sm:$0xf] %vm502_vm6, %v499_v8  ;;  %v6813_v8 = vld [vmem:[#allocation7 + $0x58] sm:$0xff]  ;;  %vm7689_vm6 = vmand %vm1472_vm8, %vm1631_vm1 }
  0xb0   : > { %1076 = vst.msk [vmem:[#allocation3 + $0x4] sm:$0xf] %vm1074_vm12, %v1053_v14  ;;  %v1264_v21 = vpop.permute.xlu1 %1263 }
  0xb1   : > { %1126 = vst.msk [vmem:[#allocation3 + $0x4] sm:$0xf] %vm1124_vm13, %v7480_v20  ;;  %v1257_v20 = vshll.u32 %v5782_v16, 16 }
  0xb2   : > { %1287 = vst.msk [vmem:[#allocation3 + $0x4] sm:$0xf] %vm1285_vm14, %v1264_v21  ;;  %1062 = vrot.lane.b32.xlu2 %v1045_v34, %s7137_s17 }
  0xb3   : > { %v1259_v42 = vrot.slane %v1257_v20, 5 }
  0xb4   : > { %v960_v45 = vpop.permute.xlu2 %959 }
  0xb5   : > { %965 = vrot.lane.b32.xlu0 %v938_v19, %s7135_s15  ;;  %v1260_v49 = vsel %vm7268_vm5, %v1255_v41, %v1259_v42 }
  0xb6   : > { %1112 = vrot.lane.b32.xlu1 %v5765_v32, %s7136_s16 }
  0xb7   : > { %v1262_v39 = vpop.permute.xlu0 %1261 }
  0xb8   : > { %1286 = vst.msk [vmem:[#allocation3] sm:$0xf] %vm1285_vm14, %v1262_v39  ;;  %v647_v43 = vpop.permute.xlu1 %646 }
  0xb9   : > { %1383 = vst.msk [vmem:[#allocation3] sm:$0xf] %vm1382_vm15, %v7507_v44  ;;  %v1241_v44 = vrot.slane %v1240_v47, 4 }
  0xba   : > { %669 = vst.msk [vmem:[#allocation3 + $0x8] sm:$0xf] %vm666_vm7, %v647_v43  ;;  %1114 = vrot.lane.b32.xlu2 %v5766_v50, %s7136_s16  ;;  %v7140_v50 = vmov 0  }
  0xbb   : > { %v1246_v57 = vsel %vm7268_vm5, %v1241_v44, %v1245_v51  ;;  %7039 = vset.pattern.permute.xlu1 %v7140_v50  ;;  %7040 = vset.pattern.permute.xlu2 %v7140_v50  ;;  %1523 = vst [vmem:[#allocation2 + $0x8] sm:$0xf] %v7140_v50  ;;  %v6807_v51 = vld [vmem:[#allocation7 + $0x28] sm:$0xff] }
  0xbc   : > { %v1105_v54 = vpop.permute.xlu2 %1104  ;;  %7041 = vset.pattern.permute.xlu0 %v7140_v50  ;;  %1524 = vst [vmem:[#allocation2 + $0xc] sm:$0x1] %v7140_v50 }
  0xbd   : > { %1064 = vrot.lane.b32.xlu0 %v1049_v46, %s7137_s17  ;;  %v6809_v46 = vld [vmem:[#allocation7 + $0x38] sm:$0xff]  ;;  %1521 = vst [vmem:[#allocation2] sm:$0xf] %v7140_v50 }
  0xbe   : > { %1275 = vrot.lane.b32.xlu1 %v1260_v49, %s7138_s18  ;;  %3209 = vmatpush.bf16.msra.mxu1 %v6809_v46  ;;  %v6808_v49 = vld [vmem:[#allocation7 + $0x30] sm:$0xff]  ;;  %1522 = vst [vmem:[#allocation2 + $0x4] sm:$0x1] %v7140_v50 }
  0xbf   : > { %v1361_v52 = vpop.permute.xlu0 %1360  ;;  %6982 = vmatpush.bf16.msra.mxu3 %v6809_v46  ;;  %1525 = vst [vmem:[#allocation2 + $0x10] sm:$0xf] %v7140_v50 }
  0xc0   : > { %1384 = vst.msk [vmem:[#allocation3 + $0x4] sm:$0xf] %vm1382_vm15, %v1361_v52  ;;  %v749_v53 = vpop.permute.xlu1 %748  ;;  %v6833_v52 = vld [vmem:[#allocation7 + $0xf8] sm:$0xff] }
  0xc1   : > { %770 = vst.msk [vmem:[#allocation3 + $0xc] sm:$0xf] %vm766_vm9, %v749_v53  ;;  %3296 = vmatpush.bf16.msrb.mxu0 %v6833_v52 }
  0xc2   : > { %1370 = vrot.lane.b32.xlu2 %v1353_v62, %s7139_s19  ;;  %3210 = vmatpush.bf16.msra.mxu1 %v6808_v49  ;;  %1526 = vst [vmem:[#allocation2 + $0x14] sm:$0x1] %v7140_v50 }
  0xc3   : > { %6983 = vmatpush.bf16.msra.mxu3 %v6808_v49  ;;  %1527 = vst [vmem:[#allocation2 + $0x18] sm:$0xf] %v7140_v50 }
  0xc4   : > { %v1268_v6 = vpop.permute.xlu2 %1267  ;;  %1528 = vst [vmem:[#allocation2 + $0x1c] sm:$0x1] %v7140_v50 }
  0xc5   : > { %1273 = vrot.lane.b32.xlu0 %v1246_v57, %s7138_s18  ;;  %v6832_v57 = vld [vmem:[#allocation7 + $0xf0] sm:$0xff]  ;;  %1529 = vst [vmem:[#allocation2 + $0x20] sm:$0xf] %v7140_v50 }
  0xc6   : > { %3211 = vmatpush.bf16.msra.mxu1 %v6807_v51  ;;  %3297 = vmatpush.bf16.msrb.mxu0 %v6832_v57  ;;  %1530 = vst [vmem:[#allocation2 + $0x24] sm:$0x1] %v7140_v50 }
  0xc7   : > { %v747_v2 = vpop.permute.xlu0 %746  ;;  %v6758_v3 = vld [vmem:[#allocation3] sm:$0xff]  ;;  %6984 = vmatpush.bf16.msra.mxu3 %v6807_v51  ;;  %1531 = vst [vmem:[#allocation2 + $0x28] sm:$0xf] %v7140_v50 }
  0xc8   : > { %769 = vst.msk [vmem:[#allocation3 + $0x8] sm:$0xf] %vm766_vm9, %v747_v2  ;;  %5839 = vmatmul.msk.bf16.vlgmr.msra.gmra.mxu0 %vm1459_vm0, %v6758_v3  ;;  %v958_v5 = vpop.permute.xlu1 %957  ;;  %v6830_v2 = vld [vmem:[#allocation7 + $0xe0] sm:$0xff] }
  0xc9   : > { %819 = vst.msk [vmem:[#allocation3 + $0x8] sm:$0xf] %vm816_vm10, %v7550_v22  ;;  %v6814_v3 = vld [vmem:[#allocation7 + $0x60] sm:$0xff] }
  0xca   : > { %980 = vst.msk [vmem:[#allocation3 + $0x8] sm:$0xf] %vm977_vm11, %v958_v5  ;;  %3212 = vmatpush.bf16.msra.mxu1 %v6806_v56  ;;  %3298 = vmatpush.bf16.msrb.mxu0 %v6831_v61  ;;  %v6829_v5 = vld [vmem:[#allocation7 + $0xd8] sm:$0xff] }
  0xcb   : > { %6985 = vmatpush.bf16.msra.mxu3 %v6806_v56  ;;  %1532 = vst [vmem:[#allocation2 + $0x2c] sm:$0x1] %v7140_v50 }
  0xcc   : > { %v651_v55 = vpop.permute.xlu2 %650  ;;  %1533 = vst [vmem:[#allocation2 + $0x30] sm:$0xf] %v7140_v50 }
  0xcd   : > { %1372 = vrot.lane.b32.xlu0 %v1357_v7, %s7139_s19  ;;  %671 = vst.msk [vmem:[#allocation3 + $0x10] sm:$0xf] %vm666_vm7, %v651_v55  ;;  %v7670_v55 = vld [vmem:[%s8258_s3] ss:$0 sm:$0xff]  ;;  %s6757_s19 = sshll.u32 %s8296_s14, 5 }
  0xce   : > { %3213 = vmatpush.bf16.msra.mxu1 %v6805_v60  ;;  %1534 = vst [vmem:[#allocation2 + $0x34] sm:$0x1] %v7140_v50  ;;  %3299 = vmatpush.bf16.msrb.mxu0 %v6830_v2  ;;  %s8151_s25 = scalar_lea.vmem %s8256_s1, %s6757_s19 }
  0xcf   : > { %v799_v10 = vpop.permute.xlu0 %798  ;;  %6986 = vmatpush.bf16.msra.mxu3 %v6805_v60  ;;  %1535 = vst [vmem:[#allocation2 + $0x38] sm:$0xf] %v7140_v50  ;;  %v1645_v60 = vld [vmem:[#allocation2 + $0x14] sm:$0x1] }
  0xd0   : > { %820 = vst.msk [vmem:[#allocation3 + $0xc] sm:$0xf] %vm816_vm10, %v799_v10  ;;  %v1057_v11 = vpop.permute.xlu1 %1056 }
  0xd1   : > { %981 = vst.msk [vmem:[#allocation3 + $0xc] sm:$0xf] %vm977_vm11, %v960_v45 }
  0xd2   : > { %1078 = vst.msk [vmem:[#allocation3 + $0xc] sm:$0xf] %vm1074_vm12, %v1057_v11  ;;  %3214 = vmatpush.bf16.msra.mxu1 %v6804_v0  ;;  %3300 = vmatpush.bf16.msrb.mxu0 %v6829_v5 }
  0xd3   : > { %6987 = vmatpush.bf16.msra.mxu3 %v6804_v0  ;;  %1536 = vst [vmem:[#allocation2 + $0x3c] sm:$0x1] %v7140_v50 }
  0xd4   : > { %v753_v14 = vpop.permute.xlu2 %752  ;;  %1537 = vst [vmem:[#allocation2 + $0x40] sm:$0xf] %v7140_v50 }
  0xd5   : > { %1538 = vst [vmem:[#allocation2 + $0x44] sm:$0x1] %v7140_v50 }
  0xd6   : > { %3215 = vmatpush.bf16.msra.mxu1 %v6803_v4  ;;  %1539 = vst [vmem:[#allocation2 + $0x48] sm:$0xf] %v7140_v50 }
  0xd7   : > { %v1055_v12 = vpop.permute.xlu0 %1054  ;;  %6988 = vmatpush.bf16.msra.mxu3 %v6803_v4  ;;  %1540 = vst [vmem:[#allocation2 + $0x4c] sm:$0x1] %v7140_v50  ;;  %v1639_v50 = vld [vmem:[#allocation2 + $0xc] sm:$0x1] }
  0xd8   : > { %1077 = vst.msk [vmem:[#allocation3 + $0x8] sm:$0xf] %vm1074_vm12, %v1055_v12  ;;  %v1266_v13 = vpop.permute.xlu1 %1265  ;;  %v1684_v12 = vld [vmem:[#allocation2] sm:$0xf] }
  0xd9   : > { %1127 = vst.msk [vmem:[#allocation3 + $0x8] sm:$0xf] %vm1124_vm13, %v1105_v54  ;;  %v6817_v54 = vld [vmem:[#allocation7 + $0x78] sm:$0xff] }
  0xda   : > { %1288 = vst.msk [vmem:[#allocation3 + $0x8] sm:$0xf] %vm1285_vm14, %v1266_v13  ;;  %3238 = vmatpush.bf16.msra.mxu2 %v6817_v54 }
  0xdb   : > { %1692 = vst [vmem:[#allocation4] sm:$0xf] %v1684_v12 }
  0xdc   : > { %v962_v18 = vpop.permute.xlu2 %961 }
  0xde   : > { %3239 = vmatpush.bf16.msra.mxu2 %v6816_v58 }
  0xdf   : > { %v1107_v15 = vpop.permute.xlu0 %1106 }
  0xe0   : > { %1128 = vst.msk [vmem:[#allocation3 + $0xc] sm:$0xf] %vm1124_vm13, %v1107_v15  ;;  %v1365_v16 = vpop.permute.xlu1 %1364  ;;  %v6802_v15 = vld [vmem:[#allocation7] sm:$0xff] }
  0xe1   : > { %1289 = vst.msk [vmem:[#allocation3 + $0xc] sm:$0xf] %vm1285_vm14, %v1268_v6  ;;  %v1700_v6 = vld [vmem:[#allocation2] sm:$0xf]  ;;  %3216 = vmatpush.bf16.msra.mxu1 %v6802_v15  ;;  %6989 = vmatpush.bf16.msra.mxu3 %v6802_v15 }
  0xe2   : > { %1386 = vst.msk [vmem:[#allocation3 + $0xc] sm:$0xf] %vm1382_vm15, %v1365_v16  ;;  %3240 = vmatpush.bf16.msra.mxu2 %v6815_v63  ;;  %v1717_v10 = vshrl.u32 %v1700_v6, 16  ;;  %v1720_v11 = vshll.u32 %v1700_v6, 16  ;;  %v6828_v16 = vld [vmem:[#allocation7 + $0xd0] sm:$0xff] }
  0xe3   : > { %3301 = vmatpush.bf16.msrb.mxu0 %v6828_v16  ;;  %v6841_v16 = vld [vmem:[#allocation7 + $0x138] sm:$0xff] }
  0xe4   : > { %v1061_v24 = vpop.permute.xlu2 %1060  ;;  %v1719_v13 = vrot.slane %v1717_v10, 4 }
  0xe5   : > { %3325 = vmatpush.bf16.msrb.mxu1 %v6841_v16 }
  0xe6   : > { %3241 = vmatpush.bf16.msra.mxu2 %v6814_v3 }
  0xe7   : > { %v1363_v17 = vpop.permute.xlu0 %1362 }
  0xe8   : > { %1385 = vst.msk [vmem:[#allocation3 + $0x8] sm:$0xf] %vm1382_vm15, %v1363_v17  ;;  %v751_v19 = vpop.permute.xlu1 %750  ;;  %v1701_v17 = vld [vmem:[#allocation2 + $0x4] sm:$0x1] }
  0xe9   : > { %771 = vst.msk [vmem:[#allocation3 + $0x10] sm:$0xf] %vm766_vm9, %v751_v19 }
  0xea   : > { %3242 = vmatpush.bf16.msra.mxu2 %v6813_v8 }
  0xec   : > { %v1270_v31 = vpop.permute.xlu2 %1269 }
  0xef   : > { %v653_v21 = vpop.permute.xlu0 %652  ;;  %v6759_v22 = vld [vmem:[#allocation3 + $0x8] sm:$0xff] }
  0xf0   : > { %672 = vst.msk [vmem:[#allocation3 + $0x14] sm:$0xf] %vm666_vm7, %v653_v21  ;;  %5840 = vmatmul.msk.bf16.gmra.mxu0 %vm1459_vm0, %v6759_v22  ;;  %v803_v23 = vpop.permute.xlu1 %802  ;;  %v1726_v21 = vshll.u32 %v1701_v17, 16  ;;  %v1844_v22 = vld [vmem:[#allocation2] sm:$0xe] }
  0xf1   : > { %772 = vst.msk [vmem:[#allocation3 + $0x14] sm:$0xf] %vm766_vm9, %v753_v14  ;;  %v1722_v14 = vrot.slane %v1720_v11, 5 }
  0xf2   : > { %822 = vst.msk [vmem:[#allocation3 + $0x14] sm:$0xf] %vm816_vm10, %v803_v23  ;;  %v1845_v23 = vld [vmem:[#allocation2 + $0x4] sm:$0x1] }
  0xf3   : > { %v1723_v19 = vor.u32 %v1722_v14, %v1719_v13 }
  0xf4   : > { %v1369_v33 = vpop.permute.xlu2 %1368 }
  0xf5   : > { %v1724_v25 = vrot.slane %v1723_v19, 4 }
  0xf7   : > { %v801_v27 = vpop.permute.xlu0 %800 }
  0xf8   : > { %821 = vst.msk [vmem:[#allocation3 + $0x10] sm:$0xf] %vm816_vm10, %v801_v27  ;;  %v1059_v28 = vpop.permute.xlu1 %1058  ;;  %v1728_v27 = vrot.slane %v1726_v21, 5 }
  0xf9   : > { %982 = vst.msk [vmem:[#allocation3 + $0x10] sm:$0xf] %vm977_vm11, %v962_v18  ;;  %v6812_v18 = vld [vmem:[#allocation7 + $0x50] sm:$0xff] }
  0xfa   : > { %1079 = vst.msk [vmem:[#allocation3 + $0x10] sm:$0xf] %vm1074_vm12, %v1059_v28  ;;  %v1878_v28 = vrot.slane %v1845_v23, 5  ;;  %3243 = vmatpush.bf16.msra.mxu2 %v6812_v18 }
  0xfc   : > { %v755_v35 = vpop.permute.xlu2 %754 }
  0xff   : > { %v964_v9 = vpop.permute.xlu0 %963 }
 0x100   : > { %983 = vst.msk [vmem:[#allocation3 + $0x14] sm:$0xf] %vm977_vm11, %v964_v9  ;;  %v1111_v32 = vpop.permute.xlu1 %1110 }
 0x101   : > { %1080 = vst.msk [vmem:[#allocation3 + $0x14] sm:$0xf] %vm1074_vm12, %v1061_v24  ;;  %v5843_v24 = vrot.slane %v1844_v22, 9 }
 0x102   : > { %1130 = vst.msk [vmem:[#allocation3 + $0x14] sm:$0xf] %vm1124_vm13, %v1111_v32  ;;  %v6827_v32 = vld [vmem:[#allocation7 + $0xc8] sm:$0xff] }
 0x103   : > { %3302 = vmatpush.bf16.msrb.mxu0 %v6827_v32 }
 0x104   : > { %v807_v40 = vpop.permute.xlu2 %806 }
 0x107   : > { %v1109_v20 = vpop.permute.xlu0 %1108 }
 0x108   : > { %1129 = vst.msk [vmem:[#allocation3 + $0x10] sm:$0xf] %vm1124_vm13, %v1109_v20  ;;  %v1367_v34 = vpop.permute.xlu1 %1366  ;;  %v1879_v20 = vsel %vm7249_vm2, %v5843_v24, %v1878_v28  ;;  %v3630_v28 = vld [vmem:[#allocation2] sm:$0xf] }
 0x109   : > { %1290 = vst.msk [vmem:[#allocation3 + $0x10] sm:$0xf] %vm1285_vm14, %v1270_v31 }
 0x10a   : > { %1387 = vst.msk [vmem:[#allocation3 + $0x10] sm:$0xf] %vm1382_vm15, %v1367_v34  ;;  %v6811_v34 = vld [vmem:[#allocation7 + $0x48] sm:$0xff] }
 0x10b   : > { %1916 = vst [vmem:[#allocation4 + $0x8] sm:$0xf] %v1879_v20  ;;  %3244 = vmatpush.bf16.msra.mxu2 %v6811_v34  ;;  %v3650_v20 = vshll.u32 %v3630_v28, 16 }
 0x10c   : > { %v1063_v45 = vpop.permute.xlu2 %1062 }
 0x10f   : > { %v1272_v36 = vpop.permute.xlu0 %1271 }
 0x110   : > { %1291 = vst.msk [vmem:[#allocation3 + $0x14] sm:$0xf] %vm1285_vm14, %v1272_v36  ;;  %v657_v37 = vpop.permute.xlu1 %656  ;;  %v3614_v36 = vld [vmem:[#allocation2] sm:$0xf] }
 0x111   : > { %1388 = vst.msk [vmem:[#allocation3 + $0x14] sm:$0xf] %vm1382_vm15, %v1369_v33  ;;  %v1729_v33 = vsel %vm7268_vm5, %v1724_v25, %v1728_v27 }
 0x112   : > { %674 = vst.msk [vmem:[#allocation3 + $0x1c] sm:$0xf] %vm666_vm7, %v657_v37  ;;  %v6826_v37 = vld [vmem:[#allocation7 + $0xc0] sm:$0xff] }
 0x113   : > { %1836 = vst [vmem:[#allocation4 + $0x4] sm:$0xf] %v1729_v33  ;;  %3303 = vmatpush.bf16.msrb.mxu0 %v6826_v37  ;;  %v3647_v33 = vshrl.u32 %v3630_v28, 16 }
 0x114   : > { %v1115_v44 = vpop.permute.xlu2 %1114 }
 0x117   : > { %v655_v38 = vpop.permute.xlu0 %654 }
 0x118   : > { %673 = vst.msk [vmem:[#allocation3 + $0x18] sm:$0xf] %vm666_vm7, %v655_v38  ;;  %v6760_v39 = vld [vmem:[#allocation3 + $0x10] sm:$0xff]  ;;  %v805_v41 = vpop.permute.xlu1 %804  ;;  %v6810_v38 = vld [vmem:[#allocation7 + $0x40] sm:$0xff]  ;;  %vm7695_vm7 = vmand %vm1636_vm3, %vm1637_vm4 }
 0x119   : > { %773 = vst.msk [vmem:[#allocation3 + $0x18] sm:$0xf] %vm766_vm9, %v755_v35  ;;  %5841 = vmatmul.msk.bf16.gmra.mxu0 %vm1459_vm0, %v6760_v39  ;;  %3245 = vmatpush.bf16.msra.mxu2 %v6810_v38 }
 0x11a   : > { %823 = vst.msk [vmem:[#allocation3 + $0x18] sm:$0xf] %vm816_vm10, %v805_v41 }
 0x11c   : > { %v1371_v59 = vpop.permute.xlu2 %1370 }
 0x11f   : > { %v757_v42 = vpop.permute.xlu0 %756 }
 0x120   : > { %774 = vst.msk [vmem:[#allocation3 + $0x1c] sm:$0xf] %vm766_vm9, %v757_v42  ;;  %v968_v43 = vpop.permute.xlu1 %967 }
 0x121   : > { %824 = vst.msk [vmem:[#allocation3 + $0x1c] sm:$0xf] %vm816_vm10, %v807_v40  ;;  %v7686_v40 = vld [vmem:[#allocation4] sm:$0xf] }
 0x122   : > { %985 = vst.msk [vmem:[#allocation3 + $0x1c] sm:$0xf] %vm977_vm11, %v968_v43 }
 0x123   : > { %3622 = vst [vmem:[#allocation4] sm:$0xf] %v3614_v36  ;;  %v6840_v36 = vld [vmem:[#allocation7 + $0x130] sm:$0xff] }
 0x124   : > { %3326 = vmatpush.bf16.msrb.mxu1 %v6840_v36 }
 0x127   : > { %v966_v47 = vpop.permute.xlu0 %965 }
 0x128   : > { %984 = vst.msk [vmem:[#allocation3 + $0x18] sm:$0xf] %vm977_vm11, %v966_v47  ;;  %v1113_v48 = vpop.permute.xlu1 %1112 }
 0x129   : > { %1081 = vst.msk [vmem:[#allocation3 + $0x18] sm:$0xf] %vm1074_vm12, %v1063_v45 }
 0x12a   : > { %1131 = vst.msk [vmem:[#allocation3 + $0x18] sm:$0xf] %vm1124_vm13, %v1113_v48  ;;  %v1633_v48 = vld [vmem:[#allocation2 + $0x8] sm:$0xf] }
 0x12f   : > { %v1065_v53 = vpop.permute.xlu0 %1064 }
 0x130   : > { %1082 = vst.msk [vmem:[#allocation3 + $0x1c] sm:$0xf] %vm1074_vm12, %v1065_v53  ;;  %v1276_v29 = vpop.permute.xlu1 %1275 }
 0x131   : > { %1132 = vst.msk [vmem:[#allocation3 + $0x1c] sm:$0xf] %vm1124_vm13, %v1115_v44 }
 0x132   : > { %1293 = vst.msk [vmem:[#allocation3 + $0x1c] sm:$0xf] %vm1285_vm14, %v1276_v29 }
 0x137   : > { %v1274_v62 = vpop.permute.xlu0 %1273 }
 0x138   : > { %1292 = vst.msk [vmem:[#allocation3 + $0x18] sm:$0xf] %vm1285_vm14, %v1274_v62 }
 0x139   : > { %1389 = vst.msk [vmem:[#allocation3 + $0x18] sm:$0xf] %vm1382_vm15, %v1371_v59  ;;  %v1642_v59 = vld [vmem:[#allocation2 + $0x10] sm:$0xf] }
 0x13f   : > { %v1373_v7 = vpop.permute.xlu0 %1372 }
 0x140   : > { %1390 = vst.msk [vmem:[#allocation3 + $0x1c] sm:$0xf] %vm1382_vm15, %v1373_v7 }
 0x145   : > { %v1485_v30 = vpop.f32.mrf.mxu0 }
 0x146   : > { %v1486_v31 = vadd.f32 %v7670_v55, %v1485_v30  ;;  %v3631_v30 = vld [vmem:[#allocation2 + $0x4] sm:$0x1] }
 0x147   : > { %v6761_v9 = vld [vmem:[#allocation3 + $0x18] sm:$0xff]  ;;  %v3656_v34 = vshll.u32 %v3631_v30, 16 }
 0x148   : > { %v7681_v35 = vmax.f32 %v1486_v31, 0.0  ;;  %5842 = vmatmul.msk.bf16.gmra.mxu0 %vm1459_vm0, %v6761_v9 }
 0x14a   : > { %v1541_v39 = vpack.c.bf16 %v7681_v35, %v7681_v35 }
 0x14c   : > { %v1550_v41 = vshrl.u32 %v1541_v39, 16  ;;  %v1553_v46 = vshll.u32 %v1541_v39, 16 }
 0x14d   : > { %v1487_v42 = vpop.f32.mrf.mxu0 }
 0x14e   : > { %v1552_v45 = vrot.slane %v1550_v41, 7  ;;  %v1488_v47 = vadd.f32 %v7670_v55, %v1487_v42  ;;  %v3649_v42 = vrot.slane %v3647_v33, 4 }
 0x150   : > { %v1555_v44 = vor.u32 %v1553_v46, %v1552_v45  ;;  %v1556_v51 = vrot.slane %v1552_v45, 4  ;;  %v7699_v52 = vmax.f32 %v1488_v47, 0.0  ;;  %v3652_v45 = vrot.slane %v3650_v20, 5  ;;  %v6839_v46 = vld [vmem:[#allocation7 + $0x128] sm:$0xff] }
 0x151   : > { %3327 = vmatpush.bf16.msrb.mxu1 %v6839_v46 }
 0x152   : > { %8283 = vst [vmem:[#allocation13_spill] sm:$0xff] %v7699_v52  ;;  %v1634_v53 = vsel %vm7689_vm6, %v1555_v44, %v1633_v48  ;;  %v1640_v54 = vsel %vm7695_vm7, %v1556_v51, %v1639_v50  ;;  %v1542_v29 = vpack.c.bf16 %v7699_v52, %v7699_v52  ;;  %v3658_v48 = vrot.slane %v3656_v34, 5 }
 0x153   : > { %1635 = vst [vmem:[#allocation2 + $0x8] sm:$0xf] %v1634_v53 }
 0x154   : > { %1641 = vst [vmem:[#allocation2 + $0xc] sm:$0x1] %v1640_v54  ;;  %v1558_v56 = vshrl.u32 %v1542_v29, 16  ;;  %v1561_v58 = vshll.u32 %v1542_v29, 16  ;;  %v6766_v29 = vld [vmem:[#allocation4 + $0x4] sm:$0xf] }
 0x156   : > { %v1560_v57 = vrot.slane %v1558_v56, 7  ;;  %v3653_v56 = vor.u32 %v3652_v45, %v3649_v42 }
 0x158   : > { %v1563_v61 = vor.u32 %v1561_v58, %v1560_v57  ;;  %v1564_v62 = vrot.slane %v1560_v57, 4 }
 0x15a   : > { %v1940_v63 = vld [vmem:[#allocation2 + $0x8] sm:$0xf]  ;;  %v1643_v0 = vsel %vm7689_vm6, %v1563_v61, %v1642_v59  ;;  %v1646_v2 = vsel %vm7695_vm7, %v1564_v62, %v1645_v60 }
 0x15b   : > { %v1685_v3 = vld [vmem:[#allocation2 + $0x8] sm:$0xf]  ;;  %1644 = vst [vmem:[#allocation2 + $0x10] sm:$0xf] %v1643_v0  ;;  %v1703_v6 = vld [vmem:[#allocation2 + $0xc] sm:$0x1] }
 0x15c   : > { %v1924_v4 = vld [vmem:[#allocation2 + $0x8] sm:$0xf]  ;;  %1647 = vst [vmem:[#allocation2 + $0x14] sm:$0x1] %v1646_v2  ;;  %v1941_v10 = vld [vmem:[#allocation2 + $0xc] sm:$0x1] }
 0x15d   : > { %v1702_v5 = vld [vmem:[#allocation2 + $0x8] sm:$0xf]  ;;  %1693 = vst [vmem:[#allocation4 + $0x24] sm:$0xf] %v1685_v3  ;;  %v1957_v11 = vshrl.u32 %v1940_v63, 16  ;;  %v1740_v14 = vshll.u32 %v1703_v6, 16 }
 0x15e   : > { %v1731_v7 = vshrl.u32 %v1702_v5, 16  ;;  %v1734_v8 = vshll.u32 %v1702_v5, 16  ;;  %1932 = vst [vmem:[#allocation4 + $0xc] sm:$0xf] %v1924_v4  ;;  %v1960_v15 = vshll.u32 %v1940_v63, 16  ;;  %v1966_v21 = vshll.u32 %v1941_v10, 16 }
 0x15f   : > { %v1959_v17 = vrot.slane %v1957_v11, 4  ;;  %v1846_v22 = vld [vmem:[#allocation2 + $0x8] sm:$0xe]  ;;  %v1742_v25 = vrot.slane %v1740_v14, 5  ;;  %v1847_v27 = vld [vmem:[#allocation2 + $0xc] sm:$0x1] }
 0x160   : > { %v1733_v12 = vrot.slane %v1731_v7, 4  ;;  %v1736_v13 = vrot.slane %v1734_v8, 5  ;;  %v1962_v19 = vrot.slane %v1960_v15, 5  ;;  %v5844_v38 = vrot.slane %v1846_v22, 9  ;;  %v2084_v53 = vld [vmem:[#allocation2 + $0x8] sm:$0xe] }
 0x161   : > { %v1882_v39 = vrot.slane %v1847_v27, 5  ;;  %v1968_v47 = vrot.slane %v1966_v21, 5  ;;  %v3654_v4 = vrot.slane %v3653_v56, 4 }
 0x162   : > { %v1737_v18 = vor.u32 %v1736_v13, %v1733_v12  ;;  %v1925_v23 = vld [vmem:[#allocation2 + $0x10] sm:$0xf]  ;;  %v1963_v31 = vor.u32 %v1962_v19, %v1959_v17  ;;  %v2085_v12 = vld [vmem:[#allocation2 + $0xc] sm:$0x1]  ;;  %v5851_v17 = vrot.slane %v2084_v53, 9 }
 0x163   : > { %1933 = vst [vmem:[#allocation4 + $0x30] sm:$0xf] %v1925_v23  ;;  %v7714_v41 = vld [vmem:[#allocation2 + $0x10] sm:$0xf]  ;;  %v1705_v57 = vld [vmem:[#allocation2 + $0x14] sm:$0x1]  ;;  %v1883_v0 = vsel %vm7249_vm2, %v5844_v38, %v1882_v39  ;;  %v3659_v14 = vsel %vm7268_vm5, %v3654_v4, %v3658_v48 }
 0x164   : > { %v1738_v24 = vrot.slane %v1737_v18, 4  ;;  %v6770_v9 = vld [vmem:[#allocation4 + $0x20] sm:$0xf0]  ;;  %v1686_v50 = vld [vmem:[#allocation2 + $0x10] sm:$0xf]  ;;  %v1964_v51 = vrot.slane %v1963_v31, 4 }
 0x165   : > { %v5870_v37 = vor.u32 %v6770_v9, %v7686_v40  ;;  %v1704_v44 = vld [vmem:[#allocation2 + $0x10] sm:$0xf]  ;;  %v6767_v54 = vld [vmem:[#allocation4 + $0xc] sm:$0xf]  ;;  %1694 = vst [vmem:[#allocation4 + $0x48] sm:$0xf] %v1686_v50 }
 0x166   : > { %v1743_v32 = vsel %vm7268_vm5, %v1738_v24, %v1742_v25  ;;  %v6838_v40 = vld [vmem:[#allocation7 + $0x120] sm:$0xff]  ;;  %v1745_v58 = vshrl.u32 %v1704_v44, 16  ;;  %v1748_v59 = vshll.u32 %v1704_v44, 16  ;;  %v1754_v60 = vshll.u32 %v1705_v57, 16  ;;  %1917 = vst [vmem:[#allocation4 + $0x2c] sm:$0xf] %v1883_v0 }
 0x167   : > { %1837 = vst [vmem:[#allocation4 + $0x28] sm:$0xf] %v1743_v32  ;;  %3217 = vmatmul.bf16.vlgmr.msra.gmra.mxu1 %v5870_v37  ;;  %v1942_v61 = vld [vmem:[#allocation2 + $0x10] sm:$0xf]  ;;  %v1943_v62 = vld [vmem:[#allocation2 + $0x14] sm:$0x1]  ;;  %v1969_v63 = vsel %vm7268_vm5, %v1964_v51, %v1968_v47 }
 0x168   : > { %v2198_v2 = vshrl.u32 %v7714_v41, 16  ;;  %v1747_v5 = vrot.slane %v1745_v58, 4  ;;  %v1750_v6 = vrot.slane %v1748_v59, 5  ;;  %v1971_v7 = vshrl.u32 %v1942_v61, 16  ;;  %2076 = vst [vmem:[#allocation4 + $0x10] sm:$0xf] %v1969_v63  ;;  %3328 = vmatpush.bf16.msrb.mxu1 %v6838_v40 }
 0x169   : > { %v1974_v10 = vshll.u32 %v1942_v61, 16  ;;  %v1980_v11 = vshll.u32 %v1943_v62, 16  ;;  %3766 = vst [vmem:[#allocation4 + $0x4] sm:$0xf] %v3659_v14  ;;  %v1756_v21 = vrot.slane %v1754_v60, 5  ;;  %v2201_v28 = vshll.u32 %v7714_v41, 16 }
 0x16a   : > { %v5879_v3 = vld [vmem:[#allocation4 + $0x2c] sm:$0xf0]  ;;  %v1751_v15 = vor.u32 %v1750_v6, %v1747_v5  ;;  %v1973_v16 = vrot.slane %v1971_v7, 4  ;;  %v2182_v23 = vld [vmem:[#allocation2 + $0x14] sm:$0x1]  ;;  %v2200_v27 = vrot.slane %v2198_v2, 4 }
 0x16b   : > { %v5882_v8 = vor.u32 %v6767_v54, %v5879_v3  ;;  %v1976_v22 = vrot.slane %v1974_v10, 5  ;;  %v2086_v30 = vld [vmem:[#allocation2 + $0x10] sm:$0xe]  ;;  %v6837_v31 = vld [vmem:[#allocation7 + $0x118] sm:$0xff]  ;;  %v1982_v32 = vrot.slane %v1980_v11, 5  ;;  %v2118_v33 = vrot.slane %v2085_v12, 5 }
 0x16c   : > { %v1752_v25 = vrot.slane %v1751_v15, 4  ;;  %v5852_v20 = vrot.slane %v2086_v30, 9  ;;  %v2203_v37 = vrot.slane %v2201_v28, 5  ;;  %v2207_v38 = vshll.u32 %v2182_v23, 16  ;;  %v2087_v39 = vld [vmem:[#allocation2 + $0x14] sm:$0x1]  ;;  %3329 = vmatpush.bf16.msrb.mxu1 %v6837_v31 }
 0x16d   : > { %v1490_v18 = vpop.f32.mrf.mxu0  ;;  %3304 = vmatmul.bf16.vlgmr.msrb.gmra.mxu0 %v5882_v8  ;;  %v1977_v9 = vor.u32 %v1976_v22, %v1973_v16  ;;  %v2119_v41 = vsel %vm7249_vm2, %v5851_v17, %v2118_v33  ;;  %v2122_v45 = vrot.slane %v2087_v39, 5  ;;  %v1848_v46 = vld [vmem:[#allocation2 + $0x10] sm:$0xe]  ;;  %v6836_v48 = vld [vmem:[#allocation7 + $0x110] sm:$0xff]  ;;  %v1849_v44 = vld [vmem:[#allocation2 + $0x14] sm:$0x1] }
 0x16e   : > { %v5871_v13 = vld [vmem:[#allocation4 + $0x24] sm:$0xf0]  ;;  %v1491_v24 = vadd.f32 %v7670_v55, %v1490_v18  ;;  %v1757_v36 = vsel %vm7268_vm5, %v1752_v25, %v1756_v21  ;;  %v2204_v50 = vor.u32 %v2203_v37, %v2200_v27  ;;  %2156 = vst [vmem:[#allocation4 + $0x14] sm:$0xf] %v2119_v41  ;;  %v5845_v54 = vrot.slane %v1848_v46, 9 }
 0x16f   : > { %v5874_v19 = vor.u32 %v6766_v29, %v5871_v13  ;;  %1838 = vst [vmem:[#allocation4 + $0x4c] sm:$0xf] %v1757_v36  ;;  %v1978_v42 = vrot.slane %v1977_v9, 4  ;;  %v2123_v53 = vsel %vm7249_vm2, %v5852_v20, %v2122_v45  ;;  %v1886_v29 = vrot.slane %v1849_v44, 5  ;;  %v2325_v56 = vld [vmem:[#allocation2 + $0x10] sm:$0xe] }
 0x170   : > { %v7725_v34 = vmax.f32 %v1491_v24, 0.0  ;;  %v2205_v57 = vrot.slane %v2204_v50, 4  ;;  %v2209_v58 = vrot.slane %v2207_v38, 5  ;;  %2157 = vst [vmem:[#allocation4 + $0x38] sm:$0xf] %v2123_v53  ;;  %v5859_v63 = vrot.slane %v2325_v56, 9  ;;  %3330 = vmatpush.bf16.msrb.mxu1 %v6836_v48 }
 0x171   : > { %3246 = vmatmul.bf16.vlgmr.msra.gmra.mxu2 %v5874_v19  ;;  %v1983_v51 = vsel %vm7268_vm5, %v1978_v42, %v1982_v32  ;;  %v1887_v61 = vsel %vm7249_vm2, %v5845_v54, %v1886_v29  ;;  %v2326_v62 = vld [vmem:[#allocation2 + $0x14] sm:$0x1]  ;;  %v2165_v5 = vld [vmem:[#allocation2 + $0x10] sm:$0xf]  ;;  %v1648_v6 = vld [vmem:[#allocation2 + $0x18] sm:$0xf] }
 0x172   : > { %v1543_v47 = vpack.c.bf16 %v7725_v34, %v7725_v34  ;;  %2077 = vst [vmem:[#allocation4 + $0x34] sm:$0xf] %v1983_v51  ;;  %v2210_v3 = vsel %vm7268_vm5, %v2205_v57, %v2209_v58  ;;  %v2359_v4 = vrot.slane %v2326_v62, 5  ;;  %v1651_v7 = vld [vmem:[#allocation2 + $0x1c] sm:$0x1]  ;;  %v6834_v21 = vld [vmem:[#allocation7 + $0x100] sm:$0xff] }
 0x173   : > { %1918 = vst [vmem:[#allocation4 + $0x50] sm:$0xf] %v1887_v61  ;;  %v6835_v16 = vld [vmem:[#allocation7 + $0x108] sm:$0xff]  ;;  %v1657_v23 = vld [vmem:[#allocation2 + $0x24] sm:$0x1] }
 0x174   : > { %v1566_v40 = vshrl.u32 %v1543_v47, 16  ;;  %v1569_v59 = vshll.u32 %v1543_v47, 16  ;;  %2317 = vst [vmem:[#allocation4 + $0x1c] sm:$0xf] %v2210_v3  ;;  %v2360_v12 = vsel %vm7249_vm2, %v5859_v63, %v2359_v4  ;;  %3331 = vmatpush.bf16.msrb.mxu1 %v6835_v16  ;;  %v1654_v22 = vld [vmem:[#allocation2 + $0x20] sm:$0xf] }
 0x175   : > { %v1492_v60 = vpop.f32.mrf.mxu0  ;;  %2173 = vst [vmem:[#allocation4 + $0x18] sm:$0xf] %v2165_v5  ;;  %v5905_v3 = vld [vmem:[#allocation4 + $0x48] sm:$0xf] }
 0x176   : > { %v1568_v0 = vrot.slane %v1566_v40, 7  ;;  %v1493_v2 = vadd.f32 %v7670_v55, %v1492_v60  ;;  %2397 = vst [vmem:[#allocation4 + $0x20] sm:$0xf] %v2360_v12 }
 0x178   : > { %v1571_v8 = vor.u32 %v1569_v59, %v1568_v0  ;;  %v1572_v10 = vrot.slane %v1568_v0, 4  ;;  %v7742_v11 = vmax.f32 %v1493_v2, 0.0  ;;  %3332 = vmatpush.bf16.msrb.mxu1 %v6834_v21 }
 0x17a   : > { %v1649_v13 = vsel %vm7689_vm6, %v1571_v8, %v1648_v6  ;;  %v1652_v14 = vsel %vm7695_vm7, %v1572_v10, %v1651_v7  ;;  %v1544_v15 = vpack.c.bf16 %v7742_v11, %v7742_v11 }
 0x17b   : > { %1650 = vst [vmem:[#allocation2 + $0x18] sm:$0xf] %v1649_v13 }
 0x17c   : > { %1653 = vst [vmem:[#allocation2 + $0x1c] sm:$0x1] %v1652_v14  ;;  %v1574_v17 = vshrl.u32 %v1544_v15, 16  ;;  %v1577_v19 = vshll.u32 %v1544_v15, 16 }
 0x17e   : > { %v1576_v18 = vrot.slane %v1574_v17, 7 }
 0x180   : > { %v1579_v24 = vor.u32 %v1577_v19, %v1576_v18  ;;  %v1580_v25 = vrot.slane %v1576_v18, 4 }
 0x182   : > { %v2183_v27 = vld [vmem:[#allocation2 + $0x18] sm:$0xf]  ;;  %v1655_v28 = vsel %vm7689_vm6, %v1579_v24, %v1654_v22  ;;  %v1658_v30 = vsel %vm7695_vm7, %v1580_v25, %v1657_v23 }
 0x183   : > { %v1687_v31 = vld [vmem:[#allocation2 + $0x18] sm:$0xf]  ;;  %1656 = vst [vmem:[#allocation2 + $0x20] sm:$0xf] %v1655_v28  ;;  %v1707_v33 = vld [vmem:[#allocation2 + $0x1c] sm:$0x1] }
 0x184   : > { %v1926_v9 = vld [vmem:[#allocation2 + $0x18] sm:$0xf]  ;;  %1659 = vst [vmem:[#allocation2 + $0x24] sm:$0x1] %v1658_v30  ;;  %v1768_v37 = vshll.u32 %v1707_v33, 16  ;;  %v2212_v39 = vshrl.u32 %v2183_v27, 16 }
 0x185   : > { %v1706_v32 = vld [vmem:[#allocation2 + $0x18] sm:$0xf]  ;;  %1695 = vst [vmem:[#allocation4 + $0x6c] sm:$0xf] %v1687_v31  ;;  %v1945_v45 = vld [vmem:[#allocation2 + $0x1c] sm:$0x1] }
 0x186   : > { %v1759_v20 = vshrl.u32 %v1706_v32, 16  ;;  %v1762_v36 = vshll.u32 %v1706_v32, 16  ;;  %v1944_v38 = vld [vmem:[#allocation2 + $0x18] sm:$0xf]  ;;  %1934 = vst [vmem:[#allocation4 + $0x54] sm:$0xf] %v1926_v9 }
 0x187   : > { %v1985_v46 = vshrl.u32 %v1944_v38, 16  ;;  %v1988_v47 = vshll.u32 %v1944_v38, 16  ;;  %v2184_v48 = vld [vmem:[#allocation2 + $0x1c] sm:$0x1]  ;;  %v1994_v44 = vshll.u32 %v1945_v45, 16  ;;  %v2214_v51 = vrot.slane %v2212_v39, 4 }
 0x188   : > { %v1761_v42 = vrot.slane %v1759_v20, 4  ;;  %v1764_v41 = vrot.slane %v1762_v36, 5  ;;  %v2215_v53 = vshll.u32 %v2183_v27, 16  ;;  %v1770_v54 = vrot.slane %v1768_v37, 5  ;;  %v1850_v57 = vld [vmem:[#allocation2 + $0x18] sm:$0xe] }
 0x189   : > { %v1987_v29 = vrot.slane %v1985_v46, 4  ;;  %v1990_v56 = vrot.slane %v1988_v47, 5  ;;  %v2221_v40 = vshll.u32 %v2184_v48, 16  ;;  %v1996_v6 = vrot.slane %v1994_v44, 5  ;;  %v1851_v30 = vld [vmem:[#allocation2 + $0x1c] sm:$0x1] }
 0x18a   : > { %v1765_v50 = vor.u32 %v1764_v41, %v1761_v42  ;;  %v1927_v58 = vld [vmem:[#allocation2 + $0x20] sm:$0xf]  ;;  %v2217_v61 = vrot.slane %v2215_v53, 5  ;;  %v5846_v8 = vrot.slane %v1850_v57, 9  ;;  %v1890_v33 = vrot.slane %v1851_v30, 5 }
 0x18b   : > { %v1946_v60 = vld [vmem:[#allocation2 + $0x20] sm:$0xf]  ;;  %1935 = vst [vmem:[#allocation4 + $0x78] sm:$0xf] %v1927_v58  ;;  %v1947_v62 = vld [vmem:[#allocation2 + $0x24] sm:$0x1]  ;;  %v1991_v63 = vor.u32 %v1990_v56, %v1987_v29 }
 0x18c   : > { %v1766_v59 = vrot.slane %v1765_v50, 4  ;;  %v1999_v0 = vshrl.u32 %v1946_v60, 16  ;;  %v2002_v2 = vshll.u32 %v1946_v60, 16  ;;  %v6779_v4 = vld [vmem:[#allocation4 + $0x68] sm:$0xf0]  ;;  %v2218_v7 = vor.u32 %v2217_v61, %v2214_v51 }
 0x18d   : > { %v5906_v10 = vor.u32 %v6779_v4, %v5905_v3  ;;  %v1992_v12 = vrot.slane %v1991_v63, 4  ;;  %v2008_v14 = vshll.u32 %v1947_v62, 16  ;;  %v1688_v16 = vld [vmem:[#allocation2 + $0x20] sm:$0xf]  ;;  %v2223_v18 = vrot.slane %v2221_v40, 5 }
 0x18e   : > { %v1771_v5 = vsel %vm7268_vm5, %v1766_v59, %v1770_v54  ;;  %v2001_v13 = vrot.slane %v1999_v0, 4  ;;  %v2004_v15 = vrot.slane %v2002_v2, 5  ;;  %v1708_v17 = vld [vmem:[#allocation2 + $0x20] sm:$0xf]  ;;  %1696 = vst [vmem:[#allocation4 + $0x90] sm:$0xf] %v1688_v16  ;;  %v1891_v47 = vsel %vm7249_vm2, %v5846_v8, %v1890_v33 }
 0x18f   : > { %1839 = vst [vmem:[#allocation4 + $0x70] sm:$0xf] %v1771_v5  ;;  %3222 = vmatmul.bf16.gmra.mxu1 %v5906_v10  ;;  %v1997_v19 = vsel %vm7268_vm5, %v1992_v12, %v1996_v6  ;;  %v1709_v21 = vld [vmem:[#allocation2 + $0x24] sm:$0x1]  ;;  %v1773_v22 = vshrl.u32 %v1708_v17, 16  ;;  %v1776_v23 = vshll.u32 %v1708_v17, 16 }
 0x190   : > { %v6776_v24 = vld [vmem:[#allocation4 + $0x54] sm:$0xf]  ;;  %v2005_v25 = vor.u32 %v2004_v15, %v2001_v13  ;;  %2078 = vst [vmem:[#allocation4 + $0x58] sm:$0xf] %v1997_v19  ;;  %v1782_v27 = vshll.u32 %v1709_v21, 16  ;;  %v2219_v28 = vrot.slane %v2218_v7, 4 }
 0x191   : > { %v2010_v31 = vrot.slane %v2008_v14, 5  ;;  %v1775_v9 = vrot.slane %v1773_v22, 4  ;;  %v1778_v32 = vrot.slane %v1776_v23, 5  ;;  %v2327_v20 = vld [vmem:[#allocation2 + $0x18] sm:$0xe] }
 0x192   : > { %v5915_v36 = vld [vmem:[#allocation4 + $0x74] sm:$0xf0]  ;;  %v6775_v37 = vld [vmem:[#allocation4 + $0x4c] sm:$0xf]  ;;  %v2006_v38 = vrot.slane %v2005_v25, 4  ;;  %v1784_v39 = vrot.slane %v1782_v27, 5  ;;  %v2224_v42 = vsel %vm7268_vm5, %v2219_v28, %v2223_v18 }
 0x193   : > { %v2328_v41 = vld [vmem:[#allocation2 + $0x1c] sm:$0x1]  ;;  %v5918_v45 = vor.u32 %v6776_v24, %v5915_v36  ;;  %v1779_v46 = vor.u32 %v1778_v32, %v1775_v9  ;;  %2318 = vst [vmem:[#allocation4 + $0x40] sm:$0xf] %v2224_v42  ;;  %v5860_v48 = vrot.slane %v2327_v20, 9 }
 0x194   : > { %v2185_v50 = vld [vmem:[#allocation2 + $0x20] sm:$0xf]  ;;  %v2011_v51 = vsel %vm7268_vm5, %v2006_v38, %v2010_v31  ;;  %1919 = vst [vmem:[#allocation4 + $0x74] sm:$0xf] %v1891_v47  ;;  %v2363_v53 = vrot.slane %v2328_v41, 5 }
 0x195   : > { %v2226_v54 = vshrl.u32 %v2185_v50, 16  ;;  %3309 = vmatmul.bf16.gmra.mxu0 %v5918_v45  ;;  %2079 = vst [vmem:[#allocation4 + $0x7c] sm:$0xf] %v2011_v51  ;;  %v1780_v56 = vrot.slane %v1779_v46, 4  ;;  %v2186_v40 = vld [vmem:[#allocation2 + $0x24] sm:$0x1] }
 0x196   : > { %v5907_v44 = vld [vmem:[#allocation4 + $0x6c] sm:$0xf0]  ;;  %v2229_v57 = vshll.u32 %v2185_v50, 16  ;;  %v1495_v58 = vpop.f32.mrf.mxu0  ;;  %v2364_v59 = vsel %vm7249_vm2, %v5860_v48, %v2363_v53  ;;  %v2235_v61 = vshll.u32 %v2186_v40, 16  ;;  %v2088_v62 = vld [vmem:[#allocation2 + $0x18] sm:$0xe] }
 0x197   : > { %v5910_v29 = vor.u32 %v6775_v37, %v5907_v44  ;;  %v2228_v60 = vrot.slane %v2226_v54, 4  ;;  %v1496_v63 = vadd.f32 %v7670_v55, %v1495_v58  ;;  %v1785_v0 = vsel %vm7268_vm5, %v1780_v56, %v1784_v39  ;;  %2398 = vst [vmem:[#allocation4 + $0x44] sm:$0xf] %v2364_v59  ;;  %v2089_v4 = vld [vmem:[#allocation2 + $0x1c] sm:$0x1] }
 0x198   : > { %v2231_v2 = vrot.slane %v2229_v57, 5  ;;  %v5853_v3 = vrot.slane %v2088_v62, 9  ;;  %1840 = vst [vmem:[#allocation4 + $0x94] sm:$0xf] %v1785_v0  ;;  %v2090_v7 = vld [vmem:[#allocation2 + $0x20] sm:$0xe] }
 0x199   : > { %3251 = vmatmul.bf16.gmra.mxu2 %v5910_v29  ;;  %v7771_v5 = vmax.f32 %v1496_v63, 0.0  ;;  %v2091_v8 = vld [vmem:[#allocation2 + $0x24] sm:$0x1]  ;;  %v2126_v10 = vrot.slane %v2089_v4, 5  ;;  %v5854_v13 = vrot.slane %v2090_v7, 9  ;;  %v2237_v18 = vrot.slane %v2235_v61, 5 }
 0x19a   : > { %v2232_v6 = vor.u32 %v2231_v2, %v2228_v60  ;;  %v6772_v12 = vld [vmem:[#allocation4 + $0x30] sm:$0xf0]  ;;  %v2130_v14 = vrot.slane %v2091_v8, 5  ;;  %v1852_v15 = vld [vmem:[#allocation2 + $0x20] sm:$0xe] }
 0x19b   : > { %8284 = vst [vmem:[#allocation14_spill] sm:$0xff] %v7771_v5  ;;  %v1545_v16 = vpack.c.bf16 %v7771_v5, %v7771_v5  ;;  %v2127_v19 = vsel %vm7249_vm2, %v5853_v3, %v2126_v10  ;;  %v1853_v21 = vld [vmem:[#allocation2 + $0x24] sm:$0x1]  ;;  %v5885_v22 = vld [vmem:[#allocation4 + $0x10] sm:$0xf]  ;;  %v5847_v24 = vrot.slane %v1852_v15, 9 }
 0x19c   : > { %v2233_v17 = vrot.slane %v2232_v6, 4  ;;  %v2131_v23 = vsel %vm7249_vm2, %v5854_v13, %v2130_v14  ;;  %2158 = vst [vmem:[#allocation4 + $0x5c] sm:$0xf] %v2127_v19  ;;  %v1894_v25 = vrot.slane %v1853_v21, 5  ;;  %v5886_v30 = vor.u32 %v6772_v12, %v5885_v22  ;;  %v2329_v9 = vld [vmem:[#allocation2 + $0x20] sm:$0xe] }
 0x19d   : > { %v1582_v27 = vshrl.u32 %v1545_v16, 16  ;;  %v1585_v28 = vshll.u32 %v1545_v16, 16  ;;  %2159 = vst [vmem:[#allocation4 + $0x80] sm:$0xf] %v2131_v23  ;;  %v1660_v32 = vld [vmem:[#allocation2 + $0x28] sm:$0xf] }
 0x19e   : > { %v2238_v31 = vsel %vm7268_vm5, %v2233_v17, %v2237_v18  ;;  %v1497_v33 = vpop.f32.mrf.mxu0  ;;  %v1895_v20 = vsel %vm7249_vm2, %v5847_v24, %v1894_v25  ;;  %v2330_v36 = vld [vmem:[#allocation2 + $0x24] sm:$0x1]  ;;  %v1663_v38 = vld [vmem:[#allocation2 + $0x2c] sm:$0x1]  ;;  %v5861_v42 = vrot.slane %v2329_v9, 9 }
 0x19f   : > { %2319 = vst [vmem:[#allocation4 + $0x64] sm:$0xf] %v2238_v31  ;;  %v1584_v37 = vrot.slane %v1582_v27, 7  ;;  %3333 = vmatmul.bf16.vlgmr.msrb.gmra.mxu1 %v5886_v30  ;;  %v1498_v39 = vadd.f32 %v7670_v55, %v1497_v33  ;;  %v2367_v41 = vrot.slane %v2330_v36, 5  ;;  %v2166_v45 = vld [vmem:[#allocation2 + $0x18] sm:$0xf] }
 0x1a0   : > { %1920 = vst [vmem:[#allocation4 + $0x98] sm:$0xf] %v1895_v20  ;;  %v2167_v46 = vld [vmem:[#allocation2 + $0x20] sm:$0xf]  ;;  %v1666_v40 = vld [vmem:[#allocation2 + $0x30] sm:$0xf] }
 0x1a1   : > { %v1587_v47 = vor.u32 %v1585_v28, %v1584_v37  ;;  %v1588_v48 = vrot.slane %v1584_v37, 4  ;;  %v7784_v50 = vmax.f32 %v1498_v39, 0.0  ;;  %2174 = vst [vmem:[#allocation4 + $0x3c] sm:$0xf] %v2166_v45  ;;  %v2368_v44 = vsel %vm7249_vm2, %v5861_v42, %v2367_v41  ;;  %v1669_v57 = vld [vmem:[#allocation2 + $0x34] sm:$0x1] }
 0x1a2   : > { %2175 = vst [vmem:[#allocation4 + $0x60] sm:$0xf] %v2167_v46  ;;  %v5921_v60 = vld [vmem:[#allocation4 + $0x58] sm:$0xf]  ;;  %v6781_v61 = vld [vmem:[#allocation4 + $0x78] sm:$0xf0] }
 0x1a3   : > { %8285 = vst [vmem:[#allocation15_spill] sm:$0xff] %v7784_v50  ;;  %v1661_v51 = vsel %vm7689_vm6, %v1587_v47, %v1660_v32  ;;  %v1664_v55 = vsel %vm7695_vm7, %v1588_v48, %v1663_v38  ;;  %v1546_v53 = vpack.c.bf16 %v7784_v50, %v7784_v50  ;;  %v5922_v8 = vor.u32 %v6781_v61, %v5921_v60  ;;  %v5941_v31 = vld [vmem:[#allocation4 + $0x90] sm:$0xf] }
 0x1a4   : > { %2399 = vst [vmem:[#allocation4 + $0x68] sm:$0xf] %v2368_v44  ;;  %v6939_v50 = vld [vmem:[#allocation9 + $0xe8] sm:$0xff]  ;;  %v6912_v5 = vld [vmem:[#allocation9 + $0x10] sm:$0xff] }
 0x1a5   : > { %1662 = vst [vmem:[#allocation2 + $0x28] sm:$0xf] %v1661_v51  ;;  %v1590_v54 = vshrl.u32 %v1546_v53, 16  ;;  %v1593_v56 = vshll.u32 %v1546_v53, 16 }
 0x1a6   : > { %1665 = vst [vmem:[#allocation2 + $0x2c] sm:$0x1] %v1664_v55 }
 0x1a7   : > { %v1592_v29 = vrot.slane %v1590_v54, 7 }
 0x1a9   : > { %v1595_v58 = vor.u32 %v1593_v56, %v1592_v29  ;;  %v1596_v59 = vrot.slane %v1592_v29, 4 }
 0x1ab   : > { %v1667_v62 = vsel %vm7689_vm6, %v1595_v58, %v1666_v40  ;;  %v1670_v63 = vsel %vm7695_vm7, %v1596_v59, %v1669_v57 }
 0x1ac   : > { %v1689_v0 = vld [vmem:[#allocation2 + $0x28] sm:$0xf]  ;;  %1668 = vst [vmem:[#allocation2 + $0x30] sm:$0xf] %v1667_v62 }
 0x1ad   : > { %v1928_v2 = vld [vmem:[#allocation2 + $0x28] sm:$0xf]  ;;  %v1711_v4 = vld [vmem:[#allocation2 + $0x2c] sm:$0x1]  ;;  %1671 = vst [vmem:[#allocation2 + $0x34] sm:$0x1] %v1670_v63 }
 0x1ae   : > { %v1710_v3 = vld [vmem:[#allocation2 + $0x28] sm:$0xf]  ;;  %v1796_v10 = vshll.u32 %v1711_v4, 16  ;;  %1697 = vst [vmem:[#allocation4 + $0xb4] sm:$0xf] %v1689_v0 }
 0x1af   : > { %v1787_v6 = vshrl.u32 %v1710_v3, 16  ;;  %v1790_v7 = vshll.u32 %v1710_v3, 16  ;;  %v1948_v12 = vld [vmem:[#allocation2 + $0x28] sm:$0xf]  ;;  %v1949_v15 = vld [vmem:[#allocation2 + $0x2c] sm:$0x1]  ;;  %3338 = vmatmul.bf16.gmra.mxu1 %v5922_v8 }
 0x1b0   : > { %1936 = vst [vmem:[#allocation4 + $0x9c] sm:$0xf] %v1928_v2  ;;  %v2013_v16 = vshrl.u32 %v1948_v12, 16  ;;  %v2016_v17 = vshll.u32 %v1948_v12, 16  ;;  %v2022_v18 = vshll.u32 %v1949_v15, 16  ;;  %v1798_v21 = vrot.slane %v1796_v10, 5 }
 0x1b1   : > { %v1789_v13 = vrot.slane %v1787_v6, 4  ;;  %v1792_v14 = vrot.slane %v1790_v7, 5  ;;  %v2187_v22 = vld [vmem:[#allocation2 + $0x28] sm:$0xf]  ;;  %v2188_v23 = vld [vmem:[#allocation2 + $0x2c] sm:$0x1] }
 0x1b2   : > { %v2015_v24 = vrot.slane %v2013_v16, 4  ;;  %v2018_v25 = vrot.slane %v2016_v17, 5  ;;  %v2024_v28 = vrot.slane %v2022_v18, 5  ;;  %v2240_v30 = vshrl.u32 %v2187_v22, 16  ;;  %v1854_v37 = vld [vmem:[#allocation2 + $0x28] sm:$0xe] }
 0x1b3   : > { %v1793_v19 = vor.u32 %v1792_v14, %v1789_v13  ;;  %v1929_v9 = vld [vmem:[#allocation2 + $0x30] sm:$0xf]  ;;  %v2243_v20 = vshll.u32 %v2187_v22, 16  ;;  %v2249_v36 = vshll.u32 %v2188_v23, 16  ;;  %v1855_v53 = vld [vmem:[#allocation2 + $0x2c] sm:$0x1] }
 0x1b4   : > { %v1950_v32 = vld [vmem:[#allocation2 + $0x30] sm:$0xf]  ;;  %v2019_v33 = vor.u32 %v2018_v25, %v2015_v24  ;;  %1937 = vst [vmem:[#allocation4 + $0xc0] sm:$0xf] %v1929_v9  ;;  %v1951_v39 = vld [vmem:[#allocation2 + $0x34] sm:$0x1] }
 0x1b5   : > { %v1794_v27 = vrot.slane %v1793_v19, 4  ;;  %v2027_v42 = vshrl.u32 %v1950_v32, 16  ;;  %v2030_v41 = vshll.u32 %v1950_v32, 16  ;;  %v6788_v45 = vld [vmem:[#allocation4 + $0xb0] sm:$0xf0]  ;;  %v2036_v47 = vshll.u32 %v1951_v39, 16 }
 0x1b6   : > { %v2020_v46 = vrot.slane %v2019_v33, 4  ;;  %v5942_v48 = vor.u32 %v6788_v45, %v5941_v31  ;;  %v1690_v55 = vld [vmem:[#allocation2 + $0x30] sm:$0xf]  ;;  %v2242_v56 = vrot.slane %v2240_v30, 4  ;;  %v1713_v57 = vld [vmem:[#allocation2 + $0x34] sm:$0x1] }
 0x1b7   : > { %v1799_v38 = vsel %vm7268_vm5, %v1794_v27, %v1798_v21  ;;  %v2029_v44 = vrot.slane %v2027_v42, 4  ;;  %v2032_v51 = vrot.slane %v2030_v41, 5  ;;  %1698 = vst [vmem:[#allocation4 + $0xd8] sm:$0xf] %v1690_v55  ;;  %v1712_v29 = vld [vmem:[#allocation2 + $0x30] sm:$0xf] }
 0x1b8   : > { %1841 = vst [vmem:[#allocation4 + $0xb8] sm:$0xf] %v1799_v38  ;;  %v2025_v54 = vsel %vm7268_vm5, %v2020_v46, %v2024_v28  ;;  %3227 = vmatmul.bf16.vlgmr.msra.gmra.mxu3 %v5942_v48  ;;  %v5848_v58 = vrot.slane %v1854_v37, 9  ;;  %v2038_v59 = vrot.slane %v2036_v47, 5  ;;  %v1801_v60 = vshrl.u32 %v1712_v29, 16  ;;  %v6825_v18 = vld [vmem:[#allocation7 + $0xb8] sm:$0xff] }
 0x1b9   : > { %v2033_v40 = vor.u32 %v2032_v51, %v2029_v44  ;;  %2080 = vst [vmem:[#allocation4 + $0xa0] sm:$0xf] %v2025_v54  ;;  %v1804_v61 = vshll.u32 %v1712_v29, 16  ;;  %v2245_v62 = vrot.slane %v2243_v20, 5  ;;  %v2331_v63 = vld [vmem:[#allocation2 + $0x28] sm:$0xe]  ;;  %3267 = vmatpush.bf16.msrb.mxu3 %v6825_v18 }
 0x1ba   : > { %v6785_v0 = vld [vmem:[#allocation4 + $0x9c] sm:$0xf]  ;;  %v1810_v3 = vshll.u32 %v1713_v57, 16  ;;  %v2251_v4 = vrot.slane %v2249_v36, 5  ;;  %v1898_v6 = vrot.slane %v1855_v53, 5  ;;  %v1803_v8 = vrot.slane %v1801_v60, 4 }
 0x1bb   : > { %v2034_v2 = vrot.slane %v2033_v40, 4  ;;  %v5951_v7 = vld [vmem:[#allocation4 + $0xbc] sm:$0xf0]  ;;  %v1806_v10 = vrot.slane %v1804_v61, 5  ;;  %v2246_v12 = vor.u32 %v2245_v62, %v2242_v56  ;;  %v2332_v13 = vld [vmem:[#allocation2 + $0x2c] sm:$0x1] }
 0x1bc   : > { %v5954_v14 = vor.u32 %v6785_v0, %v5951_v7  ;;  %v6784_v15 = vld [vmem:[#allocation4 + $0x94] sm:$0xf]  ;;  %v1899_v19 = vsel %vm7249_vm2, %v5848_v58, %v1898_v6  ;;  %v5862_v21 = vrot.slane %v2331_v63, 9  ;;  %v6865_v23 = vld [vmem:[#allocation7 + $0x1f8] sm:$0xff]  ;;  %v2371_v30 = vrot.slane %v2332_v13, 5  ;;  %v6823_v37 = vld [vmem:[#allocation7 + $0xa8] sm:$0xff] }
 0x1bd   : > { %v2039_v17 = vsel %vm7268_vm5, %v2034_v2, %v2038_v59  ;;  %v6849_v24 = vld [vmem:[#allocation7 + $0x178] sm:$0xff]  ;;  %v1807_v25 = vor.u32 %v1806_v10, %v1803_v8  ;;  %v2247_v27 = vrot.slane %v2246_v12, 4  ;;  %v6824_v28 = vld [vmem:[#allocation7 + $0xb0] sm:$0xff]  ;;  %3412 = vmatpush.bf16.msra.mxu0 %v6865_v23  ;;  %v1812_v9 = vrot.slane %v1810_v3, 5  ;;  %1921 = vst [vmem:[#allocation4 + $0xbc] sm:$0xf] %v1899_v19 }
 0x1be   : > { %2081 = vst [vmem:[#allocation4 + $0xc4] sm:$0xf] %v2039_v17  ;;  %3314 = vmatmul.bf16.gmra.mxu0 %v5954_v14  ;;  %3354 = vmatpush.bf16.msrb.mxu2 %v6849_v24  ;;  %v2372_v33 = vsel %vm7249_vm2, %v5862_v21, %v2371_v30  ;;  %v2189_v20 = vld [vmem:[#allocation2 + $0x30] sm:$0xf]  ;;  %v2190_v36 = vld [vmem:[#allocation2 + $0x34] sm:$0x1] }
 0x1bf   : > { %v5943_v16 = vld [vmem:[#allocation4 + $0xb4] sm:$0xf0]  ;;  %v1808_v31 = vrot.slane %v1807_v25, 4  ;;  %v2252_v32 = vsel %vm7268_vm5, %v2247_v27, %v2251_v4  ;;  %2400 = vst [vmem:[#allocation4 + $0x8c] sm:$0xf] %v2372_v33  ;;  %v2254_v39 = vshrl.u32 %v2189_v20, 16  ;;  %3268 = vmatpush.bf16.msrb.mxu3 %v6824_v28 }
 0x1c0   : > { %v5946_v22 = vor.u32 %v6784_v15, %v5943_v16  ;;  %2320 = vst [vmem:[#allocation4 + $0x88] sm:$0xf] %v2252_v32  ;;  %v2257_v42 = vshll.u32 %v2189_v20, 16  ;;  %v5957_v41 = vld [vmem:[#allocation4 + $0xa0] sm:$0xf]  ;;  %v2263_v44 = vshll.u32 %v2190_v36, 16 }
 0x1c1   : > { %v1813_v38 = vsel %vm7268_vm5, %v1808_v31, %v1812_v9  ;;  %v2092_v45 = vld [vmem:[#allocation2 + $0x28] sm:$0xe]  ;;  %v2093_v46 = vld [vmem:[#allocation2 + $0x2c] sm:$0x1]  ;;  %v2256_v47 = vrot.slane %v2254_v39, 4  ;;  %v6864_v58 = vld [vmem:[#allocation7 + $0x1f0] sm:$0xff] }
 0x1c2   : > { %3256 = vmatmul.bf16.gmra.mxu2 %v5946_v22  ;;  %1842 = vst [vmem:[#allocation4 + $0xdc] sm:$0xf] %v1813_v38  ;;  %v2259_v48 = vrot.slane %v2257_v42, 5  ;;  %v2094_v51 = vld [vmem:[#allocation2 + $0x30] sm:$0xe]  ;;  %v5855_v55 = vrot.slane %v2092_v45, 9  ;;  %3413 = vmatpush.bf16.msra.mxu0 %v6864_v58 }
 0x1c3   : > { %v2095_v54 = vld [vmem:[#allocation2 + $0x34] sm:$0x1]  ;;  %v2134_v29 = vrot.slane %v2093_v46, 5  ;;  %v5856_v56 = vrot.slane %v2094_v51, 9  ;;  %v6848_v59 = vld [vmem:[#allocation7 + $0x170] sm:$0xff]  ;;  %3269 = vmatpush.bf16.msrb.mxu3 %v6823_v37  ;;  %v6863_v7 = vld [vmem:[#allocation7 + $0x1e8] sm:$0xff] }
 0x1c4   : > { %v2260_v60 = vor.u32 %v2259_v48, %v2256_v47  ;;  %v2138_v61 = vrot.slane %v2095_v54, 5  ;;  %v1856_v62 = vld [vmem:[#allocation2 + $0x30] sm:$0xe]  ;;  %v7051_v63 = vld [vmem:[%s8258_s3] ss:$0 sm:$0xff]  ;;  %v2265_v10 = vrot.slane %v2263_v44, 5  ;;  %3355 = vmatpush.bf16.msrb.mxu2 %v6848_v59 }
 0x1c5   : > { %v6790_v53 = vld [vmem:[#allocation4 + $0xc0] sm:$0xf0]  ;;  %v1500_v40 = vpop.f32.mrf.mxu0  ;;  %v2135_v3 = vsel %vm7249_vm2, %v5855_v55, %v2134_v29  ;;  %v5849_v6 = vrot.slane %v1856_v62, 9  ;;  %v6847_v14 = vld [vmem:[#allocation7 + $0x168] sm:$0xff]  ;;  %v6873_v15 = vld [vmem:[#allocation7 + $0x238] sm:$0xff] }
 0x1c6   : > { %v5958_v57 = vor.u32 %v6790_v53, %v5957_v41  ;;  %v1501_v0 = vadd.f32 %v7051_v63, %v1500_v40  ;;  %v6822_v2 = vld [vmem:[#allocation7 + $0xa0] sm:$0xff]  ;;  %v2261_v8 = vrot.slane %v2260_v60, 4  ;;  %v2139_v12 = vsel %vm7249_vm2, %v5856_v56, %v2138_v61  ;;  %2160 = vst [vmem:[#allocation4 + $0xa4] sm:$0xf] %v2135_v3  ;;  %v6821_v17 = vld [vmem:[#allocation7 + $0x98] sm:$0xff]  ;;  %3441 = vmatpush.bf16.msra.mxu1 %v6873_v15  ;;  %v6872_v20 = vld [vmem:[#allocation7 + $0x230] sm:$0xff] }
 0x1c7   : > { %v1857_v4 = vld [vmem:[#allocation2 + $0x34] sm:$0x1]  ;;  %2161 = vst [vmem:[#allocation4 + $0xc8] sm:$0xf] %v2139_v12  ;;  %3270 = vmatpush.bf16.msrb.mxu3 %v6822_v2  ;;  %v2333_v22 = vld [vmem:[#allocation2 + $0x30] sm:$0xe]  ;;  %3414 = vmatpush.bf16.msra.mxu0 %v6863_v7 }
 0x1c8   : > { %3343 = vmatmul.bf16.gmra.mxu1 %v5958_v57  ;;  %v7819_v13 = vmax.f32 %v1501_v0, 0.0  ;;  %v1902_v16 = vrot.slane %v1857_v4, 5  ;;  %v2266_v18 = vsel %vm7268_vm5, %v2261_v8, %v2265_v10  ;;  %v2334_v23 = vld [vmem:[#allocation2 + $0x34] sm:$0x1]  ;;  %v5863_v24 = vrot.slane %v2333_v22, 9  ;;  %3356 = vmatpush.bf16.msrb.mxu2 %v6847_v14  ;;  %v6820_v42 = vld [vmem:[#allocation7 + $0x90] sm:$0xff] }
 0x1c9   : > { %2321 = vst [vmem:[#allocation4 + $0xac] sm:$0xf] %v2266_v18  ;;  %v2375_v25 = vrot.slane %v2334_v23, 5  ;;  %v2168_v27 = vld [vmem:[#allocation2 + $0x28] sm:$0xf]  ;;  %v6862_v32 = vld [vmem:[#allocation7 + $0x1e0] sm:$0xff] }
 0x1ca   : > { %8286 = vst [vmem:[#allocation16_spill] sm:$0xff] %v7819_v13  ;;  %v1547_v19 = vpack.c.bf16 %v7819_v13, %v7819_v13  ;;  %v1903_v21 = vsel %vm7249_vm2, %v5849_v6, %v1902_v16  ;;  %v2169_v30 = vld [vmem:[#allocation2 + $0x30] sm:$0xf]  ;;  %v1672_v31 = vld [vmem:[#allocation2 + $0x38] sm:$0xf]  ;;  %3442 = vmatpush.bf16.msra.mxu1 %v6872_v20  ;;  %v6860_v56 = vld [vmem:[#allocation7 + $0x1d0] sm:$0xff] }
 0x1cb   : > { %1922 = vst [vmem:[#allocation4 + $0xe0] sm:$0xf] %v1903_v21  ;;  %v6846_v33 = vld [vmem:[#allocation7 + $0x160] sm:$0xff]  ;;  %v2376_v36 = vsel %vm7249_vm2, %v5863_v24, %v2375_v25  ;;  %3271 = vmatpush.bf16.msrb.mxu3 %v6821_v17  ;;  %v1675_v41 = vld [vmem:[#allocation2 + $0x3c] sm:$0x1]  ;;  %3415 = vmatpush.bf16.msra.mxu0 %v6862_v32  ;;  %v6861_v45 = vld [vmem:[#allocation7 + $0x1d8] sm:$0xff] }
 0x1cc   : > { %v1598_v28 = vshrl.u32 %v1547_v19, 16  ;;  %2176 = vst [vmem:[#allocation4 + $0x84] sm:$0xf] %v2168_v27  ;;  %v1601_v38 = vshll.u32 %v1547_v19, 16  ;;  %v6871_v46 = vld [vmem:[#allocation7 + $0x228] sm:$0xff]  ;;  %3357 = vmatpush.bf16.msrb.mxu2 %v6846_v33  ;;  %v6845_v51 = vld [vmem:[#allocation7 + $0x158] sm:$0xff] }
 0x1cd   : > { %v1502_v9 = vpop.f32.mrf.mxu0  ;;  %2177 = vst [vmem:[#allocation4 + $0xa8] sm:$0xf] %v2169_v30  ;;  %v6819_v29 = vld [vmem:[#allocation7 + $0x88] sm:$0xff]  ;;  %v6844_v57 = vld [vmem:[#allocation7 + $0x150] sm:$0xff]  ;;  %v6870_v58 = vld [vmem:[#allocation7 + $0x220] sm:$0xff] }
 0x1ce   : > { %v1600_v37 = vrot.slane %v1598_v28, 7  ;;  %v1503_v39 = vadd.f32 %v7051_v63, %v1502_v9  ;;  %2401 = vst [vmem:[#allocation4 + $0xb0] sm:$0xf] %v2376_v36  ;;  %3443 = vmatpush.bf16.msra.mxu1 %v6871_v46  ;;  %v1678_v59 = vld [vmem:[#allocation2 + $0x40] sm:$0xf]  ;;  %v6818_v63 = vld [vmem:[#allocation7 + $0x80] sm:$0xff] }
 0x1cf   : > { %3272 = vmatpush.bf16.msrb.mxu3 %v6820_v42  ;;  %3416 = vmatpush.bf16.msra.mxu0 %v6861_v45  ;;  %v1681_v62 = vld [vmem:[#allocation2 + $0x44] sm:$0x1]  ;;  %v3774_v0 = vld [vmem:[#allocation2] sm:$0xe]  ;;  %v6857_v3 = vld [vmem:[#allocation7 + $0x1b8] sm:$0xff] }
 0x1d0   : > { %v1603_v47 = vor.u32 %v1601_v38, %v1600_v37  ;;  %v1604_v48 = vrot.slane %v1600_v37, 4  ;;  %v7829_v44 = vmax.f32 %v1503_v39, 0.0  ;;  %3358 = vmatpush.bf16.msrb.mxu2 %v6845_v51  ;;  %v3775_v2 = vld [vmem:[#allocation2 + $0x4] sm:$0x1]  ;;  %v6299_v7 = vrot.slane %v3774_v0, 9  ;;  %v6859_v10 = vld [vmem:[#allocation7 + $0x1c8] sm:$0xff] }
 0x1d1   : > { %v3808_v8 = vrot.slane %v3775_v2, 5  ;;  %v6843_v12 = vld [vmem:[#allocation7 + $0x148] sm:$0xff]  ;;  %v6869_v14 = vld [vmem:[#allocation7 + $0x218] sm:$0xff]  ;;  %v6842_v39 = vld [vmem:[#allocation7 + $0x140] sm:$0xff] }
 0x1d2   : > { %8287 = vst [vmem:[#allocation17_spill] sm:$0xff] %v7829_v44  ;;  %v1673_v55 = vsel %vm7689_vm6, %v1603_v47, %v1672_v31  ;;  %v1676_v53 = vsel %vm7695_vm7, %v1604_v48, %v1675_v41  ;;  %v1548_v54 = vpack.c.bf16 %v7829_v44, %v7829_v44  ;;  %3444 = vmatpush.bf16.msra.mxu1 %v6870_v58  ;;  %v7841_v24 = vld [vmem:[#allocation2 + $0x48] sm:$0xf]  ;;  %v7843_v27 = vld [vmem:[#allocation4 + $0x8] sm:$0xf] }
 0x1d3   : > { %1674 = vst [vmem:[#allocation2 + $0x38] sm:$0xf] %v1673_v55  ;;  %3273 = vmatpush.bf16.msrb.mxu3 %v6819_v29  ;;  %3417 = vmatpush.bf16.msra.mxu0 %v6860_v56  ;;  %v3809_v28 = vsel %vm7249_vm2, %v6299_v7, %v3808_v8  ;;  %v6858_v31 = vld [vmem:[#allocation7 + $0x1c0] sm:$0xff]  ;;  %v6868_v42 = vld [vmem:[#allocation7 + $0x210] sm:$0xff]  ;;  %v2296_v48 = vshrl.u32 %v7841_v24, 16  ;;  %v2299_v29 = vshll.u32 %v7841_v24, 16 }
 0x1d4   : > { %1677 = vst [vmem:[#allocation2 + $0x3c] sm:$0x1] %v1676_v53  ;;  %v1606_v40 = vshrl.u32 %v1548_v54, 16  ;;  %v1609_v61 = vshll.u32 %v1548_v54, 16  ;;  %3359 = vmatpush.bf16.msrb.mxu2 %v6844_v57  ;;  %v6856_v41 = vld [vmem:[#allocation7 + $0x1b0] sm:$0xff]  ;;  %v6867_v53 = vld [vmem:[#allocation7 + $0x208] sm:$0xff] }
 0x1d5   : > { %3846 = vst [vmem:[#allocation4 + $0x8] sm:$0xf] %v3809_v28  ;;  %v5977_v56 = vld [vmem:[#allocation4 + $0xd8] sm:$0xf] }
 0x1d6   : > { %v1608_v60 = vrot.slane %v1606_v40, 7  ;;  %3445 = vmatpush.bf16.msra.mxu1 %v6869_v14  ;;  %v6933_v13 = vld [vmem:[#allocation9 + $0xb8] sm:$0xff] }
 0x1d7   : > { %3274 = vmatpush.bf16.msrb.mxu3 %v6818_v63  ;;  %3418 = vmatpush.bf16.msra.mxu0 %v6859_v10 }
 0x1d8   : > { %v1611_v4 = vor.u32 %v1609_v61, %v1608_v60  ;;  %v1612_v6 = vrot.slane %v1608_v60, 4  ;;  %3360 = vmatpush.bf16.msrb.mxu2 %v6843_v12  ;;  %v6866_v12 = vld [vmem:[#allocation7 + $0x200] sm:$0xff] }
 0x1da   : > { %v1679_v15 = vsel %vm7689_vm6, %v1611_v4, %v1678_v59  ;;  %v1682_v16 = vsel %vm7695_vm7, %v1612_v6, %v1681_v62  ;;  %v1691_v17 = vld [vmem:[#allocation2 + $0x38] sm:$0xf]  ;;  %3446 = vmatpush.bf16.msra.mxu1 %v6868_v42 }
 0x1db   : > { %v1930_v18 = vld [vmem:[#allocation2 + $0x38] sm:$0xf]  ;;  %1680 = vst [vmem:[#allocation2 + $0x40] sm:$0xf] %v1679_v15  ;;  %v1715_v21 = vld [vmem:[#allocation2 + $0x3c] sm:$0x1]  ;;  %3383 = vmatpush.bf16.msra.mxu3 %v6857_v3  ;;  %3419 = vmatpush.bf16.msra.mxu0 %v6858_v31 }
 0x1dc   : > { %v1714_v19 = vld [vmem:[#allocation2 + $0x38] sm:$0xf]  ;;  %1683 = vst [vmem:[#allocation2 + $0x44] sm:$0x1] %v1682_v16  ;;  %v1824_v25 = vshll.u32 %v1715_v21, 16  ;;  %3361 = vmatpush.bf16.msrb.mxu2 %v6842_v39  ;;  %v7851_v15 = vrot.slane %v2296_v48, 4 }
 0x1dd   : > { %v1815_v22 = vshrl.u32 %v1714_v19, 16  ;;  %v1818_v23 = vshll.u32 %v1714_v19, 16  ;;  %v1952_v30 = vld [vmem:[#allocation2 + $0x38] sm:$0xf]  ;;  %1699 = vst [vmem:[#allocation4 + $0xfc] sm:$0xf] %v1691_v17 }
 0x1de   : > { %v1953_v33 = vld [vmem:[#allocation2 + $0x3c] sm:$0x1]  ;;  %1938 = vst [vmem:[#allocation4 + $0xe4] sm:$0xf] %v1930_v18  ;;  %v2041_v20 = vshrl.u32 %v1952_v30, 16  ;;  %v2044_v36 = vshll.u32 %v1952_v30, 16  ;;  %3447 = vmatpush.bf16.msra.mxu1 %v6867_v53 }
 0x1df   : > { %v1817_v9 = vrot.slane %v1815_v22, 4  ;;  %v1820_v32 = vrot.slane %v1818_v23, 5  ;;  %v2050_v37 = vshll.u32 %v1953_v33, 16  ;;  %v1826_v45 = vrot.slane %v1824_v25, 5  ;;  %v2191_v54 = vld [vmem:[#allocation2 + $0x38] sm:$0xf]  ;;  %3384 = vmatpush.bf16.msra.mxu3 %v6856_v41  ;;  %5196 = vmatpush.bf16.msrb.mxu0 %v6933_v13 }
 0x1e0   : > { %v2043_v46 = vrot.slane %v2041_v20, 4  ;;  %v2046_v47 = vrot.slane %v2044_v36, 5  ;;  %v2192_v59 = vld [vmem:[#allocation2 + $0x3c] sm:$0x1]  ;;  %v2268_v60 = vshrl.u32 %v2191_v54, 16  ;;  %v2271_v61 = vshll.u32 %v2191_v54, 16 }
 0x1e1   : > { %v1821_v38 = vor.u32 %v1820_v32, %v1817_v9  ;;  %v2052_v55 = vrot.slane %v2050_v37, 5  ;;  %v1858_v14 = vld [vmem:[#allocation2 + $0x38] sm:$0xe]  ;;  %v1859_v21 = vld [vmem:[#allocation2 + $0x3c] sm:$0x1]  ;;  %v2277_v25 = vshll.u32 %v2192_v59, 16 }
 0x1e2   : > { %v1931_v40 = vld [vmem:[#allocation2 + $0x40] sm:$0xf]  ;;  %v2047_v58 = vor.u32 %v2046_v47, %v2043_v46  ;;  %v2270_v18 = vrot.slane %v2268_v60, 4  ;;  %v2273_v19 = vrot.slane %v2271_v61, 5  ;;  %v5850_v28 = vrot.slane %v1858_v14, 9  ;;  %3448 = vmatpush.bf16.msra.mxu1 %v6866_v12  ;;  %v6854_v61 = vld [vmem:[#allocation7 + $0x1a0] sm:$0xff] }
 0x1e3   : > { %v1822_v51 = vrot.slane %v1821_v38, 4  ;;  %v1954_v57 = vld [vmem:[#allocation2 + $0x40] sm:$0xf]  ;;  %1939 = vst [vmem:[#allocation4 + $0x108] sm:$0xf] %v1931_v40  ;;  %v1906_v30 = vrot.slane %v1859_v21, 5 }
 0x1e4   : > { %v1955_v63 = vld [vmem:[#allocation2 + $0x44] sm:$0x1]  ;;  %v2055_v0 = vshrl.u32 %v1954_v57, 16  ;;  %v2058_v2 = vshll.u32 %v1954_v57, 16  ;;  %v6797_v3 = vld [vmem:[#allocation4 + $0xf8] sm:$0xf0]  ;;  %v2274_v9 = vor.u32 %v2273_v19, %v2270_v18 }
 0x1e5   : > { %v1827_v62 = vsel %vm7268_vm5, %v1822_v51, %v1826_v45  ;;  %v2048_v4 = vrot.slane %v2047_v58, 4  ;;  %v2064_v6 = vshll.u32 %v1955_v63, 16  ;;  %v5978_v7 = vor.u32 %v6797_v3, %v5977_v56  ;;  %v6855_v23 = vld [vmem:[#allocation7 + $0x1a8] sm:$0xff]  ;;  %v6794_v31 = vld [vmem:[#allocation4 + $0xe4] sm:$0xf] }
 0x1e6   : > { %1843 = vst [vmem:[#allocation4 + $0x100] sm:$0xf] %v1827_v62  ;;  %v2057_v8 = vrot.slane %v2055_v0, 4  ;;  %v2060_v10 = vrot.slane %v2058_v2, 5  ;;  %v2335_v32 = vld [vmem:[#allocation2 + $0x38] sm:$0xe]  ;;  %3385 = vmatpush.bf16.msra.mxu3 %v6855_v23  ;;  %v1907_v39 = vsel %vm7249_vm2, %v5850_v28, %v1906_v30 }
 0x1e7   : > { %v2053_v16 = vsel %vm7268_vm5, %v2048_v4, %v2052_v55  ;;  %v2066_v17 = vrot.slane %v2064_v6, 5  ;;  %3232 = vmatmul.bf16.gmra.mxu3 %v5978_v7  ;;  %v2336_v33 = vld [vmem:[#allocation2 + $0x3c] sm:$0x1]  ;;  %v2193_v20 = vld [vmem:[#allocation2 + $0x40] sm:$0xf]  ;;  %v2279_v38 = vrot.slane %v2277_v25, 5 }
 0x1e8   : > { %v2061_v22 = vor.u32 %v2060_v10, %v2057_v8  ;;  %2082 = vst [vmem:[#allocation4 + $0xe8] sm:$0xf] %v2053_v16  ;;  %v6793_v36 = vld [vmem:[#allocation4 + $0xdc] sm:$0xf]  ;;  %v5864_v42 = vrot.slane %v2335_v32, 9  ;;  %v2275_v46 = vrot.slane %v2274_v9, 4 }
 0x1e9   : > { %v2194_v41 = vld [vmem:[#allocation2 + $0x44] sm:$0x1]  ;;  %1923 = vst [vmem:[#allocation4 + $0x104] sm:$0xf] %v1907_v39  ;;  %v2379_v47 = vrot.slane %v2336_v33, 5  ;;  %v2282_v54 = vshrl.u32 %v2193_v20, 16 }
 0x1ea   : > { %v2062_v37 = vrot.slane %v2061_v22, 4  ;;  %v5987_v45 = vld [vmem:[#allocation4 + $0x104] sm:$0xf0]  ;;  %v2196_v53 = vld [vmem:[#allocation2 + $0x4c] sm:$0x1]  ;;  %v2285_v56 = vshll.u32 %v2193_v20, 16  ;;  %v2280_v57 = vsel %vm7268_vm5, %v2275_v46, %v2279_v38  ;;  %3386 = vmatpush.bf16.msra.mxu3 %v6854_v61 }
 0x1eb   : > { %v5990_v48 = vor.u32 %v6794_v31, %v5987_v45  ;;  %v2380_v58 = vsel %vm7249_vm2, %v5864_v42, %v2379_v47  ;;  %v2291_v59 = vshll.u32 %v2194_v41, 16  ;;  %v2096_v60 = vld [vmem:[#allocation2 + $0x38] sm:$0xe]  ;;  %2322 = vst [vmem:[#allocation4 + $0xd0] sm:$0xf] %v2280_v57  ;;  %v2284_v62 = vrot.slane %v2282_v54, 4 }
 0x1ec   : > { %v2067_v55 = vsel %vm7268_vm5, %v2062_v37, %v2066_v17  ;;  %v2287_v63 = vrot.slane %v2285_v56, 5  ;;  %v2301_v0 = vrot.slane %v2299_v29, 5  ;;  %2402 = vst [vmem:[#allocation4 + $0xd4] sm:$0xf] %v2380_v58  ;;  %v2305_v3 = vshll.u32 %v2196_v53, 16  ;;  %v6853_v45 = vld [vmem:[#allocation7 + $0x198] sm:$0xff] }
 0x1ed   : > { %v5979_v51 = vld [vmem:[#allocation4 + $0xfc] sm:$0xf0]  ;;  %2083 = vst [vmem:[#allocation4 + $0x10c] sm:$0xf] %v2067_v55  ;;  %3319 = vmatmul.bf16.gmra.mxu0 %v5990_v48  ;;  %v2293_v2 = vrot.slane %v2291_v59, 5  ;;  %v5857_v14 = vrot.slane %v2096_v60, 9 }
 0x1ee   : > { %v5982_v40 = vor.u32 %v6793_v36, %v5979_v51  ;;  %v2288_v4 = vor.u32 %v2287_v63, %v2284_v62  ;;  %v2302_v6 = vor.u32 %v2301_v0, %v7851_v15  ;;  %v2097_v7 = vld [vmem:[#allocation2 + $0x3c] sm:$0x1]  ;;  %v2098_v8 = vld [vmem:[#allocation2 + $0x40] sm:$0xe]  ;;  %v2099_v10 = vld [vmem:[#allocation2 + $0x44] sm:$0x1]  ;;  %3387 = vmatpush.bf16.msra.mxu3 %v6853_v45 }
 0x1ef   : > { %v2307_v12 = vrot.slane %v2305_v3, 5  ;;  %v2142_v16 = vrot.slane %v2097_v7, 5  ;;  %v5858_v17 = vrot.slane %v2098_v8, 9  ;;  %v2337_v18 = vld [vmem:[#allocation2 + $0x40] sm:$0xe]  ;;  %v2146_v29 = vrot.slane %v2099_v10, 5 }
 0x1f0   : > { %3261 = vmatmul.bf16.gmra.mxu2 %v5982_v40  ;;  %v6771_v19 = vld [vmem:[#allocation4 + $0x28] sm:$0xf0]  ;;  %v2289_v21 = vrot.slane %v2288_v4, 4  ;;  %v2303_v24 = vrot.slane %v2302_v6, 4  ;;  %v5865_v22 = vrot.slane %v2337_v18, 9  ;;  %v6852_v40 = vld [vmem:[#allocation7 + $0x190] sm:$0xff] }
 0x1f1   : > { %v2143_v23 = vsel %vm7249_vm2, %v5857_v14, %v2142_v16  ;;  %v2338_v25 = vld [vmem:[#allocation2 + $0x44] sm:$0x1]  ;;  %v2339_v28 = vld [vmem:[#allocation2 + $0x48] sm:$0xe]  ;;  %v2340_v30 = vld [vmem:[#allocation2 + $0x4c] sm:$0x1]  ;;  %v2147_v33 = vsel %vm7249_vm2, %v5858_v17, %v2146_v29  ;;  %v5878_v38 = vor.u32 %v6771_v19, %v7843_v27 }
 0x1f2   : > { %v5993_v15 = vld [vmem:[#allocation4 + $0xe8] sm:$0xf]  ;;  %v2294_v9 = vsel %vm7268_vm5, %v2289_v21, %v2293_v2  ;;  %v2308_v32 = vsel %vm7268_vm5, %v2303_v24, %v2307_v12  ;;  %2162 = vst [vmem:[#allocation4 + $0xec] sm:$0xf] %v2143_v23  ;;  %v2383_v36 = vrot.slane %v2338_v25, 5  ;;  %v5866_v37 = vrot.slane %v2339_v28, 9  ;;  %3388 = vmatpush.bf16.msra.mxu3 %v6852_v40 }
 0x1f3   : > { %2323 = vst [vmem:[#allocation4 + $0xf4] sm:$0xf] %v2294_v9  ;;  %v2387_v39 = vrot.slane %v2340_v30, 5  ;;  %v2170_v41 = vld [vmem:[#allocation2 + $0x38] sm:$0xf] }
 0x1f4   : > { %v6799_v31 = vld [vmem:[#allocation4 + $0x108] sm:$0xf0]  ;;  %2324 = vst [vmem:[#allocation4 + $0x118] sm:$0xf] %v2308_v32  ;;  %v2384_v42 = vsel %vm7249_vm2, %v5865_v22, %v2383_v36  ;;  %v2171_v47 = vld [vmem:[#allocation2 + $0x40] sm:$0xf] }
 0x1f5   : > { %v5994_v20 = vor.u32 %v6799_v31, %v5993_v15  ;;  %2163 = vst [vmem:[#allocation4 + $0x110] sm:$0xf] %v2147_v33  ;;  %v2388_v46 = vsel %vm7249_vm2, %v5866_v37, %v2387_v39  ;;  %v5895_v48 = vld [vmem:[#allocation4 + $0x3c] sm:$0xf0]  ;;  %v2172_v51 = vld [vmem:[#allocation2 + $0x48] sm:$0xf] }
 0x1f6   : > { %2403 = vst [vmem:[#allocation4 + $0xf8] sm:$0xf] %v2384_v42  ;;  %v5887_v55 = vld [vmem:[#allocation4 + $0x34] sm:$0xf0]  ;;  %v6769_v27 = vld [vmem:[#allocation4 + $0x1c] sm:$0xf] }
 0x1f7   : > { %3348 = vmatmul.bf16.gmra.mxu1 %v5994_v20  ;;  %3275 = vmatmul.bf16.vlgmr.msrb.gmra.mxu3 %v5878_v38  ;;  %2404 = vst [vmem:[#allocation4 + $0x11c] sm:$0xf] %v2388_v46  ;;  %v5898_v53 = vor.u32 %v6769_v27, %v5895_v48  ;;  %v6768_v54 = vld [vmem:[#allocation4 + $0x14] sm:$0xf]  ;;  %v6774_v57 = vld [vmem:[#allocation4 + $0x40] sm:$0xf0] }
 0x1f8   : > { %2178 = vst [vmem:[#allocation4 + $0xcc] sm:$0xf] %v2170_v41  ;;  %v5890_v56 = vor.u32 %v6768_v54, %v5887_v55  ;;  %v6780_v58 = vld [vmem:[#allocation4 + $0x70] sm:$0xf0]  ;;  %v5901_v59 = vld [vmem:[#allocation4 + $0x20] sm:$0xf] }
 0x1f9   : > { %2179 = vst [vmem:[#allocation4 + $0xf0] sm:$0xf] %v2171_v47  ;;  %v5913_v60 = vld [vmem:[#allocation4 + $0x50] sm:$0xf]  ;;  %v5902_v61 = vor.u32 %v6774_v57, %v5901_v59  ;;  %v5931_v0 = vld [vmem:[#allocation4 + $0x84] sm:$0xf0] }
 0x1fa   : > { %2180 = vst [vmem:[#allocation4 + $0x114] sm:$0xf] %v2172_v51  ;;  %v5914_v62 = vor.u32 %v6780_v58, %v5913_v60  ;;  %v6851_v63 = vld [vmem:[#allocation7 + $0x188] sm:$0xff]  ;;  %v5923_v2 = vld [vmem:[#allocation4 + $0x7c] sm:$0xf0] }
 0x1fb   : > { %3389 = vmatpush.bf16.msra.mxu3 %v6851_v63  ;;  %v6778_v3 = vld [vmem:[#allocation4 + $0x64] sm:$0xf]  ;;  %v6777_v6 = vld [vmem:[#allocation4 + $0x5c] sm:$0xf]  ;;  %v4124_v10 = vld [vmem:[#allocation2 + $0x48] sm:$0xf] }
 0x1fc   : > { %v5934_v4 = vor.u32 %v6778_v3, %v5931_v0  ;;  %v5926_v7 = vor.u32 %v6777_v6, %v5923_v2  ;;  %v6850_v8 = vld [vmem:[#allocation7 + $0x180] sm:$0xff]  ;;  %v4125_v12 = vld [vmem:[#allocation2 + $0x4c] sm:$0x1]  ;;  %v4225_v14 = vshrl.u32 %v4124_v10, 16  ;;  %v4228_v16 = vshll.u32 %v4124_v10, 16  ;;  %v7883_v2 = vpop.f32.mrf.mxu1  ;;  %v6931_v13 = vld [vmem:[#allocation9 + $0xa8] sm:$0xff] }
 0x1fd   : > { %3420 = vmatmul.bf16.vlgmr.msra.gmra.mxu0 %v5898_v53  ;;  %v4234_v17 = vshll.u32 %v4125_v12, 16  ;;  %v6783_v21 = vld [vmem:[#allocation4 + $0x88] sm:$0xf0]  ;;  %v6789_v24 = vld [vmem:[#allocation4 + $0xb8] sm:$0xf0] }
 0x1fe   : > { %v4227_v18 = vrot.slane %v4225_v14, 4  ;;  %v4230_v19 = vrot.slane %v4228_v16, 5  ;;  %v5937_v23 = vld [vmem:[#allocation4 + $0x68] sm:$0xf]  ;;  %v5949_v25 = vld [vmem:[#allocation4 + $0x98] sm:$0xf] }
 0x1ff   : > { %3390 = vmatpush.bf16.msra.mxu3 %v6850_v8  ;;  %v4236_v22 = vrot.slane %v4234_v17, 5  ;;  %v5938_v28 = vor.u32 %v6783_v21, %v5937_v23  ;;  %v5950_v15 = vor.u32 %v6789_v24, %v5949_v25  ;;  %v6003_v31 = vld [vmem:[#allocation4 + $0x114] sm:$0xf0]  ;;  %v4269_v33 = vld [vmem:[#allocation2 + $0x4c] sm:$0x1]  ;;  %v3247_v21 = vpop.f32.mrf.mxu2 }
 0x200   : > { %3362 = vmatmul.bf16.vlgmr.msrb.gmra.mxu2 %v5890_v56  ;;  %v4231_v29 = vor.u32 %v4230_v19, %v4227_v18  ;;  %v4268_v32 = vld [vmem:[#allocation2 + $0x48] sm:$0xe]  ;;  %v5967_v20 = vld [vmem:[#allocation4 + $0xcc] sm:$0xf0]  ;;  %v4316_v37 = vrot.slane %v4269_v33, 5 }
 0x201   : > { %v6322_v36 = vrot.slane %v4268_v32, 9  ;;  %v5959_v38 = vld [vmem:[#allocation4 + $0xc4] sm:$0xf0]  ;;  %v6787_v39 = vld [vmem:[#allocation4 + $0xac] sm:$0xf] }
 0x202   : > { %v4232_v30 = vrot.slane %v4231_v29, 4  ;;  %v6801_v42 = vld [vmem:[#allocation4 + $0x118] sm:$0xf0]  ;;  %v5970_v45 = vor.u32 %v6787_v39, %v5967_v20  ;;  %v6786_v46 = vld [vmem:[#allocation4 + $0xa4] sm:$0xf] }
 0x203   : > { %v4317_v41 = vsel %vm7249_vm2, %v6322_v36, %v4316_v37  ;;  %v5962_v47 = vor.u32 %v6786_v46, %v5959_v38  ;;  %v6792_v48 = vld [vmem:[#allocation4 + $0xd0] sm:$0xf0]  ;;  %v6798_v51 = vld [vmem:[#allocation4 + $0x100] sm:$0xf0]  ;;  %v5973_v55 = vld [vmem:[#allocation4 + $0xb0] sm:$0xf] }
 0x204   : > { %v4237_v9 = vsel %vm7268_vm5, %v4232_v30, %v4236_v22  ;;  %4333 = vst [vmem:[#allocation4 + $0x11c] sm:$0xf] %v4317_v41  ;;  %v5985_v27 = vld [vmem:[#allocation4 + $0xe0] sm:$0xf]  ;;  %v5974_v53 = vor.u32 %v6792_v48, %v5973_v55  ;;  %v6796_v56 = vld [vmem:[#allocation4 + $0xf4] sm:$0xf]  ;;  %v7885_v10 = vpop.f32.mrf.mxu1  ;;  %v3305_v22 = vpop.f32.mrf.mxu0 }
 0x205   : > { %4253 = vst [vmem:[#allocation4 + $0x118] sm:$0xf] %v4237_v9  ;;  %v5986_v54 = vor.u32 %v6798_v51, %v5985_v27  ;;  %v5995_v40 = vld [vmem:[#allocation4 + $0x10c] sm:$0xf0]  ;;  %v6006_v57 = vor.u32 %v6796_v56, %v6003_v31  ;;  %v6795_v58 = vld [vmem:[#allocation4 + $0xec] sm:$0xf] }
 0x206   : > { %v5998_v59 = vor.u32 %v6795_v58, %v5995_v40  ;;  %v6009_v60 = vld [vmem:[#allocation4 + $0xf8] sm:$0xf]  ;;  %v6782_v3 = vld [vmem:[#allocation4 + $0x80] sm:$0xf0]  ;;  %v6791_v14 = vld [vmem:[#allocation4 + $0xc8] sm:$0xf0] }
 0x207   : > { %3449 = vmatmul.bf16.vlgmr.msra.gmra.mxu1 %v5902_v61  ;;  %3280 = vmatmul.bf16.gmra.mxu3 %v5914_v62  ;;  %v6773_v61 = vld [vmem:[#allocation4 + $0x38] sm:$0xf0]  ;;  %v5893_v62 = vld [vmem:[#allocation4 + $0x18] sm:$0xf]  ;;  %v6010_v63 = vor.u32 %v6801_v42, %v6009_v60  ;;  %v5965_v16 = vld [vmem:[#allocation4 + $0xa8] sm:$0xf] }
 0x208   : > { %v5894_v0 = vor.u32 %v6773_v61, %v5893_v62  ;;  %v4101_v8 = vld [vmem:[#allocation2 + $0x48] sm:$0xf]  ;;  %v5966_v17 = vor.u32 %v6791_v14, %v5965_v16  ;;  %v6001_v29 = vld [vmem:[#allocation4 + $0xf0] sm:$0xf]  ;;  %v6914_v58 = vld [vmem:[#allocation9 + $0x20] sm:$0xff] }
 0x209   : > { %v6917_v38 = vld [vmem:[#allocation9 + $0x38] sm:$0xff]  ;;  %v6916_v46 = vld [vmem:[#allocation9 + $0x30] sm:$0xff]  ;;  %v6915_v27 = vld [vmem:[#allocation9 + $0x28] sm:$0xff] }
 0x20a   : > { %5138 = vmatpush.bf16.msra.mxu2 %v6917_v38  ;;  %v6940_v16 = vld [vmem:[#allocation9 + $0xf0] sm:$0xff] }
 0x20c   : > { %v7887_v12 = vpop.f32.mrf.mxu1 }
 0x20d   : > { %3425 = vmatmul.bf16.gmra.mxu0 %v5934_v4  ;;  %v5929_v4 = vld [vmem:[#allocation4 + $0x60] sm:$0xf] }
 0x20e   : > { %v5930_v6 = vor.u32 %v6782_v3, %v5929_v4  ;;  %5139 = vmatpush.bf16.msra.mxu2 %v6916_v46  ;;  %v7950_v4 = vld [vmem:[%s8260_s5] ss:$0 sm:$0xff] }
 0x210   : > { %3367 = vmatmul.bf16.gmra.mxu2 %v5926_v7  ;;  %v6800_v7 = vld [vmem:[#allocation4 + $0x110] sm:$0xf0] }
 0x211   : > { %4109 = vst [vmem:[#allocation4 + $0x114] sm:$0xf] %v4101_v8  ;;  %v6002_v25 = vor.u32 %v6800_v7, %v6001_v29  ;;  %v3219_v8 = vadd.f32 %v7950_v4, %v7883_v2  ;;  %v6925_v2 = vld [vmem:[#allocation9 + $0x78] sm:$0xff] }
 0x212   : > { %5140 = vmatpush.bf16.msra.mxu2 %v6915_v27  ;;  %5167 = vmatpush.bf16.msrb.mxu3 %v6925_v2  ;;  %v6930_v2 = vld [vmem:[#allocation9 + $0xa0] sm:$0xff] }
 0x213   : > { %v3248_v14 = vadd.f32 %v3247_v21, %v3219_v8 }
 0x214   : > { %v7891_v19 = vpop.f32.mrf.mxu1 }
 0x216   : > { %5141 = vmatpush.bf16.msra.mxu2 %v6914_v58 }
 0x217   : > { %3454 = vmatmul.bf16.gmra.mxu1 %v5938_v28  ;;  %3285 = vmatmul.bf16.gmra.mxu3 %v5950_v15  ;;  %v3249_v28 = vpop.f32.mrf.mxu2  ;;  %v7899_v15 = vpop.f32.mrf.mxu0 }
 0x21c   : > { %v7895_v23 = vpop.f32.mrf.mxu1 }
 0x21d   : > { %3430 = vmatmul.bf16.gmra.mxu0 %v5970_v45 }
 0x21f   : > { %v7903_v9 = vpop.f32.mrf.mxu2  ;;  %v7907_v33 = vpop.f32.mrf.mxu0 }
 0x220   : > { %3372 = vmatmul.bf16.gmra.mxu2 %v5962_v47 }
 0x224   : > { %v7901_v31 = vpop.f32.mrf.mxu1 }
 0x227   : > { %3459 = vmatmul.bf16.gmra.mxu1 %v5974_v53  ;;  %3290 = vmatmul.bf16.gmra.mxu3 %v5986_v54  ;;  %v7911_v36 = vpop.f32.mrf.mxu2  ;;  %v7913_v39 = vpop.f32.mrf.mxu0 }
 0x22c   : > { %v7909_v20 = vpop.f32.mrf.mxu1 }
 0x22d   : > { %3435 = vmatmul.bf16.gmra.mxu0 %v6006_v57  ;;  %v6941_v57 = vld [vmem:[#allocation9 + $0xf8] sm:$0xff] }
 0x22e   : > { %5225 = vmatpush.bf16.msrb.mxu1 %v6941_v57  ;;  %v3221_v57 = vadd.f32 %v7950_v4, %v7885_v10  ;;  %v3224_v10 = vadd.f32 %v7950_v4, %v7887_v12  ;;  %v6923_v12 = vld [vmem:[#allocation9 + $0x68] sm:$0xff] }
 0x230   : > { %3377 = vmatmul.bf16.gmra.mxu2 %v5998_v59  ;;  %v3250_v44 = vadd.f32 %v3249_v28, %v3221_v57  ;;  %v6911_v57 = vld [vmem:[#allocation9 + $0x8] sm:$0xff] }
 0x232   : > { %5226 = vmatpush.bf16.msrb.mxu1 %v6940_v16 }
 0x234   : > { %v7917_v41 = vpop.f32.mrf.mxu1 }
 0x236   : > { %5227 = vmatpush.bf16.msrb.mxu1 %v6939_v50  ;;  %v6924_v50 = vld [vmem:[#allocation9 + $0x70] sm:$0xff] }
 0x237   : > { %3464 = vmatmul.bf16.gmra.mxu1 %v6010_v63  ;;  %3391 = vmatmul.bf16.vlgmr.msra.gmra.mxu3 %v5894_v0 }
 0x238   : > { %5168 = vmatpush.bf16.msrb.mxu3 %v6924_v50 }
 0x23b   : > { %v7889_v18 = vpop.f32.mrf.mxu3  ;;  %v7919_v47 = vpop.f32.mrf.mxu0 }
 0x23c   : > { %5169 = vmatpush.bf16.msrb.mxu3 %v6923_v12  ;;  %v3566_v12 = vld [vmem:[#allocation2 + $0x8] sm:$0xf] }
 0x243   : > { %v7893_v24 = vpop.f32.mrf.mxu3  ;;  %v7925_v53 = vpop.f32.mrf.mxu0 }
 0x245   : > { %v7915_v42 = vpop.f32.mrf.mxu2  ;;  %v7921_v48 = vpop.f32.mrf.mxu1 }
 0x247   : > { %3396 = vmatmul.bf16.gmra.mxu3 %v5930_v6 }
 0x24d   : > { %v7923_v55 = vpop.f32.mrf.mxu2  ;;  %v7931_v40 = vpop.f32.mrf.mxu1 }
 0x257   : > { %3401 = vmatmul.bf16.gmra.mxu3 %v5966_v17  ;;  %v6913_v17 = vld [vmem:[#allocation9 + $0x18] sm:$0xff] }
 0x258   : > { %5142 = vmatpush.bf16.msra.mxu2 %v6913_v17 }
 0x25c   : > { %5143 = vmatpush.bf16.msra.mxu2 %v6912_v5 }
 0x260   : > { %5144 = vmatpush.bf16.msra.mxu2 %v6911_v57  ;;  %v6928_v57 = vld [vmem:[#allocation9 + $0x90] sm:$0xff] }
 0x267   : > { %3406 = vmatmul.bf16.gmra.mxu3 %v6002_v25 }
 0x26a   : > { %v7897_v30 = vpop.f32.mrf.mxu3  ;;  %v7933_v59 = vpop.f32.mrf.mxu0 }
 0x272   : > { %v7905_v32 = vpop.f32.mrf.mxu3  ;;  %v7943_v0 = vpop.f32.mrf.mxu0 }
 0x273   : > { %v7929_v56 = vpop.f32.mrf.mxu2 }
 0x274   : > { %v7937_v61 = vpop.f32.mrf.mxu1 }
 0x27a   : > { %v3276_v37 = vpop.f32.mrf.mxu3  ;;  %v3421_v29 = vpop.f32.mrf.mxu0 }
 0x27b   : > { %v7939_v62 = vpop.f32.mrf.mxu2  ;;  %v3277_v25 = vadd.f32 %v3276_v37, %v3248_v14  ;;  %v6932_v37 = vld [vmem:[#allocation9 + $0xb0] sm:$0xff] }
 0x27c   : > { %v7945_v3 = vpop.f32.mrf.mxu1  ;;  %5197 = vmatpush.bf16.msrb.mxu0 %v6932_v37 }
 0x27d   : > { %v3306_v58 = vadd.f32 %v3305_v22, %v3277_v25 }
 0x27f   : > { %v3335_v8 = vadd.f32 %v7895_v23, %v3306_v58 }
 0x280   : > { %5198 = vmatpush.bf16.msrb.mxu0 %v6931_v13 }
 0x282   : > { %v3278_v45 = vpop.f32.mrf.mxu3  ;;  %v3423_v14 = vpop.f32.mrf.mxu0 }
 0x283   : > { %v3363_v6 = vpop.f32.mrf.mxu2  ;;  %v3279_v21 = vadd.f32 %v3278_v45, %v3250_v44  ;;  %v3253_v44 = vadd.f32 %v7903_v9, %v3224_v10  ;;  %v6938_v45 = vld [vmem:[#allocation9 + $0xe0] sm:$0xff]  ;;  %v3226_v9 = vadd.f32 %v7950_v4, %v7891_v19 }
 0x284   : > { %v3450_v38 = vpop.f32.mrf.mxu1  ;;  %v3364_v16 = vadd.f32 %v3363_v6, %v3335_v8  ;;  %5228 = vmatpush.bf16.msrb.mxu1 %v6938_v45  ;;  %5199 = vmatpush.bf16.msrb.mxu0 %v6930_v2  ;;  %v6910_v19 = vld [vmem:[#allocation9] sm:$0xff]  ;;  %v3229_v2 = vadd.f32 %v7950_v4, %v7889_v18 }
 0x285   : > { %v3308_v22 = vadd.f32 %v7899_v15, %v3279_v21  ;;  %5145 = vmatpush.bf16.msra.mxu2 %v6910_v19 }
 0x287   : > { %v3337_v6 = vadd.f32 %v7901_v31, %v3308_v22  ;;  %v3255_v31 = vadd.f32 %v7911_v36, %v3226_v9  ;;  %v6921_v36 = vld [vmem:[#allocation9 + $0x58] sm:$0xff] }
 0x28a   : > { %v3281_v51 = vpop.f32.mrf.mxu3 }
 0x28b   : > { %v3365_v46 = vpop.f32.mrf.mxu2  ;;  %v3282_v5 = vadd.f32 %v3281_v51, %v3253_v44  ;;  %v6937_v44 = vld [vmem:[#allocation9 + $0xd8] sm:$0xff] }
 0x28c   : > { %v3452_v17 = vpop.f32.mrf.mxu1  ;;  %v3366_v15 = vadd.f32 %v3365_v46, %v3337_v6  ;;  %v6922_v46 = vld [vmem:[#allocation9 + $0x60] sm:$0xff]  ;;  %5229 = vmatpush.bf16.msrb.mxu1 %v6937_v44 }
 0x28d   : > { %v3311_v8 = vadd.f32 %v7907_v33, %v3282_v5  ;;  %5170 = vmatpush.bf16.msrb.mxu3 %v6922_v46 }
 0x28f   : > { %v3340_v13 = vadd.f32 %v7909_v20, %v3311_v8  ;;  %v3569_v20 = vld [vmem:[#allocation2 + $0xc] sm:$0x1] }
 0x291   : > { %5171 = vmatpush.bf16.msrb.mxu3 %v6921_v36 }
 0x292   : > { %v7927_v54 = vpop.f32.mrf.mxu3 }
 0x293   : > { %v3368_v28 = vpop.f32.mrf.mxu2 }
 0x294   : > { %v3369_v5 = vadd.f32 %v3368_v28, %v3340_v13  ;;  %v3258_v28 = vadd.f32 %v7915_v42, %v3229_v2  ;;  %v6926_v42 = vld [vmem:[#allocation9 + $0x80] sm:$0xff]  ;;  %v6949_v13 = vld [vmem:[#allocation9 + $0x138] sm:$0xff] }
 0x295   : > { %5254 = vmatpush.bf16.msrb.mxu2 %v6949_v13 }
 0x29a   : > { %v7935_v60 = vpop.f32.mrf.mxu3 }
 0x2a2   : > { %v7941_v63 = vpop.f32.mrf.mxu3 }
 0x2aa   : > { %v7952_v7 = vpop.f32.mrf.mxu3 }
 0x2b2   : > { %v7956_v27 = vpop.f32.mrf.mxu3 }
 0x2ba   : > { %v3392_v52 = vpop.f32.mrf.mxu3 }
 0x2bb   : > { %v3393_v25 = vadd.f32 %v3392_v52, %v3364_v16  ;;  %v3370_v16 = vpop.f32.mrf.mxu2 }
 0x2bd   : > { %v3422_v23 = vadd.f32 %v3421_v29, %v3393_v25  ;;  %v3426_v29 = vpop.f32.mrf.mxu0  ;;  %v6929_v25 = vld [vmem:[#allocation9 + $0x98] sm:$0xff] }
 0x2be   : > { %5200 = vmatpush.bf16.msrb.mxu0 %v6929_v25 }
 0x2bf   : > { %v3451_v58 = vadd.f32 %v3450_v38, %v3422_v23  ;;  %v3455_v38 = vpop.f32.mrf.mxu1  ;;  %v3284_v23 = vadd.f32 %v7927_v54, %v3255_v31  ;;  %v3287_v31 = vadd.f32 %v7935_v60, %v3258_v28  ;;  %v6934_v28 = vld [vmem:[#allocation9 + $0xc0] sm:$0xff] }
 0x2c1   : > { %v3470_v52 = vmax.f32 %v3451_v58, 0.0  ;;  %v3313_v54 = vadd.f32 %v7913_v39, %v3284_v23 }
 0x2c2   : > { %v3394_v21 = vpop.f32.mrf.mxu3  ;;  %5201 = vmatpush.bf16.msrb.mxu0 %v6928_v57 }
 0x2c3   : > { %v3478_v37 = vpack.c.bf16 %v3470_v52, %v3470_v52  ;;  %v3395_v51 = vadd.f32 %v3394_v21, %v3366_v15  ;;  %v3342_v25 = vadd.f32 %v7917_v41, %v3313_v54  ;;  %v3373_v46 = vpop.f32.mrf.mxu2 }
 0x2c5   : > { %v3487_v10 = vshrl.u32 %v3478_v37, 16  ;;  %v3424_v22 = vadd.f32 %v3423_v14, %v3395_v51  ;;  %v3490_v33 = vshll.u32 %v3478_v37, 16  ;;  %v3428_v8 = vpop.f32.mrf.mxu0  ;;  %v6927_v37 = vld [vmem:[#allocation9 + $0x88] sm:$0xff]  ;;  %v6936_v51 = vld [vmem:[#allocation9 + $0xd0] sm:$0xff] }
 0x2c6   : > { %5202 = vmatpush.bf16.msrb.mxu0 %v6927_v37  ;;  %5230 = vmatpush.bf16.msrb.mxu1 %v6936_v51  ;;  %v6918_v51 = vld [vmem:[#allocation9 + $0x40] sm:$0xff] }
 0x2c7   : > { %v3489_v50 = vrot.slane %v3487_v10, 7  ;;  %v3453_v45 = vadd.f32 %v3452_v17, %v3424_v22  ;;  %v3457_v10 = vpop.f32.mrf.mxu1  ;;  %v6920_v22 = vld [vmem:[#allocation9 + $0x50] sm:$0xff] }
 0x2c8   : > { %5172 = vmatpush.bf16.msrb.mxu3 %v6920_v22 }
 0x2c9   : > { %v3492_v6 = vor.u32 %v3490_v33, %v3489_v50  ;;  %v3493_v14 = vrot.slane %v3489_v50, 4  ;;  %v3471_v58 = vmax.f32 %v3453_v45, 0.0  ;;  %v3231_v50 = vadd.f32 %v7950_v4, %v7893_v24  ;;  %v6919_v33 = vld [vmem:[#allocation9 + $0x48] sm:$0xff] }
 0x2ca   : > { %v3397_v15 = vpop.f32.mrf.mxu3  ;;  %v3371_v45 = vadd.f32 %v3370_v16, %v3342_v25  ;;  %5203 = vmatpush.bf16.msrb.mxu0 %v6926_v42 }
 0x2cb   : > { %v3567_v17 = vsel %vm7689_vm6, %v3492_v6, %v3566_v12  ;;  %v3570_v52 = vsel %vm7695_vm7, %v3493_v14, %v3569_v20  ;;  %v3479_v9 = vpack.c.bf16 %v3471_v58, %v3471_v58  ;;  %v3398_v21 = vadd.f32 %v3397_v15, %v3369_v5  ;;  %v3575_v6 = vld [vmem:[#allocation2 + $0x14] sm:$0x1] }
 0x2cc   : > { %3568 = vst [vmem:[#allocation2 + $0x8] sm:$0xf] %v3567_v17  ;;  %v3260_v41 = vadd.f32 %v7923_v55, %v3231_v50  ;;  %v3316_v5 = vadd.f32 %v7919_v47, %v3287_v31  ;;  %5173 = vmatpush.bf16.msrb.mxu3 %v6919_v33  ;;  %v3578_v33 = vld [vmem:[#allocation2 + $0x18] sm:$0xf] }
 0x2cd   : > { %3571 = vst [vmem:[#allocation2 + $0xc] sm:$0x1] %v3570_v52  ;;  %v3495_v18 = vshrl.u32 %v3479_v9, 16  ;;  %v3427_v39 = vadd.f32 %v3426_v29, %v3398_v21  ;;  %v3498_v23 = vshll.u32 %v3479_v9, 16  ;;  %v6935_v29 = vld [vmem:[#allocation9 + $0xc8] sm:$0xff] }
 0x2ce   : > { %v3289_v15 = vadd.f32 %v7941_v63, %v3260_v41  ;;  %5231 = vmatpush.bf16.msrb.mxu1 %v6935_v29  ;;  %v3345_v37 = vadd.f32 %v7921_v48, %v3316_v5  ;;  %v6948_v63 = vld [vmem:[#allocation9 + $0x130] sm:$0xff]  ;;  %v3375_v48 = vpop.f32.mrf.mxu2  ;;  %v6325_v41 = vld [vmem:[#allocation4] sm:$0xf] }
 0x2cf   : > { %v3497_v44 = vrot.slane %v3495_v18, 7  ;;  %v3456_v19 = vadd.f32 %v3455_v38, %v3427_v39  ;;  %v3572_v38 = vld [vmem:[#allocation2 + $0x10] sm:$0xf]  ;;  %v3234_v18 = vadd.f32 %v7950_v4, %v7897_v30  ;;  %v3431_v39 = vpop.f32.mrf.mxu0  ;;  %v3460_v13 = vpop.f32.mrf.mxu1  ;;  %5255 = vmatpush.bf16.msrb.mxu2 %v6948_v63 }
 0x2d0   : > { %v3374_v42 = vadd.f32 %v3373_v46, %v3345_v37  ;;  %5174 = vmatpush.bf16.msrb.mxu3 %v6918_v51 }
 0x2d1   : > { %v3500_v60 = vor.u32 %v3498_v23, %v3497_v44  ;;  %v3501_v57 = vrot.slane %v3497_v44, 4  ;;  %v3472_v36 = vmax.f32 %v3456_v19, 0.0  ;;  %v3318_v19 = vadd.f32 %v7925_v53, %v3289_v15 }
 0x2d2   : > { %v3399_v14 = vpop.f32.mrf.mxu3  ;;  %5232 = vmatpush.bf16.msrb.mxu1 %v6934_v28 }
 0x2d3   : > { %v3573_v58 = vsel %vm7689_vm6, %v3500_v60, %v3572_v38  ;;  %v3576_v24 = vsel %vm7695_vm7, %v3501_v57, %v3575_v6  ;;  %v3480_v2 = vpack.c.bf16 %v3472_v36, %v3472_v36  ;;  %v3400_v54 = vadd.f32 %v3399_v14, %v3371_v45  ;;  %v3615_v16 = vld [vmem:[#allocation2 + $0x8] sm:$0xf]  ;;  %v3581_v57 = vld [vmem:[#allocation2 + $0x1c] sm:$0x1] }
 0x2d4   : > { %v3776_v12 = vld [vmem:[#allocation2 + $0x8] sm:$0xe]  ;;  %3574 = vst [vmem:[#allocation2 + $0x10] sm:$0xf] %v3573_v58  ;;  %v3777_v47 = vld [vmem:[#allocation2 + $0xc] sm:$0x1]  ;;  %v3263_v60 = vadd.f32 %v7929_v56, %v3234_v18 }
 0x2d5   : > { %v3854_v20 = vld [vmem:[#allocation2 + $0x8] sm:$0xf]  ;;  %v6300_v55 = vrot.slane %v3776_v12, 9  ;;  %3577 = vst [vmem:[#allocation2 + $0x14] sm:$0x1] %v3576_v24  ;;  %v3503_v17 = vshrl.u32 %v3480_v2, 16  ;;  %v3429_v9 = vadd.f32 %v3428_v8, %v3400_v54 }
 0x2d6   : > { %v3506_v52 = vshll.u32 %v3480_v2, 16  ;;  %v3812_v21 = vrot.slane %v3777_v47, 5  ;;  %3623 = vst [vmem:[#allocation4 + $0x24] sm:$0xf] %v3615_v16  ;;  %v3632_v31 = vld [vmem:[#allocation2 + $0x8] sm:$0xf]  ;;  %v3292_v54 = vadd.f32 %v7952_v7, %v3263_v60  ;;  %v3236_v7 = vadd.f32 %v7950_v4, %v7905_v32 }
 0x2d7   : > { %v3505_v22 = vrot.slane %v3503_v17, 7  ;;  %v3458_v25 = vadd.f32 %v3457_v10, %v3429_v9  ;;  %3862 = vst [vmem:[#allocation4 + $0xc] sm:$0xf] %v3854_v20  ;;  %v3633_v23 = vld [vmem:[#allocation2 + $0xc] sm:$0x1]  ;;  %v3661_v8 = vshrl.u32 %v3632_v31, 16  ;;  %v3347_v20 = vadd.f32 %v7931_v40, %v3318_v19  ;;  %v3433_v40 = vpop.f32.mrf.mxu0 }
 0x2d8   : > { %v3813_v44 = vsel %vm7249_vm2, %v6300_v55, %v3812_v21  ;;  %v3664_v30 = vshll.u32 %v3632_v31, 16  ;;  %v3670_v53 = vshll.u32 %v3633_v23, 16  ;;  %v6333_v58 = vld [vmem:[#allocation4 + $0x8] sm:$0xf]  ;;  %v3265_v4 = vadd.f32 %v7939_v62, %v3236_v7 }
 0x2d9   : > { %3847 = vst [vmem:[#allocation4 + $0x2c] sm:$0xf] %v3813_v44  ;;  %v3508_v50 = vor.u32 %v3506_v52, %v3505_v22  ;;  %v3509_v29 = vrot.slane %v3505_v22, 4  ;;  %v3473_v45 = vmax.f32 %v3458_v25, 0.0  ;;  %v3663_v10 = vrot.slane %v3661_v8, 4  ;;  %v6947_v18 = vld [vmem:[#allocation9 + $0x128] sm:$0xff] }
 0x2da   : > { %v3402_v36 = vpop.f32.mrf.mxu3  ;;  %v3666_v5 = vrot.slane %v3664_v30, 5  ;;  %v3672_v28 = vrot.slane %v3670_v53, 5  ;;  %v3321_v22 = vadd.f32 %v7933_v59, %v3292_v54  ;;  %5256 = vmatpush.bf16.msrb.mxu2 %v6947_v18  ;;  %v3587_v59 = vld [vmem:[#allocation2 + $0x24] sm:$0x1]  ;;  %v3294_v53 = vadd.f32 %v7956_v27, %v3265_v4 }
 0x2db   : > { %v3579_v46 = vsel %vm7689_vm6, %v3508_v50, %v3578_v33  ;;  %v3582_v38 = vsel %vm7695_vm7, %v3509_v29, %v3581_v57  ;;  %v3481_v6 = vpack.c.bf16 %v3473_v45, %v3473_v45  ;;  %v3403_v14 = vadd.f32 %v3402_v36, %v3374_v42  ;;  %v3855_v24 = vld [vmem:[#allocation2 + $0x10] sm:$0xf]  ;;  %v3584_v42 = vld [vmem:[#allocation2 + $0x20] sm:$0xf]  ;;  %v3378_v29 = vpop.f32.mrf.mxu2 }
 0x2dc   : > { %v3778_v2 = vld [vmem:[#allocation2 + $0x10] sm:$0xe]  ;;  %3580 = vst [vmem:[#allocation2 + $0x18] sm:$0xf] %v3579_v46  ;;  %v3667_v56 = vor.u32 %v3666_v5, %v3663_v10  ;;  %v3779_v12 = vld [vmem:[#allocation2 + $0x14] sm:$0x1] }
 0x2dd   : > { %v3616_v16 = vld [vmem:[#allocation2 + $0x10] sm:$0xf]  ;;  %3583 = vst [vmem:[#allocation2 + $0x1c] sm:$0x1] %v3582_v38  ;;  %v3511_v15 = vshrl.u32 %v3481_v6, 16  ;;  %v3432_v47 = vadd.f32 %v3431_v39, %v3403_v14  ;;  %v6301_v17 = vrot.slane %v3778_v2, 9  ;;  %v3376_v39 = vadd.f32 %v3375_v48, %v3347_v20 }
 0x2de   : > { %v6878_v55 = vld [vmem:[#allocation4 + $0x20] sm:$0xf0]  ;;  %v3514_v52 = vshll.u32 %v3481_v6, 16  ;;  %3863 = vst [vmem:[#allocation4 + $0x30] sm:$0xf] %v3855_v24  ;;  %v3668_v21 = vrot.slane %v3667_v56, 4 }
 0x2df   : > { %v6326_v9 = vor.u32 %v6878_v55, %v6325_v41  ;;  %v3513_v37 = vrot.slane %v3511_v15, 7  ;;  %v3461_v51 = vadd.f32 %v3460_v13, %v3432_v47  ;;  %3624 = vst [vmem:[#allocation4 + $0x48] sm:$0xf] %v3616_v16  ;;  %v3816_v31 = vrot.slane %v3779_v12, 5  ;;  %v3634_v23 = vld [vmem:[#allocation2 + $0x10] sm:$0xf]  ;;  %v3462_v13 = vpop.f32.mrf.mxu1 }
 0x2e0   : > { %v6879_v63 = vld [vmem:[#allocation4 + $0x28] sm:$0xf0]  ;;  %v3673_v44 = vsel %vm7268_vm5, %v3668_v21, %v3672_v28  ;;  %v3675_v50 = vshrl.u32 %v3634_v23, 16  ;;  %v3635_v62 = vld [vmem:[#allocation2 + $0x14] sm:$0x1]  ;;  %v3678_v14 = vshll.u32 %v3634_v23, 16 }
 0x2e1   : > { %5146 = vmatmul.bf16.vlgmr.msra.gmra.mxu2 %v6326_v9  ;;  %v6334_v25 = vor.u32 %v6879_v63, %v6333_v58  ;;  %v3516_v8 = vor.u32 %v3514_v52, %v3513_v37  ;;  %v3517_v19 = vrot.slane %v3513_v37, 4  ;;  %v3474_v30 = vmax.f32 %v3461_v51, 0.0  ;;  %3767 = vst [vmem:[#allocation4 + $0x28] sm:$0xf] %v3673_v44  ;;  %v6875_v57 = vld [vmem:[#allocation4 + $0xc] sm:$0xf] }
 0x2e2   : > { %v3817_v32 = vsel %vm7249_vm2, %v6301_v17, %v3816_v31  ;;  %v3404_v48 = vpop.f32.mrf.mxu3  ;;  %v6874_v46 = vld [vmem:[#allocation4 + $0x4] sm:$0xf]  ;;  %v3350_v58 = vadd.f32 %v7937_v61, %v3321_v22  ;;  %v6973_v20 = vld [vmem:[#allocation9 + $0x1f8] sm:$0xff]  ;;  %v3677_v15 = vrot.slane %v3675_v50, 4  ;;  %v3323_v9 = vadd.f32 %v7943_v0, %v3294_v53 }
 0x2e3   : > { %5204 = vmatmul.bf16.vlgmr.msrb.gmra.mxu0 %v6334_v25  ;;  %3848 = vst [vmem:[#allocation4 + $0x50] sm:$0xf] %v3817_v32  ;;  %v3585_v33 = vsel %vm7689_vm6, %v3516_v8, %v3584_v42  ;;  %v3588_v45 = vsel %vm7695_vm7, %v3517_v19, %v3587_v59  ;;  %v3482_v10 = vpack.c.bf16 %v3474_v30, %v3474_v30  ;;  %v3617_v36 = vld [vmem:[#allocation2 + $0x18] sm:$0xf]  ;;  %v3590_v21 = vld [vmem:[#allocation2 + $0x28] sm:$0xf] }
 0x2e4   : > { %v3405_v60 = vadd.f32 %v3404_v48, %v3376_v39  ;;  %v3780_v41 = vld [vmem:[#allocation2 + $0x18] sm:$0xe]  ;;  %3586 = vst [vmem:[#allocation2 + $0x20] sm:$0xf] %v3585_v33  ;;  %v3781_v38 = vld [vmem:[#allocation2 + $0x1c] sm:$0x1]  ;;  %v3379_v47 = vadd.f32 %v3378_v29, %v3350_v58  ;;  %5341 = vmatpush.bf16.msra.mxu1 %v6973_v20  ;;  %v3436_v39 = vpop.f32.mrf.mxu0 }
 0x2e5   : > { %v3856_v5 = vld [vmem:[#allocation2 + $0x18] sm:$0xf]  ;;  %v6302_v6 = vrot.slane %v3780_v41, 9  ;;  %3589 = vst [vmem:[#allocation2 + $0x24] sm:$0x1] %v3588_v45  ;;  %v3519_v24 = vshrl.u32 %v3482_v10, 16  ;;  %v3352_v41 = vadd.f32 %v7945_v3, %v3323_v9 }
 0x2e6   : > { %v3434_v2 = vadd.f32 %v3433_v40, %v3405_v60  ;;  %v6335_v54 = vld [vmem:[#allocation4 + $0x2c] sm:$0xf0]  ;;  %v3522_v56 = vshll.u32 %v3482_v10, 16  ;;  %3625 = vst [vmem:[#allocation4 + $0x6c] sm:$0xf] %v3617_v36  ;;  %v3820_v12 = vrot.slane %v3781_v38, 5 }
 0x2e7   : > { %v6338_v16 = vor.u32 %v6875_v57, %v6335_v54  ;;  %v3521_v55 = vrot.slane %v3519_v24, 7  ;;  %3864 = vst [vmem:[#allocation4 + $0x54] sm:$0xf] %v3856_v5  ;;  %v6946_v17 = vld [vmem:[#allocation9 + $0x120] sm:$0xff]  ;;  %v3637_v18 = vld [vmem:[#allocation2 + $0x1c] sm:$0x1]  ;;  %v3465_v45 = vpop.f32.mrf.mxu1  ;;  %v3380_v5 = vpop.f32.mrf.mxu2 }
 0x2e8   : > { %v3463_v27 = vadd.f32 %v3462_v13, %v3434_v2  ;;  %v3636_v52 = vld [vmem:[#allocation2 + $0x18] sm:$0xf]  ;;  %v3821_v28 = vsel %vm7249_vm2, %v6302_v6, %v3820_v12  ;;  %v3680_v7 = vrot.slane %v3678_v14, 5  ;;  %v3684_v37 = vshll.u32 %v3635_v62, 16  ;;  %v3593_v31 = vld [vmem:[#allocation2 + $0x2c] sm:$0x1]  ;;  %5257 = vmatpush.bf16.msrb.mxu2 %v6946_v17 }
 0x2e9   : > { %5233 = vmatmul.bf16.vlgmr.msrb.gmra.mxu1 %v6338_v16  ;;  %v6327_v61 = vld [vmem:[#allocation4 + $0x24] sm:$0xf0]  ;;  %v3524_v51 = vor.u32 %v3522_v56, %v3521_v55  ;;  %v3525_v63 = vrot.slane %v3521_v55, 4  ;;  %3849 = vst [vmem:[#allocation4 + $0x74] sm:$0xf] %v3821_v28  ;;  %v3689_v44 = vshrl.u32 %v3636_v52, 16 }
 0x2ea   : > { %v3475_v40 = vmax.f32 %v3463_v27, 0.0  ;;  %v6330_v22 = vor.u32 %v6874_v46, %v6327_v61  ;;  %v3407_v25 = vpop.f32.mrf.mxu3  ;;  %v3681_v0 = vor.u32 %v3680_v7, %v3677_v15  ;;  %v3692_v23 = vshll.u32 %v3636_v52, 16  ;;  %v6972_v19 = vld [vmem:[#allocation9 + $0x1f0] sm:$0xff]  ;;  %v6945_v42 = vld [vmem:[#allocation9 + $0x118] sm:$0xff]  ;;  %v6361_v48 = vld [vmem:[#allocation4 + $0x48] sm:$0xf] }
 0x2eb   : > { %v3698_v8 = vshll.u32 %v3637_v18, 16  ;;  %v6965_v30 = vld [vmem:[#allocation9 + $0x1b8] sm:$0xff]  ;;  %v3591_v32 = vsel %vm7689_vm6, %v3524_v51, %v3590_v21  ;;  %v3594_v4 = vsel %vm7695_vm7, %v3525_v63, %v3593_v31  ;;  %v3408_v59 = vadd.f32 %v3407_v25, %v3379_v47  ;;  %v3857_v50 = vld [vmem:[#allocation2 + $0x20] sm:$0xf]  ;;  %5342 = vmatpush.bf16.msra.mxu1 %v6972_v19  ;;  %v3599_v27 = vld [vmem:[#allocation2 + $0x34] sm:$0x1] }
 0x2ec   : > { %v3483_v13 = vpack.c.bf16 %v3475_v40, %v3475_v40  ;;  %5175 = vmatmul.bf16.vlgmr.msrb.gmra.mxu3 %v6330_v22  ;;  %v3618_v29 = vld [vmem:[#allocation2 + $0x20] sm:$0xf]  ;;  %3592 = vst [vmem:[#allocation2 + $0x28] sm:$0xf] %v3591_v32  ;;  %v3682_v10 = vrot.slane %v3681_v0, 4  ;;  %v3686_v60 = vrot.slane %v3684_v37, 5  ;;  %5312 = vmatpush.bf16.msra.mxu0 %v6965_v30  ;;  %v3381_v47 = vadd.f32 %v3380_v5, %v3352_v41 }
 0x2ed   : > { %v8025_v33 = vld [vmem:[#allocation2 + $0x20] sm:$0xe]  ;;  %v3691_v57 = vrot.slane %v3689_v44, 4  ;;  %v3694_v36 = vrot.slane %v3692_v23, 5  ;;  %3595 = vst [vmem:[#allocation2 + $0x2c] sm:$0x1] %v3594_v4  ;;  %v3437_v53 = vadd.f32 %v3436_v39, %v3408_v59  ;;  %5258 = vmatpush.bf16.msrb.mxu2 %v6945_v42  ;;  %v3438_v4 = vpop.f32.mrf.mxu0 }
 0x2ee   : > { %v3527_v62 = vshrl.u32 %v3483_v13, 16  ;;  %v6887_v46 = vld [vmem:[#allocation4 + $0x68] sm:$0xf0]  ;;  %v8028_v38 = vrot.slane %v3698_v8, 5  ;;  %v8030_v6 = vld [vmem:[#allocation2 + $0x8] sm:$0xf]  ;;  %v3687_v2 = vsel %vm7268_vm5, %v3682_v10, %v3686_v60 }
 0x2ef   : > { %v3530_v14 = vshll.u32 %v3483_v13, 16  ;;  %v6362_v58 = vor.u32 %v6887_v46, %v6361_v48  ;;  %v6369_v24 = vld [vmem:[#allocation4 + $0x50] sm:$0xf]  ;;  %3865 = vst [vmem:[#allocation4 + $0x78] sm:$0xf] %v3857_v50  ;;  %v3695_v54 = vor.u32 %v3694_v36, %v3691_v57  ;;  %v3466_v16 = vadd.f32 %v3465_v45, %v3437_v53  ;;  %v6957_v51 = vld [vmem:[#allocation9 + $0x178] sm:$0xff]  ;;  %v3467_v60 = vpop.f32.mrf.mxu1 }
 0x2f0   : > { %v3783_v3 = vld [vmem:[#allocation2 + $0x24] sm:$0x1]  ;;  %v3529_v56 = vrot.slane %v3527_v62, 7  ;;  %3768 = vst [vmem:[#allocation4 + $0x4c] sm:$0xf] %v3687_v2  ;;  %v6303_v12 = vrot.slane %v8025_v33, 9  ;;  %5283 = vmatpush.bf16.msra.mxu3 %v6957_v51 }
 0x2f1   : > { %v3824_v20 = vrot.slane %v3783_v3, 5  ;;  %v6971_v15 = vld [vmem:[#allocation9 + $0x1e8] sm:$0xff]  ;;  %v3596_v55 = vld [vmem:[#allocation2 + $0x30] sm:$0xf]  ;;  %5151 = vmatmul.bf16.gmra.mxu2 %v6362_v58  ;;  %v6888_v17 = vld [vmem:[#allocation4 + $0x70] sm:$0xf0] }
 0x2f2   : > { %v3696_v52 = vrot.slane %v3695_v54, 4  ;;  %3626 = vst [vmem:[#allocation4 + $0x90] sm:$0xf] %v3618_v29  ;;  %v6944_v9 = vld [vmem:[#allocation9 + $0x110] sm:$0xff]  ;;  %v3532_v21 = vor.u32 %v3530_v14, %v3529_v56  ;;  %v3533_v61 = vrot.slane %v3529_v56, 4  ;;  %v3476_v28 = vmax.f32 %v3466_v16, 0.0  ;;  %5343 = vmatpush.bf16.msra.mxu1 %v6971_v15  ;;  %v3409_v63 = vpop.f32.mrf.mxu3 }
 0x2f3   : > { %v6370_v18 = vor.u32 %v6888_v17, %v6369_v24  ;;  %v6964_v7 = vld [vmem:[#allocation9 + $0x1b0] sm:$0xff]  ;;  %5259 = vmatpush.bf16.msrb.mxu2 %v6944_v9  ;;  %v3887_v25 = vshrl.u32 %v8030_v6, 16  ;;  %v3410_v8 = vadd.f32 %v3409_v63, %v3381_v47  ;;  %v3784_v30 = vld [vmem:[#allocation2 + $0x28] sm:$0xe]  ;;  %v6963_v32 = vld [vmem:[#allocation9 + $0x1a8] sm:$0xff]  ;;  %v3825_v45 = vsel %vm7249_vm2, %v6303_v12, %v3824_v20 }
 0x2f4   : > { %v3638_v37 = vld [vmem:[#allocation2 + $0x20] sm:$0xf]  ;;  %v3701_v31 = vsel %vm7268_vm5, %v3696_v52, %v8028_v38  ;;  %v3639_v40 = vld [vmem:[#allocation2 + $0x24] sm:$0x1]  ;;  %v3597_v0 = vsel %vm7689_vm6, %v3532_v21, %v3596_v55  ;;  %v3600_v44 = vsel %vm7695_vm7, %v3533_v61, %v3599_v27  ;;  %v3484_v23 = vpack.c.bf16 %v3476_v28, %v3476_v28  ;;  %v3619_v42 = vld [vmem:[#allocation2 + $0x28] sm:$0xf]  ;;  %5313 = vmatpush.bf16.msra.mxu0 %v6964_v7 }
 0x2f5   : > { %v3703_v22 = vshrl.u32 %v3638_v37, 16  ;;  %v3706_v39 = vshll.u32 %v3638_v37, 16  ;;  %5209 = vmatmul.bf16.gmra.mxu0 %v6370_v18  ;;  %v6884_v19 = vld [vmem:[#allocation4 + $0x54] sm:$0xf]  ;;  %3598 = vst [vmem:[#allocation2 + $0x30] sm:$0xf] %v3597_v0  ;;  %v3439_v29 = vadd.f32 %v3438_v4, %v3410_v8 }
 0x2f6   : > { %v3785_v13 = vld [vmem:[#allocation2 + $0x2c] sm:$0x1]  ;;  %v6304_v59 = vrot.slane %v3784_v30, 9  ;;  %3601 = vst [vmem:[#allocation2 + $0x34] sm:$0x1] %v3600_v44  ;;  %v3535_v50 = vshrl.u32 %v3484_v23, 16 }
 0x2f7   : > { %v3705_v48 = vrot.slane %v3703_v22, 4  ;;  %v6371_v33 = vld [vmem:[#allocation4 + $0x74] sm:$0xf0]  ;;  %3769 = vst [vmem:[#allocation4 + $0x70] sm:$0xf] %v3701_v31  ;;  %v3828_v36 = vrot.slane %v3785_v13, 5  ;;  %v3468_v46 = vadd.f32 %v3467_v60, %v3439_v29 }
 0x2f8   : > { %v6956_v10 = vld [vmem:[#allocation9 + $0x170] sm:$0xff]  ;;  %v6374_v57 = vor.u32 %v6884_v19, %v6371_v33  ;;  %v3708_v5 = vrot.slane %v3706_v39, 5  ;;  %v3537_v62 = vrot.slane %v3535_v50, 7  ;;  %v3538_v53 = vshll.u32 %v3484_v23, 16  ;;  %3627 = vst [vmem:[#allocation4 + $0xb4] sm:$0xf] %v3619_v42  ;;  %5314 = vmatpush.bf16.msra.mxu0 %v6963_v32 }
 0x2f9   : > { %v3858_v41 = vld [vmem:[#allocation2 + $0x28] sm:$0xf]  ;;  %v3712_v38 = vshll.u32 %v3639_v40, 16  ;;  %v3602_v14 = vld [vmem:[#allocation2 + $0x38] sm:$0xf]  ;;  %v3829_v24 = vsel %vm7249_vm2, %v6304_v59, %v3828_v36  ;;  %v3477_v12 = vmax.f32 %v3468_v46, 0.0  ;;  %5284 = vmatpush.bf16.msra.mxu3 %v6956_v10 }
 0x2fa   : > { %v3605_v58 = vld [vmem:[#allocation2 + $0x3c] sm:$0x1]  ;;  %5238 = vmatmul.bf16.gmra.mxu1 %v6374_v57  ;;  %3850 = vst [vmem:[#allocation4 + $0x98] sm:$0xf] %v3825_v45  ;;  %v3640_v2 = vld [vmem:[#allocation2 + $0x28] sm:$0xf]  ;;  %v3709_v3 = vor.u32 %v3708_v5, %v3705_v48  ;;  %v3540_v56 = vor.u32 %v3538_v53, %v3537_v62 }
 0x2fb   : > { %v3641_v54 = vld [vmem:[#allocation2 + $0x2c] sm:$0x1]  ;;  %v3541_v16 = vrot.slane %v3537_v62, 4  ;;  %3851 = vst [vmem:[#allocation4 + $0xbc] sm:$0xf] %v3829_v24  ;;  %v3714_v20 = vrot.slane %v3712_v38, 5  ;;  %v3485_v21 = vpack.c.bf16 %v3477_v12, %v3477_v12 }
 0x2fc   : > { %v6970_v15 = vld [vmem:[#allocation9 + $0x1e0] sm:$0xff]  ;;  %3866 = vst [vmem:[#allocation4 + $0x9c] sm:$0xf] %v3858_v41  ;;  %v3710_v47 = vrot.slane %v3709_v3, 4  ;;  %v3717_v55 = vshrl.u32 %v3640_v2, 16  ;;  %v3720_v27 = vshll.u32 %v3640_v2, 16  ;;  %v3603_v52 = vsel %vm7689_vm6, %v3540_v56, %v3602_v14 }
 0x2fd   : > { %v3726_v17 = vshll.u32 %v3641_v54, 16  ;;  %v3606_v9 = vsel %vm7695_vm7, %v3541_v16, %v3605_v58  ;;  %v6883_v61 = vld [vmem:[#allocation4 + $0x4c] sm:$0xf]  ;;  %v3859_v28 = vld [vmem:[#allocation2 + $0x30] sm:$0xf]  ;;  %5344 = vmatpush.bf16.msra.mxu1 %v6970_v15  ;;  %v3890_v37 = vshll.u32 %v8030_v6, 16 }
 0x2fe   : > { %v3620_v18 = vld [vmem:[#allocation2 + $0x30] sm:$0xf]  ;;  %v6943_v7 = vld [vmem:[#allocation9 + $0x108] sm:$0xff]  ;;  %3604 = vst [vmem:[#allocation2 + $0x38] sm:$0xf] %v3603_v52  ;;  %v3715_v63 = vsel %vm7268_vm5, %v3710_v47, %v3714_v20  ;;  %v3719_v31 = vrot.slane %v3717_v55, 4 }
 0x2ff   : > { %v6397_v51 = vld [vmem:[#allocation4 + $0x90] sm:$0xf]  ;;  %v3722_v40 = vrot.slane %v3720_v27, 5  ;;  %v6962_v22 = vld [vmem:[#allocation9 + $0x1a0] sm:$0xff]  ;;  %v8056_v39 = vrot.slane %v3887_v25, 4  ;;  %v3543_v0 = vshrl.u32 %v3485_v21, 16  ;;  %5260 = vmatpush.bf16.msrb.mxu2 %v6943_v7 }
 0x300   : > { %3607 = vst [vmem:[#allocation2 + $0x3c] sm:$0x1] %v3606_v9  ;;  %v6363_v44 = vld [vmem:[#allocation4 + $0x6c] sm:$0xf0]  ;;  %v3728_v23 = vrot.slane %v3726_v17, 5  ;;  %5315 = vmatpush.bf16.msra.mxu0 %v6962_v22  ;;  %v6961_v32 = vld [vmem:[#allocation9 + $0x198] sm:$0xff] }
 0x301   : > { %v6366_v8 = vor.u32 %v6883_v61, %v6363_v44  ;;  %v6896_v19 = vld [vmem:[#allocation4 + $0xb0] sm:$0xf0]  ;;  %3867 = vst [vmem:[#allocation4 + $0xc0] sm:$0xf] %v3859_v28  ;;  %v3723_v42 = vor.u32 %v3722_v40, %v3719_v31  ;;  %v6955_v30 = vld [vmem:[#allocation9 + $0x168] sm:$0xff]  ;;  %v3545_v4 = vrot.slane %v3543_v0, 7 }
 0x302   : > { %v3546_v13 = vshll.u32 %v3485_v21, 16  ;;  %v6398_v59 = vor.u32 %v6896_v19, %v6397_v51  ;;  %v6405_v48 = vld [vmem:[#allocation4 + $0x98] sm:$0xf]  ;;  %3770 = vst [vmem:[#allocation4 + $0x94] sm:$0xf] %v3715_v63  ;;  %5285 = vmatpush.bf16.msra.mxu3 %v6955_v30  ;;  %v6954_v36 = vld [vmem:[#allocation9 + $0x160] sm:$0xff] }
 0x303   : > { %v3608_v6 = vld [vmem:[#allocation2 + $0x40] sm:$0xf]  ;;  %v3611_v25 = vld [vmem:[#allocation2 + $0x44] sm:$0x1]  ;;  %5180 = vmatmul.bf16.gmra.mxu3 %v6366_v8  ;;  %v6897_v50 = vld [vmem:[#allocation4 + $0xb8] sm:$0xf0] }
 0x304   : > { %v3724_v29 = vrot.slane %v3723_v42, 4  ;;  %3628 = vst [vmem:[#allocation4 + $0xd8] sm:$0xf] %v3620_v18  ;;  %v6969_v33 = vld [vmem:[#allocation9 + $0x1d8] sm:$0xff]  ;;  %v3548_v45 = vor.u32 %v3546_v13, %v3545_v4  ;;  %v3549_v10 = vrot.slane %v3545_v4, 4  ;;  %5156 = vmatmul.bf16.gmra.mxu2 %v6398_v59  ;;  %v6406_v60 = vor.u32 %v6897_v50, %v6405_v48  ;;  %v6942_v41 = vld [vmem:[#allocation9 + $0x100] sm:$0xff]  ;;  %5316 = vmatpush.bf16.msra.mxu0 %v6961_v32 }
 0x305   : > { %v3786_v57 = vld [vmem:[#allocation2 + $0x30] sm:$0xe]  ;;  %v8058_v5 = vrot.slane %v3890_v37, 5  ;;  %v3787_v53 = vld [vmem:[#allocation2 + $0x34] sm:$0x1]  ;;  %5345 = vmatpush.bf16.msra.mxu1 %v6969_v33  ;;  %v6960_v38 = vld [vmem:[#allocation9 + $0x190] sm:$0xff]  ;;  %5261 = vmatpush.bf16.msrb.mxu2 %v6942_v41 }
 0x306   : > { %v3729_v62 = vsel %vm7268_vm5, %v3724_v29, %v3728_v23  ;;  %v6305_v46 = vrot.slane %v3786_v57, 9  ;;  %v3642_v14 = vld [vmem:[#allocation2 + $0x30] sm:$0xf]  ;;  %v3609_v58 = vsel %vm7689_vm6, %v3548_v45, %v3608_v6  ;;  %v3612_v24 = vsel %vm7695_vm7, %v3549_v10, %v3611_v25  ;;  %5214 = vmatmul.bf16.gmra.mxu0 %v6406_v60  ;;  %v6893_v2 = vld [vmem:[#allocation4 + $0x9c] sm:$0xf]  ;;  %5286 = vmatpush.bf16.msra.mxu3 %v6954_v36  ;;  %v6959_v44 = vld [vmem:[#allocation9 + $0x188] sm:$0xff] }
 0x307   : > { %3771 = vst [vmem:[#allocation4 + $0xb8] sm:$0xf] %v3729_v62  ;;  %v3621_v54 = vld [vmem:[#allocation2 + $0x38] sm:$0xf]  ;;  %v3789_v56 = vld [vmem:[#allocation2 + $0x3c] sm:$0x1]  ;;  %v3893_v18 = vor.u32 %v8058_v5, %v8056_v39 }
 0x308   : > { %v3788_v3 = vld [vmem:[#allocation2 + $0x38] sm:$0xe]  ;;  %3610 = vst [vmem:[#allocation2 + $0x40] sm:$0xf] %v3609_v58  ;;  %v3832_v16 = vrot.slane %v3787_v53, 5  ;;  %v3836_v15 = vrot.slane %v3789_v56, 5  ;;  %5317 = vmatpush.bf16.msra.mxu0 %v6960_v38 }
 0x309   : > { %v6306_v12 = vrot.slane %v3788_v3, 9  ;;  %3613 = vst [vmem:[#allocation2 + $0x44] sm:$0x1] %v3612_v24  ;;  %v6407_v20 = vld [vmem:[#allocation4 + $0xbc] sm:$0xf0]  ;;  %v3731_v47 = vshrl.u32 %v3642_v14, 16 }
 0x30a   : > { %v6410_v43 = vor.u32 %v6893_v2, %v6407_v20  ;;  %3629 = vst [vmem:[#allocation4 + $0xfc] sm:$0xf] %v3621_v54  ;;  %v3833_v49 = vsel %vm7249_vm2, %v6305_v46, %v3832_v16  ;;  %v3860_v55 = vld [vmem:[#allocation2 + $0x38] sm:$0xf]  ;;  %v3643_v17 = vld [vmem:[#allocation2 + $0x34] sm:$0x1] }
 0x30b   : > { %v3837_v27 = vsel %vm7249_vm2, %v6306_v12, %v3836_v15  ;;  %3852 = vst [vmem:[#allocation4 + $0xe0] sm:$0xf] %v3833_v49  ;;  %v3871_v52 = vld [vmem:[#allocation2 + $0xc] sm:$0x1]  ;;  %v3644_v9 = vld [vmem:[#allocation2 + $0x38] sm:$0xf] }
 0x30c   : > { %5243 = vmatmul.bf16.gmra.mxu1 %v6410_v43  ;;  %3853 = vst [vmem:[#allocation4 + $0x104] sm:$0xf] %v3837_v27  ;;  %v3645_v21 = vld [vmem:[#allocation2 + $0x3c] sm:$0x1]  ;;  %v3872_v61 = vld [vmem:[#allocation2 + $0x10] sm:$0xf]  ;;  %5318 = vmatpush.bf16.msra.mxu0 %v6959_v44 }
 0x30d   : > { %v3873_v28 = vld [vmem:[#allocation2 + $0x14] sm:$0x1]  ;;  %v6892_v7 = vld [vmem:[#allocation4 + $0x94] sm:$0xf]  ;;  %3868 = vst [vmem:[#allocation4 + $0xe4] sm:$0xf] %v3860_v55 }
 0x30e   : > { %v3733_v37 = vrot.slane %v3731_v47, 4  ;;  %v3734_v51 = vshll.u32 %v3642_v14, 16  ;;  %v3745_v63 = vshrl.u32 %v3644_v9, 16  ;;  %v6399_v31 = vld [vmem:[#allocation4 + $0xb4] sm:$0xf0]  ;;  %v3740_v40 = vshll.u32 %v3643_v17, 16 }
 0x30f   : > { %v3748_v22 = vshll.u32 %v3644_v9, 16  ;;  %v6953_v0 = vld [vmem:[#allocation9 + $0x158] sm:$0xff]  ;;  %v3861_v8 = vld [vmem:[#allocation2 + $0x40] sm:$0xf]  ;;  %v3754_v30 = vshll.u32 %v3645_v21, 16  ;;  %v6402_v4 = vor.u32 %v6892_v7, %v6399_v31  ;;  %v3894_v59 = vrot.slane %v3893_v18, 4 }
 0x310   : > { %v6433_v23 = vld [vmem:[#allocation4 + $0xd8] sm:$0xf]  ;;  %v3736_v19 = vrot.slane %v3734_v51, 5  ;;  %v3747_v42 = vrot.slane %v3745_v63, 4  ;;  %3869 = vst [vmem:[#allocation4 + $0x108] sm:$0xf] %v3861_v8  ;;  %5287 = vmatpush.bf16.msra.mxu3 %v6953_v0 }
 0x311   : > { %v6968_v32 = vld [vmem:[#allocation9 + $0x1d0] sm:$0xff]  ;;  %v3750_v13 = vrot.slane %v3748_v22, 5  ;;  %v3896_v48 = vshll.u32 %v3871_v52, 16  ;;  %v6905_v6 = vld [vmem:[#allocation4 + $0xf8] sm:$0xf0]  ;;  %v3901_v50 = vshrl.u32 %v3872_v61, 16 }
 0x312   : > { %v6952_v39 = vld [vmem:[#allocation9 + $0x150] sm:$0xff]  ;;  %v3737_v25 = vor.u32 %v3736_v19, %v3733_v37  ;;  %5346 = vmatpush.bf16.msra.mxu1 %v6968_v32  ;;  %v3904_v29 = vshll.u32 %v3872_v61, 16  ;;  %v3910_v33 = vshll.u32 %v3873_v28, 16  ;;  %v6958_v45 = vld [vmem:[#allocation9 + $0x180] sm:$0xff]  ;;  %v6434_v10 = vor.u32 %v6905_v6, %v6433_v23  ;;  %v6981_v5 = vld [vmem:[#allocation9 + $0x238] sm:$0xff] }
 0x313   : > { %v6441_v60 = vld [vmem:[#allocation4 + $0xe0] sm:$0xf]  ;;  %v3742_v57 = vrot.slane %v3740_v40, 5  ;;  %v3751_v36 = vor.u32 %v3750_v13, %v3747_v42  ;;  %v3898_v41 = vrot.slane %v3896_v48, 5  ;;  %v6967_v62 = vld [vmem:[#allocation9 + $0x1c8] sm:$0xff]  ;;  %v3756_v38 = vrot.slane %v3754_v30, 5  ;;  %5185 = vmatmul.bf16.gmra.mxu3 %v6402_v4  ;;  %5319 = vmatpush.bf16.msra.mxu0 %v6958_v45 }
 0x314   : > { %v6906_v53 = vld [vmem:[#allocation4 + $0x100] sm:$0xf0]  ;;  %v3738_v46 = vrot.slane %v3737_v25, 4  ;;  %v3903_v14 = vrot.slane %v3901_v50, 4  ;;  %v3906_v58 = vrot.slane %v3904_v29, 5  ;;  %v3912_v3 = vrot.slane %v3910_v33, 5  ;;  %5161 = vmatmul.bf16.gmra.mxu2 %v6434_v10  ;;  %5288 = vmatpush.bf16.msra.mxu3 %v6952_v39 }
 0x315   : > { %v6442_v24 = vor.u32 %v6906_v53, %v6441_v60  ;;  %v3752_v2 = vrot.slane %v3751_v36, 4  ;;  %v3899_v54 = vsel %vm7268_vm5, %v3894_v59, %v3898_v41  ;;  %v4094_v56 = vld [vmem:[#allocation2 + $0x10] sm:$0xf]  ;;  %v6902_v16 = vld [vmem:[#allocation4 + $0xe4] sm:$0xf]  ;;  %v6951_v15 = vld [vmem:[#allocation9 + $0x148] sm:$0xff]  ;;  %6990 = vmatpush.bf16.msra.mxu2 %v6981_v5 }
 0x316   : > { %v3743_v12 = vsel %vm7268_vm5, %v3738_v46, %v3742_v57  ;;  %v3907_v20 = vor.u32 %v3906_v58, %v3903_v14  ;;  %4006 = vst [vmem:[#allocation4 + $0x10] sm:$0xf] %v3899_v54  ;;  %v4095_v47 = vld [vmem:[#allocation2 + $0x18] sm:$0xf]  ;;  %5347 = vmatpush.bf16.msra.mxu1 %v6967_v62  ;;  %v4110_v55 = vld [vmem:[#allocation2 + $0x10] sm:$0xf] }
 0x317   : > { %v6966_v43 = vld [vmem:[#allocation9 + $0x1c0] sm:$0xff]  ;;  %v3757_v49 = vsel %vm7268_vm5, %v3752_v2, %v3756_v38  ;;  %3772 = vst [vmem:[#allocation4 + $0xdc] sm:$0xf] %v3743_v12  ;;  %5219 = vmatmul.bf16.gmra.mxu0 %v6442_v24  ;;  %v4127_v21 = vshrl.u32 %v4110_v55, 16  ;;  %v4113_v18 = vld [vmem:[#allocation2 + $0x1c] sm:$0x1] }
 0x318   : > { %v4111_v27 = vld [vmem:[#allocation2 + $0x14] sm:$0x1]  ;;  %v6443_v17 = vld [vmem:[#allocation4 + $0x104] sm:$0xf0]  ;;  %3773 = vst [vmem:[#allocation4 + $0x100] sm:$0xf] %v3757_v49  ;;  %5289 = vmatpush.bf16.msra.mxu3 %v6951_v15 }
 0x319   : > { %v3908_v52 = vrot.slane %v3907_v20, 4  ;;  %v6950_v9 = vld [vmem:[#allocation9 + $0x140] sm:$0xff]  ;;  %v6446_v61 = vor.u32 %v6902_v16, %v6443_v17  ;;  %4102 = vst [vmem:[#allocation4 + $0x18] sm:$0xf] %v4094_v56  ;;  %v4129_v37 = vrot.slane %v4127_v21, 4  ;;  %v4130_v51 = vshll.u32 %v4110_v55, 16 }
 0x31a   : > { %v4112_v28 = vld [vmem:[#allocation2 + $0x18] sm:$0xf]  ;;  %4103 = vst [vmem:[#allocation4 + $0x3c] sm:$0xf] %v4095_v47  ;;  %v4136_v63 = vshll.u32 %v4111_v27, 16  ;;  %v6980_v31 = vld [vmem:[#allocation9 + $0x230] sm:$0xff]  ;;  %5348 = vmatpush.bf16.msra.mxu1 %v6966_v43 }
 0x31b   : > { %v3913_v7 = vsel %vm7268_vm5, %v3908_v52, %v3912_v3  ;;  %v4141_v40 = vshrl.u32 %v4112_v28, 16  ;;  %v4144_v22 = vshll.u32 %v4112_v28, 16  ;;  %v4150_v0 = vshll.u32 %v4113_v18, 16  ;;  %6991 = vmatpush.bf16.msra.mxu2 %v6980_v31  ;;  %v4014_v23 = vld [vmem:[#allocation2 + $0x8] sm:$0xe]  ;;  %v6979_v19 = vld [vmem:[#allocation9 + $0x228] sm:$0xff] }
 0x31c   : > { %4007 = vst [vmem:[#allocation4 + $0x34] sm:$0xf] %v3913_v7  ;;  %v4132_v44 = vrot.slane %v4130_v51, 5  ;;  %v4015_v8 = vld [vmem:[#allocation2 + $0xc] sm:$0x1]  ;;  %5248 = vmatmul.bf16.gmra.mxu1 %v6446_v61  ;;  %v6307_v32 = vrot.slane %v4014_v23, 9  ;;  %5290 = vmatpush.bf16.msra.mxu3 %v6950_v9 }
 0x31d   : > { %v4143_v42 = vrot.slane %v4141_v40, 4  ;;  %v4146_v30 = vrot.slane %v4144_v22, 5  ;;  %v4138_v13 = vrot.slane %v4136_v63, 5  ;;  %v4152_v39 = vrot.slane %v4150_v0, 5  ;;  %v4016_v59 = vld [vmem:[#allocation2 + $0x10] sm:$0xe] }
 0x31e   : > { %5370 = vmatpush.bf16.msrb.mxu1 %v6981_v5  ;;  %v4133_v4 = vor.u32 %v4132_v44, %v4129_v37  ;;  %v4017_v48 = vld [vmem:[#allocation2 + $0x14] sm:$0x1]  ;;  %v4048_v50 = vrot.slane %v4015_v8, 5  ;;  %v6308_v29 = vrot.slane %v4016_v59, 9  ;;  %v6901_v45 = vld [vmem:[#allocation4 + $0xdc] sm:$0xf] }
 0x31f   : > { %v6435_v6 = vld [vmem:[#allocation4 + $0xfc] sm:$0xf0]  ;;  %v4147_v25 = vor.u32 %v4146_v30, %v4143_v42  ;;  %v4052_v33 = vrot.slane %v4017_v48, 5  ;;  %v3874_v60 = vld [vmem:[#allocation2 + $0x18] sm:$0xf]  ;;  %6992 = vmatpush.bf16.msra.mxu2 %v6979_v19 }
 0x320   : > { %v4134_v10 = vrot.slane %v4133_v4, 4  ;;  %v6978_v57 = vld [vmem:[#allocation9 + $0x220] sm:$0xff]  ;;  %v6438_v36 = vor.u32 %v6901_v45, %v6435_v6  ;;  %v6341_v41 = vld [vmem:[#allocation4 + $0x10] sm:$0xf]  ;;  %v4049_v53 = vsel %vm7249_vm2, %v6307_v32, %v4048_v50  ;;  %v3875_v46 = vld [vmem:[#allocation2 + $0x1c] sm:$0x1] }
 0x321   : > { %v6881_v5 = vld [vmem:[#allocation4 + $0x38] sm:$0xf0]  ;;  %v4148_v62 = vrot.slane %v4147_v25, 4  ;;  %v3915_v38 = vshrl.u32 %v3874_v60, 16  ;;  %v4053_v24 = vsel %vm7249_vm2, %v6308_v29, %v4052_v33  ;;  %4086 = vst [vmem:[#allocation4 + $0x14] sm:$0xf] %v4049_v53 }
 0x322   : > { %5371 = vmatpush.bf16.msrb.mxu1 %v6980_v31  ;;  %v4139_v58 = vsel %vm7268_vm5, %v4134_v10, %v4138_v13  ;;  %v3876_v2 = vld [vmem:[#allocation2 + $0x20] sm:$0xf]  ;;  %v6349_v54 = vld [vmem:[#allocation4 + $0x18] sm:$0xf]  ;;  %v3877_v56 = vld [vmem:[#allocation2 + $0x24] sm:$0x1] }
 0x323   : > { %v6880_v14 = vld [vmem:[#allocation4 + $0x30] sm:$0xf0]  ;;  %v4153_v3 = vsel %vm7268_vm5, %v4148_v62, %v4152_v39  ;;  %4246 = vst [vmem:[#allocation4 + $0x1c] sm:$0xf] %v4139_v58  ;;  %v3917_v16 = vrot.slane %v3915_v38, 4  ;;  %v3918_v12 = vshll.u32 %v3874_v60, 16  ;;  %6993 = vmatpush.bf16.msra.mxu2 %v6978_v57  ;;  %5190 = vmatmul.bf16.gmra.mxu3 %v6438_v36  ;;  %v6350_v17 = vor.u32 %v6881_v5, %v6349_v54 }
 0x324   : > { %v6342_v20 = vor.u32 %v6880_v14, %v6341_v41  ;;  %4247 = vst [vmem:[#allocation4 + $0x40] sm:$0xf] %v4153_v3  ;;  %v3924_v15 = vshll.u32 %v3875_v46, 16  ;;  %v3929_v47 = vshrl.u32 %v3876_v2, 16  ;;  %v3932_v43 = vshll.u32 %v3876_v2, 16  ;;  %v6977_v59 = vld [vmem:[#allocation9 + $0x218] sm:$0xff] }
 0x325   : > { %4087 = vst [vmem:[#allocation4 + $0x38] sm:$0xf] %v4053_v24  ;;  %v3920_v49 = vrot.slane %v3918_v12, 5  ;;  %v3938_v55 = vshll.u32 %v3877_v56, 16  ;;  %v4096_v27 = vld [vmem:[#allocation2 + $0x20] sm:$0xf] }
 0x326   : > { %5372 = vmatpush.bf16.msrb.mxu1 %v6979_v19  ;;  %5262 = vmatmul.bf16.vlgmr.msrb.gmra.mxu2 %v6342_v20  ;;  %v3926_v52 = vrot.slane %v3924_v15, 5  ;;  %v3931_v9 = vrot.slane %v3929_v47, 4  ;;  %v3934_v21 = vrot.slane %v3932_v43, 5  ;;  %v4097_v61 = vld [vmem:[#allocation2 + $0x28] sm:$0xf] }
 0x327   : > { %v3921_v28 = vor.u32 %v3920_v49, %v3917_v16  ;;  %4104 = vst [vmem:[#allocation4 + $0x60] sm:$0xf] %v4096_v27  ;;  %v4114_v18 = vld [vmem:[#allocation2 + $0x20] sm:$0xf]  ;;  %v4115_v7 = vld [vmem:[#allocation2 + $0x24] sm:$0x1]  ;;  %5320 = vmatmul.bf16.vlgmr.msra.gmra.mxu0 %v6350_v17  ;;  %6994 = vmatpush.bf16.msra.mxu2 %v6977_v59 }
 0x328   : > { %v3935_v37 = vor.u32 %v3934_v21, %v3931_v9  ;;  %4105 = vst [vmem:[#allocation4 + $0x84] sm:$0xf] %v4097_v61  ;;  %v4116_v51 = vld [vmem:[#allocation2 + $0x28] sm:$0xf]  ;;  %v4117_v63 = vld [vmem:[#allocation2 + $0x2c] sm:$0x1] }
 0x329   : > { %v3922_v31 = vrot.slane %v3921_v28, 4  ;;  %v3940_v40 = vrot.slane %v3938_v55, 5  ;;  %v4155_v22 = vshrl.u32 %v4114_v18, 16  ;;  %v4158_v0 = vshll.u32 %v4114_v18, 16  ;;  %v4018_v33 = vld [vmem:[#allocation2 + $0x18] sm:$0xe] }
 0x32a   : > { %5373 = vmatpush.bf16.msrb.mxu1 %v6978_v57  ;;  %v6877_v44 = vld [vmem:[#allocation4 + $0x1c] sm:$0xf]  ;;  %v3936_v23 = vrot.slane %v3935_v37, 4  ;;  %v4164_v8 = vshll.u32 %v4115_v7, 16  ;;  %v4169_v19 = vshrl.u32 %v4116_v51, 16  ;;  %v4172_v42 = vshll.u32 %v4116_v51, 16 }
 0x32b   : > { %v6351_v30 = vld [vmem:[#allocation4 + $0x3c] sm:$0xf0]  ;;  %v3927_v32 = vsel %vm7268_vm5, %v3922_v31, %v3926_v52  ;;  %v4157_v4 = vrot.slane %v4155_v22, 4  ;;  %v4160_v13 = vrot.slane %v4158_v0, 5  ;;  %v4178_v39 = vshll.u32 %v4117_v63, 16  ;;  %v6976_v2 = vld [vmem:[#allocation9 + $0x210] sm:$0xff] }
 0x32c   : > { %v6354_v48 = vor.u32 %v6877_v44, %v6351_v30  ;;  %v3941_v6 = vsel %vm7268_vm5, %v3936_v23, %v3940_v40  ;;  %4008 = vst [vmem:[#allocation4 + $0x58] sm:$0xf] %v3927_v32  ;;  %v4171_v25 = vrot.slane %v4169_v19, 4  ;;  %v4174_v50 = vrot.slane %v4172_v42, 5  ;;  %v6343_v45 = vld [vmem:[#allocation4 + $0x34] sm:$0xf0]  ;;  %6995 = vmatpush.bf16.msra.mxu2 %v6976_v2 }
 0x32d   : > { %4009 = vst [vmem:[#allocation4 + $0x7c] sm:$0xf] %v3941_v6  ;;  %v4161_v29 = vor.u32 %v4160_v13, %v4157_v4  ;;  %v4019_v60 = vld [vmem:[#allocation2 + $0x1c] sm:$0x1]  ;;  %v4020_v57 = vld [vmem:[#allocation2 + $0x20] sm:$0xe] }
 0x32e   : > { %5374 = vmatpush.bf16.msrb.mxu1 %v6977_v59  ;;  %v4175_v10 = vor.u32 %v4174_v50, %v4171_v25  ;;  %v4166_v41 = vrot.slane %v4164_v8, 5  ;;  %v4180_v5 = vrot.slane %v4178_v39, 5  ;;  %v4021_v62 = vld [vmem:[#allocation2 + $0x24] sm:$0x1]  ;;  %v6309_v53 = vrot.slane %v4018_v33, 9  ;;  %v6975_v33 = vld [vmem:[#allocation9 + $0x208] sm:$0xff] }
 0x32f   : > { %5349 = vmatmul.bf16.vlgmr.msra.gmra.mxu1 %v6354_v48  ;;  %v4162_v36 = vrot.slane %v4161_v29, 4  ;;  %v6876_v46 = vld [vmem:[#allocation4 + $0x14] sm:$0xf]  ;;  %v4056_v14 = vrot.slane %v4019_v60, 5  ;;  %v6310_v58 = vrot.slane %v4020_v57, 9  ;;  %v4060_v56 = vrot.slane %v4021_v62, 5 }
 0x330   : > { %v4176_v38 = vrot.slane %v4175_v10, 4  ;;  %v3878_v24 = vld [vmem:[#allocation2 + $0x28] sm:$0xf]  ;;  %v6890_v54 = vld [vmem:[#allocation4 + $0x80] sm:$0xf0]  ;;  %v6346_v27 = vor.u32 %v6876_v46, %v6343_v45  ;;  %6996 = vmatpush.bf16.msra.mxu2 %v6975_v33 }
 0x331   : > { %v4167_v3 = vsel %vm7268_vm5, %v4162_v36, %v4166_v41  ;;  %v3879_v16 = vld [vmem:[#allocation2 + $0x2c] sm:$0x1]  ;;  %v3880_v12 = vld [vmem:[#allocation2 + $0x30] sm:$0xf]  ;;  %v3943_v20 = vshrl.u32 %v3878_v24, 16  ;;  %v4057_v47 = vsel %vm7249_vm2, %v6309_v53, %v4056_v14  ;;  %v3946_v49 = vshll.u32 %v3878_v24, 16 }
 0x332   : > { %v4181_v15 = vsel %vm7268_vm5, %v4176_v38, %v4180_v5  ;;  %4248 = vst [vmem:[#allocation4 + $0x64] sm:$0xf] %v4167_v3  ;;  %v3881_v43 = vld [vmem:[#allocation2 + $0x34] sm:$0x1]  ;;  %v3952_v55 = vshll.u32 %v3879_v16, 16  ;;  %5375 = vmatpush.bf16.msrb.mxu1 %v6976_v2  ;;  %v4061_v9 = vsel %vm7249_vm2, %v6310_v58, %v4060_v56  ;;  %v3957_v61 = vshrl.u32 %v3880_v12, 16 }
 0x333   : > { %v6377_v17 = vld [vmem:[#allocation4 + $0x58] sm:$0xf]  ;;  %v6385_v52 = vld [vmem:[#allocation4 + $0x60] sm:$0xf]  ;;  %4249 = vst [vmem:[#allocation4 + $0x88] sm:$0xf] %v4181_v15  ;;  %5291 = vmatmul.bf16.vlgmr.msra.gmra.mxu3 %v6346_v27 }
 0x334   : > { %v3945_v21 = vrot.slane %v3943_v20, 4  ;;  %v6889_v28 = vld [vmem:[#allocation4 + $0x78] sm:$0xf0]  ;;  %4088 = vst [vmem:[#allocation4 + $0x5c] sm:$0xf] %v4057_v47  ;;  %v3948_v18 = vrot.slane %v3946_v49, 5  ;;  %v6386_v31 = vor.u32 %v6890_v54, %v6385_v52 }
 0x335   : > { %v6378_v7 = vor.u32 %v6889_v28, %v6377_v17  ;;  %4089 = vst [vmem:[#allocation4 + $0x80] sm:$0xf] %v4061_v9  ;;  %v3954_v37 = vrot.slane %v3952_v55, 5  ;;  %v3959_v51 = vrot.slane %v3957_v61, 4  ;;  %v3960_v63 = vshll.u32 %v3880_v12, 16  ;;  %v6974_v27 = vld [vmem:[#allocation9 + $0x200] sm:$0xff] }
 0x336   : > { %v3949_v40 = vor.u32 %v3948_v18, %v3945_v21  ;;  %v4098_v22 = vld [vmem:[#allocation2 + $0x30] sm:$0xf]  ;;  %v4099_v0 = vld [vmem:[#allocation2 + $0x38] sm:$0xf]  ;;  %v3966_v8 = vshll.u32 %v3881_v43, 16  ;;  %5376 = vmatpush.bf16.msrb.mxu1 %v6975_v33  ;;  %6997 = vmatpush.bf16.msra.mxu2 %v6974_v27 }
 0x337   : > { %v4118_v44 = vld [vmem:[#allocation2 + $0x30] sm:$0xf]  ;;  %5267 = vmatmul.bf16.gmra.mxu2 %v6378_v7  ;;  %v3962_v23 = vrot.slane %v3960_v63, 5  ;;  %4106 = vst [vmem:[#allocation4 + $0xa8] sm:$0xf] %v4098_v22  ;;  %5325 = vmatmul.bf16.gmra.mxu0 %v6386_v31 }
 0x338   : > { %v4119_v19 = vld [vmem:[#allocation2 + $0x34] sm:$0x1]  ;;  %v3950_v42 = vrot.slane %v3949_v40, 4  ;;  %4107 = vst [vmem:[#allocation4 + $0xcc] sm:$0xf] %v4099_v0  ;;  %v4183_v32 = vshrl.u32 %v4118_v44, 16 }
 0x339   : > { %v4120_v30 = vld [vmem:[#allocation2 + $0x38] sm:$0xf]  ;;  %v6886_v4 = vld [vmem:[#allocation4 + $0x64] sm:$0xf]  ;;  %v3963_v13 = vor.u32 %v3962_v23, %v3959_v51  ;;  %v4121_v39 = vld [vmem:[#allocation2 + $0x3c] sm:$0x1] }
 0x33a   : > { %v4186_v59 = vshll.u32 %v4118_v44, 16  ;;  %v6387_v48 = vld [vmem:[#allocation4 + $0x84] sm:$0xf0]  ;;  %v3955_v6 = vsel %vm7268_vm5, %v3950_v42, %v3954_v37  ;;  %v4185_v25 = vrot.slane %v4183_v32, 4  ;;  %v4197_v50 = vshrl.u32 %v4120_v30, 16  ;;  %5377 = vmatpush.bf16.msrb.mxu1 %v6974_v27 }
 0x33b   : > { %v4200_v29 = vshll.u32 %v4120_v30, 16  ;;  %v3964_v45 = vrot.slane %v3963_v13, 4  ;;  %v3968_v10 = vrot.slane %v3966_v8, 5  ;;  %4010 = vst [vmem:[#allocation4 + $0xa0] sm:$0xf] %v3955_v6  ;;  %v4192_v57 = vshll.u32 %v4119_v19, 16 }
 0x33c   : > { %v4188_v60 = vrot.slane %v4186_v59, 5  ;;  %v6390_v36 = vor.u32 %v6886_v4, %v6387_v48  ;;  %v4199_v41 = vrot.slane %v4197_v50, 4  ;;  %v4206_v62 = vshll.u32 %v4121_v39, 16  ;;  %v4022_v38 = vld [vmem:[#allocation2 + $0x28] sm:$0xe] }
 0x33d   : > { %v4202_v5 = vrot.slane %v4200_v29, 5  ;;  %v3969_v53 = vsel %vm7268_vm5, %v3964_v45, %v3968_v10  ;;  %v4023_v14 = vld [vmem:[#allocation2 + $0x2c] sm:$0x1]  ;;  %v4024_v58 = vld [vmem:[#allocation2 + $0x30] sm:$0xe]  ;;  %v6311_v54 = vrot.slane %v4022_v38, 9 }
 0x33e   : > { %v4189_v46 = vor.u32 %v4188_v60, %v4185_v25  ;;  %v6379_v24 = vld [vmem:[#allocation4 + $0x7c] sm:$0xf0]  ;;  %4011 = vst [vmem:[#allocation4 + $0xc4] sm:$0xf] %v3969_v53  ;;  %v4194_v56 = vrot.slane %v4192_v57, 5  ;;  %v4208_v16 = vrot.slane %v4206_v62, 5 }
 0x33f   : > { %5354 = vmatmul.bf16.gmra.mxu1 %v6390_v36  ;;  %v4203_v2 = vor.u32 %v4202_v5, %v4199_v41  ;;  %v4025_v12 = vld [vmem:[#allocation2 + $0x34] sm:$0x1]  ;;  %v4064_v20 = vrot.slane %v4023_v14, 5  ;;  %v6885_v15 = vld [vmem:[#allocation4 + $0x5c] sm:$0xf]  ;;  %v6312_v43 = vrot.slane %v4024_v58, 9 }
 0x340   : > { %v4190_v3 = vrot.slane %v4189_v46, 4  ;;  %v4068_v49 = vrot.slane %v4025_v12, 5  ;;  %v3882_v55 = vld [vmem:[#allocation2 + $0x38] sm:$0xf]  ;;  %v6899_v17 = vld [vmem:[#allocation4 + $0xc8] sm:$0xf0]  ;;  %v6382_v63 = vor.u32 %v6885_v15, %v6379_v24 }
 0x341   : > { %v4204_v47 = vrot.slane %v4203_v2, 4  ;;  %v4065_v9 = vsel %vm7249_vm2, %v6311_v54, %v4064_v20  ;;  %v3883_v21 = vld [vmem:[#allocation2 + $0x3c] sm:$0x1]  ;;  %v3884_v61 = vld [vmem:[#allocation2 + $0x40] sm:$0xf]  ;;  %v3971_v37 = vshrl.u32 %v3882_v55, 16 }
 0x342   : > { %v4195_v52 = vsel %vm7268_vm5, %v4190_v3, %v4194_v56  ;;  %v4069_v18 = vsel %vm7249_vm2, %v6312_v43, %v4068_v49  ;;  %v3885_v7 = vld [vmem:[#allocation2 + $0x44] sm:$0x1]  ;;  %v3974_v51 = vshll.u32 %v3882_v55, 16  ;;  %v6413_v31 = vld [vmem:[#allocation4 + $0xa0] sm:$0xf]  ;;  %v3980_v22 = vshll.u32 %v3883_v21, 16 }
 0x343   : > { %v4209_v28 = vsel %vm7268_vm5, %v4204_v47, %v4208_v16  ;;  %4250 = vst [vmem:[#allocation4 + $0xac] sm:$0xf] %v4195_v52  ;;  %v6421_v40 = vld [vmem:[#allocation4 + $0xa8] sm:$0xf]  ;;  %v3985_v0 = vshrl.u32 %v3884_v61, 16  ;;  %v3988_v44 = vshll.u32 %v3884_v61, 16  ;;  %5296 = vmatmul.bf16.gmra.mxu3 %v6382_v63 }
 0x344   : > { %4251 = vst [vmem:[#allocation4 + $0xd0] sm:$0xf] %v4209_v28  ;;  %v3973_v23 = vrot.slane %v3971_v37, 4  ;;  %v3976_v8 = vrot.slane %v3974_v51, 5  ;;  %v4100_v19 = vld [vmem:[#allocation2 + $0x40] sm:$0xf]  ;;  %v6422_v13 = vor.u32 %v6899_v17, %v6421_v40 }
 0x345   : > { %4090 = vst [vmem:[#allocation4 + $0xa4] sm:$0xf] %v4065_v9  ;;  %v6898_v42 = vld [vmem:[#allocation4 + $0xc0] sm:$0xf0]  ;;  %v3987_v30 = vrot.slane %v3985_v0, 4  ;;  %v3994_v32 = vshll.u32 %v3885_v7, 16 }
 0x346   : > { %4091 = vst [vmem:[#allocation4 + $0xc8] sm:$0xf] %v4069_v18  ;;  %v6414_v4 = vor.u32 %v6898_v42, %v6413_v31  ;;  %v3977_v39 = vor.u32 %v3976_v8, %v3973_v23  ;;  %v3990_v59 = vrot.slane %v3988_v44, 5  ;;  %v3982_v48 = vrot.slane %v3980_v22, 5  ;;  %v4122_v6 = vld [vmem:[#allocation2 + $0x40] sm:$0xf] }
 0x347   : > { %4108 = vst [vmem:[#allocation4 + $0xf0] sm:$0xf] %v4100_v19  ;;  %v4123_v25 = vld [vmem:[#allocation2 + $0x44] sm:$0x1]  ;;  %5330 = vmatmul.bf16.gmra.mxu0 %v6422_v13  ;;  %v4211_v33 = vshrl.u32 %v4122_v6, 16  ;;  %v4214_v45 = vshll.u32 %v4122_v6, 16 }
 0x348   : > { %5272 = vmatmul.bf16.gmra.mxu2 %v6414_v4  ;;  %v3978_v50 = vrot.slane %v3977_v39, 4  ;;  %v3991_v29 = vor.u32 %v3990_v59, %v3987_v30  ;;  %v4026_v10 = vld [vmem:[#allocation2 + $0x38] sm:$0xe]  ;;  %v3996_v60 = vrot.slane %v3994_v32, 5  ;;  %v4220_v57 = vshll.u32 %v4123_v25, 16 }
 0x349   : > { %v4027_v36 = vld [vmem:[#allocation2 + $0x3c] sm:$0x1]  ;;  %v6313_v41 = vrot.slane %v4026_v10, 9  ;;  %v4213_v46 = vrot.slane %v4211_v33, 4  ;;  %v4216_v38 = vrot.slane %v4214_v45, 5 }
 0x34a   : > { %v3983_v62 = vsel %vm7268_vm5, %v3978_v50, %v3982_v48  ;;  %v3992_v53 = vrot.slane %v3991_v29, 4  ;;  %v6895_v14 = vld [vmem:[#allocation4 + $0xac] sm:$0xf]  ;;  %v4072_v58 = vrot.slane %v4027_v36, 5  ;;  %v4028_v3 = vld [vmem:[#allocation2 + $0x40] sm:$0xe] }
 0x34b   : > { %v6423_v5 = vld [vmem:[#allocation4 + $0xcc] sm:$0xf0]  ;;  %4012 = vst [vmem:[#allocation4 + $0xe8] sm:$0xf] %v3983_v62  ;;  %v4217_v54 = vor.u32 %v4216_v38, %v4213_v46  ;;  %v4029_v56 = vld [vmem:[#allocation2 + $0x44] sm:$0x1] }
 0x34c   : > { %v6426_v24 = vor.u32 %v6895_v14, %v6423_v5  ;;  %v3997_v2 = vsel %vm7268_vm5, %v3992_v53, %v3996_v60  ;;  %v4073_v16 = vsel %vm7249_vm2, %v6313_v41, %v4072_v58  ;;  %v6314_v12 = vrot.slane %v4028_v3, 9  ;;  %v4258_v49 = vld [vmem:[#allocation2 + $0x20] sm:$0xe]  ;;  %v4259_v27 = vld [vmem:[#allocation2 + $0x24] sm:$0x1] }
 0x34d   : > { %4013 = vst [vmem:[#allocation4 + $0x10c] sm:$0xf] %v3997_v2  ;;  %v4076_v20 = vrot.slane %v4029_v56, 5  ;;  %v6415_v15 = vld [vmem:[#allocation4 + $0xc4] sm:$0xf0]  ;;  %v4218_v47 = vrot.slane %v4217_v54, 4 }
 0x34e   : > { %v4222_v43 = vrot.slane %v4220_v57, 5  ;;  %4092 = vst [vmem:[#allocation4 + $0xec] sm:$0xf] %v4073_v16  ;;  %v4260_v17 = vld [vmem:[#allocation2 + $0x28] sm:$0xe]  ;;  %v6317_v21 = vrot.slane %v4258_v49, 9 }
 0x34f   : > { %5359 = vmatmul.bf16.gmra.mxu1 %v6426_v24  ;;  %v4077_v55 = vsel %vm7249_vm2, %v6314_v12, %v4076_v20  ;;  %v4261_v52 = vld [vmem:[#allocation2 + $0x2c] sm:$0x1]  ;;  %v4296_v61 = vrot.slane %v4259_v27, 5  ;;  %v6318_v28 = vrot.slane %v4260_v17, 9  ;;  %v6894_v18 = vld [vmem:[#allocation4 + $0xa4] sm:$0xf] }
 0x350   : > { %v4223_v9 = vsel %vm7268_vm5, %v4218_v47, %v4222_v43  ;;  %4093 = vst [vmem:[#allocation4 + $0x110] sm:$0xf] %v4077_v55  ;;  %v6908_v7 = vld [vmem:[#allocation4 + $0x110] sm:$0xf0]  ;;  %v4300_v37 = vrot.slane %v4261_v52, 5  ;;  %v6418_v22 = vor.u32 %v6894_v18, %v6415_v15 }
 0x351   : > { %4252 = vst [vmem:[#allocation4 + $0xf4] sm:$0xf] %v4223_v9  ;;  %v6457_v51 = vld [vmem:[#allocation4 + $0xf0] sm:$0xf]  ;;  %v4297_v63 = vsel %vm7249_vm2, %v6317_v21, %v4296_v61  ;;  %v4254_v31 = vld [vmem:[#allocation2 + $0x10] sm:$0xe] }
 0x352   : > { %v4255_v40 = vld [vmem:[#allocation2 + $0x14] sm:$0x1]  ;;  %v4301_v0 = vsel %vm7249_vm2, %v6318_v28, %v4300_v37  ;;  %4328 = vst [vmem:[#allocation4 + $0x68] sm:$0xf] %v4297_v63  ;;  %v4256_v26 = vld [vmem:[#allocation2 + $0x18] sm:$0xe]  ;;  %v6458_v39 = vor.u32 %v6908_v7, %v6457_v51 }
 0x353   : > { %v4257_v44 = vld [vmem:[#allocation2 + $0x1c] sm:$0x1]  ;;  %4329 = vst [vmem:[#allocation4 + $0x8c] sm:$0xf] %v4301_v0  ;;  %v6315_v8 = vrot.slane %v4254_v31, 9  ;;  %v4288_v19 = vrot.slane %v4255_v40, 5  ;;  %5301 = vmatmul.bf16.gmra.mxu3 %v6418_v22 }
 0x354   : > { %v6907_v23 = vld [vmem:[#allocation4 + $0x108] sm:$0xf0]  ;;  %v6449_v42 = vld [vmem:[#allocation4 + $0xe8] sm:$0xf]  ;;  %v6316_v30 = vrot.slane %v4256_v26, 9  ;;  %v4292_v32 = vrot.slane %v4257_v44, 5 }
 0x355   : > { %v4262_v4 = vld [vmem:[#allocation2 + $0x30] sm:$0xe]  ;;  %v6450_v13 = vor.u32 %v6907_v23, %v6449_v42  ;;  %v4289_v59 = vsel %vm7249_vm2, %v6315_v8, %v4288_v19  ;;  %v4263_v48 = vld [vmem:[#allocation2 + $0x34] sm:$0x1]  ;;  %v4264_v6 = vld [vmem:[#allocation2 + $0x38] sm:$0xe] }
 0x356   : > { %v4265_v25 = vld [vmem:[#allocation2 + $0x3c] sm:$0x1]  ;;  %v4293_v50 = vsel %vm7249_vm2, %v6316_v30, %v4292_v32  ;;  %4326 = vst [vmem:[#allocation4 + $0x20] sm:$0xf] %v4289_v59  ;;  %v6319_v29 = vrot.slane %v4262_v4, 9  ;;  %v4304_v33 = vrot.slane %v4263_v48, 5 }
 0x357   : > { %5335 = vmatmul.bf16.gmra.mxu0 %v6458_v39  ;;  %4327 = vst [vmem:[#allocation4 + $0x44] sm:$0xf] %v4293_v50  ;;  %v6320_v45 = vrot.slane %v4264_v6, 9  ;;  %v4308_v10 = vrot.slane %v4265_v25, 5  ;;  %v6459_v57 = vld [vmem:[#allocation4 + $0x114] sm:$0xf0] }
 0x358   : > { %5277 = vmatmul.bf16.gmra.mxu2 %v6450_v13  ;;  %v6904_v60 = vld [vmem:[#allocation4 + $0xf4] sm:$0xf]  ;;  %v4305_v36 = vsel %vm7249_vm2, %v6319_v29, %v4304_v33  ;;  %v6451_v62 = vld [vmem:[#allocation4 + $0x10c] sm:$0xf0]  ;;  %v6903_v53 = vld [vmem:[#allocation4 + $0xec] sm:$0xf] }
 0x359   : > { %v4309_v41 = vsel %vm7249_vm2, %v6320_v45, %v4308_v10  ;;  %4330 = vst [vmem:[#allocation4 + $0xb0] sm:$0xf] %v4305_v36  ;;  %v6462_v5 = vor.u32 %v6904_v60, %v6459_v57  ;;  %v6454_v46 = vor.u32 %v6903_v53, %v6451_v62  ;;  %v4266_v14 = vld [vmem:[#allocation2 + $0x40] sm:$0xe]  ;;  %v4267_v58 = vld [vmem:[#allocation2 + $0x44] sm:$0x1] }
 0x35a   : > { %4331 = vst [vmem:[#allocation4 + $0xd4] sm:$0xf] %v4309_v41  ;;  %v6891_v38 = vld [vmem:[#allocation4 + $0x88] sm:$0xf0]  ;;  %v6321_v24 = vrot.slane %v4266_v14, 9  ;;  %v4312_v2 = vrot.slane %v4267_v58, 5 }
 0x35b   : > { %v6393_v54 = vld [vmem:[#allocation4 + $0x68] sm:$0xf]  ;;  %v8139_v43 = vld [vmem:[%s8262_s7] ss:$0 sm:$0xff]  ;;  %v6909_v44 = vld [vmem:[#allocation4 + $0x118] sm:$0xf0] }
 0x35c   : > { %v6394_v3 = vor.u32 %v6891_v38, %v6393_v54  ;;  %v4313_v56 = vsel %vm7249_vm2, %v6321_v24, %v4312_v2  ;;  %v5532_v14 = vld [vmem:[%s8151_s25] sm:$0xff] }
 0x35d   : > { %4332 = vst [vmem:[#allocation4 + $0xf8] sm:$0xf] %v4313_v56  ;;  %v6357_v15 = vld [vmem:[#allocation4 + $0x20] sm:$0xf]  ;;  %5542 = vperm.xlu1 %7039, %v5532_v14  }
 0x35e   : > { %v6882_v12 = vld [vmem:[#allocation4 + $0x40] sm:$0xf0] }
 0x35f   : > { %5364 = vmatmul.bf16.gmra.mxu1 %v6462_v5  ;;  %v6358_v47 = vor.u32 %v6882_v12, %v6357_v15 }
 0x360   : > { %v5205_v17 = vpop.f32.mrf.mxu0  ;;  %v6429_v21 = vld [vmem:[#allocation4 + $0xb0] sm:$0xf] }
 0x361   : > { %v6900_v52 = vld [vmem:[#allocation4 + $0xd0] sm:$0xf0] }
 0x362   : > { %v6430_v28 = vor.u32 %v6900_v52, %v6429_v21  ;;  %v5533_v52 = vld [vmem:[%s8151_s25 + $0x8] sm:$0xff] }
 0x363   : > { %5306 = vmatmul.bf16.gmra.mxu3 %v6454_v46  ;;  %5547 = vperm.xlu2 %7040, %v5533_v52  }
 0x364   : > { %v5147_v16 = vpop.f32.mrf.mxu2  ;;  %v6465_v26 = vld [vmem:[#allocation4 + $0xf8] sm:$0xf] }
 0x365   : > { %v5148_v55 = vadd.f32 %v8139_v43, %v5147_v16  ;;  %v6466_v23 = vor.u32 %v6909_v44, %v6465_v26 }
 0x366   : > { %v5234_v20 = vpop.f32.mrf.mxu1 }
 0x368   : > { %5383 = vmatmul.bf16.vlgmr.msra.gmra.mxu2 %v6394_v3  ;;  %v5207_v31 = vpop.f32.mrf.mxu0 }
 0x36c   : > { %v5149_v49 = vpop.f32.mrf.mxu2 }
 0x36d   : > { %v5150_v7 = vadd.f32 %v8139_v43, %v5149_v49 }
 0x36e   : > { %v5236_v27 = vpop.f32.mrf.mxu1 }
 0x36f   : > { %5378 = vmatmul.bf16.vlgmr.msrb.gmra.mxu1 %v6358_v47  ;;  %v5176_v1 = vpop.f32.mrf.mxu3 }
 0x370   : > { %v5177_v9 = vadd.f32 %v5176_v1, %v5148_v55 }
 0x372   : > { %v5206_v61 = vadd.f32 %v5205_v17, %v5177_v9  ;;  %v5210_v42 = vpop.f32.mrf.mxu0 }
 0x374   : > { %v5152_v18 = vpop.f32.mrf.mxu2  ;;  %v8143_v32 = vadd.f32 %v5234_v20, %v5206_v61 }
 0x375   : > { %v5153_v13 = vadd.f32 %v8139_v43, %v5152_v18 }
 0x377   : > { %v5239_v37 = vpop.f32.mrf.mxu1  ;;  %v5178_v51 = vpop.f32.mrf.mxu3 }
 0x378   : > { %5388 = vmatmul.bf16.gmra.mxu2 %v6430_v28  ;;  %v5179_v63 = vadd.f32 %v5178_v51, %v5150_v7 }
 0x37a   : > { %v5208_v40 = vadd.f32 %v5207_v31, %v5179_v63  ;;  %v5212_v25 = vpop.f32.mrf.mxu0 }
 0x37c   : > { %v5154_v22 = vpop.f32.mrf.mxu2  ;;  %v5237_v6 = vadd.f32 %v5236_v27, %v5208_v40 }
 0x37d   : > { %v5155_v33 = vadd.f32 %v8139_v43, %v5154_v22 }
 0x37f   : > { %v5241_v0 = vpop.f32.mrf.mxu1 }
 0x383   : > { %v5215_v36 = vpop.f32.mrf.mxu0 }
 0x386   : > { %v5181_v8 = vpop.f32.mrf.mxu3 }
 0x387   : > { %v5157_v19 = vpop.f32.mrf.mxu2  ;;  %v5182_v48 = vadd.f32 %v5181_v8, %v5153_v13 }
 0x388   : > { %5393 = vmatmul.bf16.gmra.mxu2 %v6466_v23  ;;  %v5158_v5 = vadd.f32 %v8139_v43, %v5157_v19 }
 0x389   : > { %v5244_v30 = vpop.f32.mrf.mxu1  ;;  %v5211_v50 = vadd.f32 %v5210_v42, %v5182_v48 }
 0x38b   : > { %v5240_v57 = vadd.f32 %v5239_v37, %v5211_v50  ;;  %v5217_v2 = vpop.f32.mrf.mxu0 }
 0x38e   : > { %v5183_v4 = vpop.f32.mrf.mxu3 }
 0x38f   : > { %v5159_v39 = vpop.f32.mrf.mxu2  ;;  %v5184_v60 = vadd.f32 %v5183_v4, %v5155_v33 }
 0x390   : > { %v5160_v54 = vadd.f32 %v8139_v43, %v5159_v39 }
 0x391   : > { %v5246_v59 = vpop.f32.mrf.mxu1  ;;  %v5213_v41 = vadd.f32 %v5212_v25, %v5184_v60 }
 0x393   : > { %v5242_v58 = vadd.f32 %v5241_v0, %v5213_v41 }
 0x394   : > { %v5220_v55 = vpop.f32.mrf.mxu0 }
 0x396   : > { %v5186_v29 = vpop.f32.mrf.mxu3 }
 0x397   : > { %v5162_v45 = vpop.f32.mrf.mxu2  ;;  %v5187_v38 = vadd.f32 %v5186_v29, %v5158_v5 }
 0x398   : > { %v5163_v47 = vadd.f32 %v8139_v43, %v5162_v45 }
 0x399   : > { %v5249_v10 = vpop.f32.mrf.mxu1  ;;  %v5216_v24 = vadd.f32 %v5215_v36, %v5187_v38 }
 0x39b   : > { %v8156_v12 = vadd.f32 %v5244_v30, %v5216_v24 }
 0x39c   : > { %v5222_v63 = vpop.f32.mrf.mxu0 }
 0x39e   : > { %v5188_v53 = vpop.f32.mrf.mxu3 }
 0x39f   : > { %v5164_v62 = vpop.f32.mrf.mxu2  ;;  %v5189_v56 = vadd.f32 %v5188_v53, %v5160_v54 }
 0x3a0   : > { %v5165_v28 = vadd.f32 %v8139_v43, %v5164_v62 }
 0x3a1   : > { %v5251_v46 = vpop.f32.mrf.mxu1  ;;  %v5218_v15 = vadd.f32 %v5217_v2, %v5189_v56 }
 0x3a3   : > { %v8160_v9 = vadd.f32 %v5246_v59, %v5218_v15 }
 0x3a4   : > { %v5321_v44 = vpop.f32.mrf.mxu0 }
 0x3a6   : > { %v5191_v20 = vpop.f32.mrf.mxu3 }
 0x3a7   : > { %v5192_v17 = vadd.f32 %v5191_v20, %v5163_v47 }
 0x3a9   : > { %v5263_v3 = vpop.f32.mrf.mxu2  ;;  %v5221_v61 = vadd.f32 %v5220_v55, %v5192_v17 }
 0x3aa   : > { %v5264_v29 = vadd.f32 %v5263_v3, %v8143_v32  ;;  %v7045_v32 = vld [vmem:[%s8263_s8] ss:$0 sm:$0xff] }
 0x3ab   : > { %v8163_v51 = vadd.f32 %v5249_v10, %v5221_v61 }
 0x3ac   : > { %v5350_v16 = vpop.f32.mrf.mxu1  ;;  %v5323_v30 = vpop.f32.mrf.mxu0 }
 0x3ae   : > { %v5193_v21 = vpop.f32.mrf.mxu3 }
 0x3af   : > { %v5194_v7 = vadd.f32 %v5193_v21, %v5165_v28 }
 0x3b1   : > { %v5265_v49 = vpop.f32.mrf.mxu2  ;;  %v5223_v31 = vadd.f32 %v5222_v63, %v5194_v7 }
 0x3b2   : > { %v5266_v27 = vadd.f32 %v5265_v49, %v5237_v6 }
 0x3b3   : > { %v8165_v26 = vadd.f32 %v5251_v46, %v5223_v31  ;;  %v8288_v31 = vld [vmem:[#allocation13_spill] sm:$0xff] }
 0x3b4   : > { %v5352_v1 = vpop.f32.mrf.mxu1  ;;  %v5326_v48 = vpop.f32.mrf.mxu0 }
 0x3b6   : > { %v5292_v40 = vpop.f32.mrf.mxu3 }
 0x3b7   : > { %v5293_v45 = vadd.f32 %v5292_v40, %v5264_v29 }
 0x3b9   : > { %v5322_v5 = vadd.f32 %v5321_v44, %v5293_v45 }
 0x3ba   : > { %v5268_v18 = vpop.f32.mrf.mxu2 }
 0x3bb   : > { %v5269_v33 = vadd.f32 %v5268_v18, %v5240_v57  ;;  %v5351_v24 = vadd.f32 %v5350_v16, %v5322_v5 }
 0x3bc   : > { %v5355_v37 = vpop.f32.mrf.mxu1  ;;  %v5328_v41 = vpop.f32.mrf.mxu0 }
 0x3be   : > { %v5294_v23 = vpop.f32.mrf.mxu3 }
 0x3bf   : > { %v5295_v42 = vadd.f32 %v5294_v23, %v5266_v27  ;;  %v8289_v23 = vld [vmem:[#allocation14_spill] sm:$0xff] }
 0x3c1   : > { %v5324_v4 = vadd.f32 %v5323_v30, %v5295_v42 }
 0x3c2   : > { %v5270_v22 = vpop.f32.mrf.mxu2 }
 0x3c3   : > { %v5353_v59 = vadd.f32 %v5352_v1, %v5324_v4  ;;  %v5271_v53 = vadd.f32 %v5270_v22, %v5242_v58 }
 0x3c4   : > { %v5357_v0 = vpop.f32.mrf.mxu1  ;;  %v5331_v47 = vpop.f32.mrf.mxu0 }
 0x3c6   : > { %v5297_v39 = vpop.f32.mrf.mxu3 }
 0x3c7   : > { %v5298_v10 = vadd.f32 %v5297_v39, %v5269_v33 }
 0x3c9   : > { %v5327_v62 = vadd.f32 %v5326_v48, %v5298_v10  ;;  %v8290_v48 = vld [vmem:[#allocation15_spill] sm:$0xff] }
 0x3cb   : > { %v5273_v8 = vpop.f32.mrf.mxu2  ;;  %v5356_v14 = vadd.f32 %v5355_v37, %v5327_v62 }
 0x3cc   : > { %v5360_v19 = vpop.f32.mrf.mxu1  ;;  %v5274_v58 = vadd.f32 %v5273_v8, %v8156_v12  ;;  %v5333_v7 = vpop.f32.mrf.mxu0 }
 0x3ce   : > { %v5299_v50 = vpop.f32.mrf.mxu3 }
 0x3cf   : > { %v5300_v38 = vadd.f32 %v5299_v50, %v5271_v53  ;;  %v8291_v53 = vld [vmem:[#allocation16_spill] sm:$0xff] }
 0x3d1   : > { %v5329_v57 = vadd.f32 %v5328_v41, %v5300_v38 }
 0x3d3   : > { %v5275_v43 = vpop.f32.mrf.mxu2  ;;  %v5358_v16 = vadd.f32 %v5357_v0, %v5329_v57 }
 0x3d4   : > { %v5362_v13 = vpop.f32.mrf.mxu1 }
 0x3d6   : > { %v5302_v46 = vpop.f32.mrf.mxu3 }
 0x3d7   : > { %v5303_v27 = vadd.f32 %v5302_v46, %v5274_v58 }
 0x3d9   : > { %v5332_v61 = vadd.f32 %v5331_v47, %v5303_v27 }
 0x3db   : > { %v5278_v6 = vpop.f32.mrf.mxu2  ;;  %v5361_v12 = vadd.f32 %v5360_v19, %v5332_v61 }
 0x3dc   : > { %v8167_v25 = vpop.f32.mrf.mxu1  ;;  %v5279_v42 = vadd.f32 %v5278_v6, %v8163_v51 }
 0x3de   : > { %v5304_v17 = vpop.f32.mrf.mxu3 }
 0x3e3   : > { %v5280_v60 = vpop.f32.mrf.mxu2 }
 0x3e4   : > { %v8170_v36 = vpop.f32.mrf.mxu1  ;;  %v5281_v33 = vadd.f32 %v5280_v60, %v8165_v26  ;;  %v8189_v60 = vpop.permute.xlu1 %5542 }
 0x3e6   : > { %v5307_v0 = vpop.f32.mrf.mxu3 }
 0x3e7   : > { %v5308_v4 = vadd.f32 %v5307_v0, %v5279_v42  ;;  %v5464_v0 = vld [vmem:[%s8265_s10 + $0x8] sm:$0xff] }
 0x3eb   : > { %v5384_v2 = vpop.f32.mrf.mxu2 }
 0x3ec   : > { %v5379_v54 = vpop.f32.mrf.mxu1  ;;  %v5385_v56 = vadd.f32 %v5384_v2, %v5356_v14  ;;  %v8292_v2 = vld [vmem:[#allocation17_spill] sm:$0xff] }
 0x3ed   : > { %v5380_v20 = vadd.f32 %v5379_v54, %v5351_v24 }
 0x3ee   : > { %v5409_v3 = vadd.f32 %v5385_v56, %v7725_v34  ;;  %v5276_v34 = vadd.f32 %v5275_v43, %v8160_v9  ;;  %v5336_v43 = vpop.f32.mrf.mxu0  ;;  %v5309_v29 = vpop.f32.mrf.mxu3  ;;  %v7046_v56 = vld [vmem:[#allocation6] ss:$0 sm:$0xff] }
 0x3ef   : > { %v5407_v15 = vadd.f32 %v5380_v20, %v7681_v35  ;;  %v5337_v19 = vadd.f32 %v5336_v43, %v5308_v4  ;;  %v5310_v10 = vadd.f32 %v5309_v29, %v5281_v33  ;;  %v5466_v43 = vld [vmem:[%s8265_s10 + $0x18] sm:$0xff] }
 0x3f0   : > { %v5421_v49 = vmul.f32 %v7045_v32, %v5409_v3  ;;  %v5305_v37 = vadd.f32 %v5304_v17, %v5276_v34 }
 0x3f1   : > { %v5419_v55 = vmul.f32 %v7045_v32, %v5407_v15  ;;  %v5366_v51 = vadd.f32 %v8167_v25, %v5337_v19  ;;  %v8191_v25 = vpop.permute.xlu2 %5547 }
 0x3f2   : > { %5431 = vadd.xlane.f32.xlu0 %v5421_v49  ;;  %v5334_v44 = vadd.f32 %v5333_v7, %v5305_v37 }
 0x3f3   : > { %5427 = vadd.xlane.f32.xlu1 %v5419_v55  ;;  %v5386_v1 = vpop.f32.mrf.mxu2 }
 0x3f4   : > { %v5387_v52 = vadd.f32 %v5386_v1, %v5358_v16  ;;  %v5381_v21 = vpop.f32.mrf.mxu1  ;;  %v5363_v9 = vadd.f32 %v5362_v13, %v5334_v44 }
 0x3f5   : > { %v5382_v18 = vadd.f32 %v5381_v21, %v5353_v59 }
 0x3f6   : > { %v5410_v28 = vadd.f32 %v5387_v52, %v7742_v11  ;;  %v5338_v5 = vpop.f32.mrf.mxu0 }
 0x3f7   : > { %v5408_v40 = vadd.f32 %v5382_v18, %v8288_v31  ;;  %v5339_v62 = vadd.f32 %v5338_v5, %v5310_v10  ;;  %v5536_v5 = vld [vmem:[%s8266_s11] sm:$0xff] }
 0x3f8   : > { %v5422_v35 = vmul.f32 %v7045_v32, %v5410_v28  ;;  %v5534_v28 = vld [vmem:[%s8151_s25 + $0x10] sm:$0xff] }
 0x3f9   : > { %v5420_v30 = vmul.f32 %v7045_v32, %v5408_v40  ;;  %v5368_v38 = vadd.f32 %v8170_v36, %v5339_v62  ;;  %v5470_v62 = vld [vmem:[%s8265_s10 + $0x38] sm:$0xff] }
 0x3fa   : > { %5433 = vadd.xlane.f32.xlu2 %v5422_v35 }
 0x3fb   : > { %v5389_v63 = vpop.f32.mrf.mxu2 }
 0x3fc   : > { %v5390_v22 = vadd.f32 %v5389_v63, %v5361_v12  ;;  %v5535_v63 = vld [vmem:[%s8151_s25 + $0x18] sm:$0xff] }
 0x3fe   : > { %v5411_v8 = vadd.f32 %v5390_v22, %v8289_v23  ;;  %v5463_v22 = vld [vmem:[%s8265_s10] sm:$0xff]  ;;  %v5465_v23 = vld [vmem:[%s8265_s10 + $0x10] sm:$0xff] }
 0x400   : > { %v5423_v11 = vmul.f32 %v7045_v32, %v5411_v8 }
 0x402   : > { %5429 = vadd.xlane.f32.xlu2 %v5420_v30  ;;  %5435 = vadd.xlane.f32.xlu1 %v5423_v11 }
 0x403   : > { %v5391_v39 = vpop.f32.mrf.mxu2 }
 0x404   : > { %v5392_v59 = vadd.f32 %v5391_v39, %v5363_v9 }
 0x406   : > { %v5412_v50 = vadd.f32 %v5392_v59, %v8290_v48  ;;  %v5467_v48 = vld [vmem:[%s8265_s10 + $0x20] sm:$0xff] }
 0x408   : > { %v5424_v45 = vmul.f32 %v7045_v32, %v5412_v50 }
 0x40a   : > { %5437 = vadd.xlane.f32.xlu2 %v5424_v45  ;;  %v5468_v45 = vld [vmem:[%s8265_s10 + $0x28] sm:$0xff] }
 0x40b   : > { %v5394_v6 = vpop.f32.mrf.mxu2 }
 0x40c   : > { %v5395_v41 = vadd.f32 %v5394_v6, %v5366_v51  ;;  %v5469_v51 = vld [vmem:[%s8265_s10 + $0x30] sm:$0xff] }
 0x40e   : > { %v5413_v13 = vadd.f32 %v5395_v41, %v8291_v53  ;;  %v5537_v41 = vld [vmem:[%s8266_s11 + $0x8] sm:$0xff] }
 0x410   : > { %v5425_v46 = vmul.f32 %v7045_v32, %v5413_v13 }
 0x412   : > { %5439 = vadd.xlane.f32.xlu0 %v5425_v46 }
 0x413   : > { %v5396_v14 = vpop.f32.mrf.mxu2 }
 0x414   : > { %v5397_v24 = vadd.f32 %v5396_v14, %v5368_v38  ;;  %v5538_v14 = vld [vmem:[%s8266_s11 + $0x10] sm:$0xff] }
 0x416   : > { %v5414_v54 = vadd.f32 %v5397_v24, %v8292_v2  ;;  %v5561_v2 = vmul.f32 %v8191_v25, %v5537_v41 }
 0x418   : > { %v5426_v26 = vmul.f32 %v7045_v32, %v5414_v54  ;;  %v5560_v54 = vmul.f32 %v8189_v60, %v5536_v5  ;;  %v5576_v60 = vlaneseq }
 0x41a   : > { %5441 = vadd.xlane.f32.xlu1 %v5426_v26 }
 0x465   : > { %v5432_v20 = vpop.xlane.xlu0 %5431 }
 0x466   : > { %v5428_v57 = vpop.xlane.xlu1 %5427  ;;  %v5449_v3 = vadd.f32 %v7046_v56, %v5432_v20 }
 0x467   : > { %v5447_v15 = vadd.f32 %v7046_v56, %v5428_v57 }
 0x468   : > { %v5457_v47 = vmax.f32 %v5449_v3, 0.0  ;;  %v5539_v3 = vld [vmem:[%s8266_s11 + $0x18] sm:$0xff] }
 0x469   : > { %v5455_v58 = vmax.f32 %v5447_v15, 0.0  ;;  %v5564_v15 = vadd.f32 %v5561_v2, %v5560_v54 }
 0x46a   : > { %5483 = vperm.xlu1 %7039, %v5457_v47  }
 0x46b   : > { %5473 = vperm.xlu2 %7040, %v5455_v58  }
 0x46d   : > { %v5434_v36 = vpop.xlane.xlu2 %5433 }
 0x46e   : > { %v5450_v49 = vadd.f32 %v7046_v56, %v5434_v36 }
 0x470   : > { %v5458_v55 = vmax.f32 %v5450_v49, 0.0 }
 0x473   : > { %5488 = vperm.xlu2 %7040, %v5458_v55  }
 0x475   : > { %v5430_v32 = vpop.xlane.xlu2 %5429  ;;  %v5436_v27 = vpop.xlane.xlu1 %5435 }
 0x476   : > { %v5448_v16 = vadd.f32 %v7046_v56, %v5430_v32  ;;  %v5451_v17 = vadd.f32 %v7046_v56, %v5436_v27 }
 0x478   : > { %v5456_v1 = vmax.f32 %v5448_v16, 0.0  ;;  %v5459_v52 = vmax.f32 %v5451_v17, 0.0 }
 0x47a   : > { %5478 = vperm.xlu0 %7041, %v5456_v1   ;;  %5493 = vperm.xlu1 %7039, %v5459_v52  }
 0x47d   : > { %v5438_v21 = vpop.xlane.xlu2 %5437 }
 0x47e   : > { %v5452_v61 = vadd.f32 %v7046_v56, %v5438_v21 }
 0x480   : > { %v5460_v34 = vmax.f32 %v5452_v61, 0.0  ;;  %v5577_v61 = vand.u32 127, %v5576_v60 }
 0x482   : > { %5498 = vperm.xlu2 %7040, %v5460_v34   ;;  %5552 = vperm.xlu1 %7039, %v5534_v28   ;;  %vm5578_vm2 = vcmp.ge.s32.totalorder %v5577_v61, 32  ;;  %vm5579_vm5 = vcmp.lt.s32.totalorder %v5577_v61, 42 }
 0x483   : > { %vm8236_vm8 = vmand %vm5578_vm2, %vm5579_vm5 }
 0x485   : > { %v5440_v18 = vpop.xlane.xlu0 %5439 }
 0x486   : > { %v5453_v35 = vadd.f32 %v7046_v56, %v5440_v18 }
 0x488   : > { %v5461_v7 = vmax.f32 %v5453_v35, 0.0  ;;  %v5574_v35 = vld [vmem:[%s8267_s12] sm:$0x1] }
 0x48a   : > { %5503 = vperm.xlu0 %7041, %v5461_v7  }
 0x48d   : > { %v5442_v37 = vpop.xlane.xlu1 %5441 }
 0x48e   : > { %v5454_v12 = vadd.f32 %v7046_v56, %v5442_v37 }
 0x490   : > { %v5462_v31 = vmax.f32 %v5454_v12, 0.0 }
 0x492   : > { %5557 = vperm.xlu0 %7041, %v5535_v63   ;;  %5508 = vperm.xlu2 %7040, %v5462_v31  }
 0x4c5   : > { %v5474_v40 = vpop.permute.xlu2 %5473 }
 0x4c6   : > { %v5511_v30 = vmul.f32 %v5474_v40, %v5463_v22 }
 0x4cd   : > { %v5489_v44 = vpop.permute.xlu2 %5488 }
 0x4ce   : > { %v5514_v59 = vmul.f32 %v5489_v44, %v5466_v43 }
 0x4dc   : > { %v5484_v8 = vpop.permute.xlu1 %5483  ;;  %v5499_v19 = vpop.permute.xlu2 %5498 }
 0x4dd   : > { %v5513_v4 = vmul.f32 %v5484_v8, %v5465_v23  ;;  %v5516_v6 = vmul.f32 %v5499_v19, %v5468_v45 }
 0x4ec   : > { %v5479_v42 = vpop.permute.xlu0 %5478  ;;  %v5494_v50 = vpop.permute.xlu1 %5493 }
 0x4ed   : > { %v5512_v11 = vmul.f32 %v5479_v42, %v5464_v0  ;;  %v5515_v33 = vmul.f32 %v5494_v50, %v5467_v48  ;;  %v5509_v53 = vpop.permute.xlu2 %5508 }
 0x4ee   : > { %v5518_v26 = vmul.f32 %v5509_v53, %v5470_v62 }
 0x4ef   : > { %v5519_v9 = vadd.f32 %v5512_v11, %v5511_v30 }
 0x4f1   : > { %v5520_v39 = vadd.f32 %v5519_v9, %v5513_v4 }
 0x4f3   : > { %v5521_v29 = vadd.f32 %v5520_v39, %v5514_v59 }
 0x4f4   : > { %v5553_v24 = vpop.permute.xlu1 %5552 }
 0x4f5   : > { %v5522_v10 = vadd.f32 %v5521_v29, %v5515_v33  ;;  %v5562_v20 = vmul.f32 %v5553_v24, %v5538_v14 }
 0x4f7   : > { %v5523_v38 = vadd.f32 %v5522_v10, %v5516_v6  ;;  %v5565_v36 = vadd.f32 %v5564_v15, %v5562_v20 }
 0x4fc   : > { %v5504_v13 = vpop.permute.xlu0 %5503 }
 0x4fd   : > { %v5517_v46 = vmul.f32 %v5504_v13, %v5469_v51 }
 0x4ff   : > { %v5524_v56 = vadd.f32 %v5523_v38, %v5517_v46 }
 0x501   : > { %v5525_v57 = vadd.f32 %v5524_v56, %v5518_v26 }
 0x503   : > { %v5526_v47 = vrot.slane %v5525_v57, 4 }
 0x504   : > { %v5558_v58 = vpop.permute.xlu0 %5557 }
 0x505   : > { %v5527_v49 = vadd.f32 %v5526_v47, %v5525_v57  ;;  %v5563_v55 = vmul.f32 %v5558_v58, %v5539_v3 }
 0x507   : > { %v5528_v32 = vrot.slane %v5527_v49, 2  ;;  %v5566_v27 = vadd.f32 %v5565_v36, %v5563_v55 }
 0x509   : > { %v5567_v16 = vrot.slane %v5566_v27, 4  ;;  %v5529_v25 = vadd.f32 %v5528_v32, %v5527_v49 }
 0x50b   : > { %v5568_v17 = vadd.f32 %v5567_v16, %v5566_v27  ;;  %v5530_v52 = vrot.slane %v5529_v25, 1 }
 0x50d   : > { %v5569_v1 = vrot.slane %v5568_v17, 2  ;;  %v5531_v18 = vadd.f32 %v5530_v52, %v5529_v25 }
 0x50f   : > { %v5570_v21 = vadd.f32 %v5569_v1, %v5568_v17 }
 0x511   : > { %v5571_v28 = vrot.slane %v5570_v21, 1 }
 0x513   : > { %v5572_v34 = vadd.f32 %v5571_v28, %v5570_v21 }
 0x515   : > { %v5573_v7 = vadd.f32 %v5572_v34, %v5531_v18 }
 0x517   : > { %v5575_v12 = vadd.f32 %v5574_v35, %v5573_v7 }
 0x519   : > { %v5581_v63 = vsel %vm8236_vm8, %v5575_v12, -inf }
 0x51a   : > { %v5583_v31 = vsel %vm1636_vm3, %v5581_v63, -inf }
 0x51b   : > { %5584 = vmax.xlane.f32.xlu1 %v5583_v31 }
 0x58e   : > { %v5585_v40 = vpop.xlane.xlu1 %5584 }
 0x58f   : > { %v5586_v22 = vsub.f32 %v5575_v12, %v5585_v40 }
 0x591   : > { %v5587_v0 = vmul.f32 1.442695, %v5586_v22 }
 0x593   : > { %7047 = vpow2.f32 %v5587_v0 }
 0x599   : > { %v7048_v44 = vpop.eup %7047 }
 0x59a   : > { %v5589_v23 = vsel %vm8236_vm8, %v7048_v44, 0.0 }
 0x59b   : > { %v5590_v8 = vsel %vm1636_vm3, %v5589_v23, 0.0 }
 0x59c   : > { %5591 = vadd.xlane.f32.xlu2 %v5590_v8 }
 0x60f   : > { %v5592_v42 = vpop.xlane.xlu2 %5591 }
 0x610   : > { %7049 = vrcp.f32 %v5592_v42  ;;  %v5604_v9 = vand.u32 2147483648, %v5592_v42  ;;  %v5602_v39 = vand.u32 2147483647, %v5592_v42  ;;  %vm5598_vm10 = vweird.f32 %v5592_v42 }
 0x612   : > { %v5605_v19 = vor.u32 1.1754944e-38, %v5604_v9  ;;  %vm5603_vm12 = vcmp.eq.f32.partialorder %v5602_v39, 8.507059e+37 }
 0x616   : > { %v7050_v30 = vpop.eup %7049 }
 0x617   : > { %v5594_v11 = vmul.f32 %v7050_v30, %v5592_v42  ;;  %vm5599_vm9 = vweird.f32 %v7050_v30 }
 0x618   : > { %vm5600_vm11 = vmor %vm5598_vm10, %vm5599_vm9 }
 0x619   : > { %v5595_v4 = vsub.f32 1.0, %v5594_v11 }
 0x61b   : > { %v5596_v43 = vmul.f32 %v7050_v30, %v5595_v4 }
 0x61d   : > { %v5597_v59 = vadd.f32 %v7050_v30, %v5596_v43 }
 0x61f   : > { %v5601_v48 = vsel %vm5600_vm11, %v7050_v30, %v5597_v59 }
 0x620   : > { %v5606_v50 = vsel %vm5603_vm12, %v5605_v19, %v5601_v48 }
 0x621   : > { %v5607_v29 = vmul.f32 %v5606_v50, %v5589_v23 }
 0x623   : > { %v5608_v33 = vsel %vm8236_vm8, %v5607_v29, %v5575_v12 }
 0x624   : > { %5609 = vst [vmem:[%s492_s24] sm:$0x1] %v5608_v33 }
 0x625 PF: > { %s27_s27 = sadd.s32 1, %s7126_s27  }
 0x626   : > { %p24_p7 = scmp.ge.s32.totalorder %s27_s27, 4  }
 0x628   :  { %26 = sbr.rel (!%p24_p7) target bundleno = 5 (0x5), region = 118 }
 0x62d   :  { %5627 = vsyncpa [#allocation8], 1 }
 0x62e   :  { %5629 = vsyncpa [#allocation8 + $0x1], 1 }
 0x62f   :  { %5630 = vsyncpa [#allocation10], 1 }

</bundles_post_ra>
